<compile_context>
chip_gen: v7x
topology: tpu7x:2x2x1
jax: 0.10.0
libtpu: 0.0.40
codegen_flags: <defaults>
</compile_context>

<pallas_src>
import jax
import jax.numpy as jnp
from jax import lax
from jax.experimental import pallas as pl
from jax.experimental.pallas import tpu as pltpu

_EPS = 1e-5
_LANE = 128


# ------------------------------- small helpers -------------------------------

def _round_up(x, m):
    return ((x + m - 1) // m) * m


def _pad_to(a, shape):
    cfg = [(0, t - s) for s, t in zip(a.shape, shape)]
    return jnp.pad(a, cfg) if any(p for _, p in cfg) else a


def _bn_affine(gamma, beta, mean, var):
    scale = gamma / jnp.sqrt(var + _EPS)
    bias = beta - mean * scale
    return scale.astype(jnp.float32), bias.astype(jnp.float32)


# ------------------------------ fused Pallas kernel ------------------------------

def _make_fused_kernel(*, H, W, Cin, ksize, stride, padding, expand, use_residual,
                       ch, Ho, Wo, coff):
    """Builds the per-sample fused MBConv kernel (config is Python-static)."""
    k = ksize
    s = stride
    pe = 1 if expand else padding              # spatial padding present on the input block
    cbase = (coff - padding) if expand else 0  # column of the first (zero) pad column in `src`

    def kernel(*refs):
        it = iter(refs)
        x_ref = next(it)                                     # (H+2pe, W+2pe, Cin)  f32
        if expand:
            exp_w_ref = next(it)                             # (9, Cin, ch)        bf16
            exp_sc_ref = next(it)                            # (1, ch)             f32
            exp_bi_ref = next(it)
        dw_w_ref = next(it)                                  # (k*k, 1, ch)        f32
        dw_sc_ref = next(it)                                 # (1, ch)
        dw_bi_ref = next(it)
        se_w1_ref = next(it)                                 # (ch, rp)            f32
        se_b1_ref = next(it)                                 # (1, rp)
        se_w2_ref = next(it)                                 # (rp, ch)
        se_b2_ref = next(it)                                 # (1, ch)
        pw_w_ref = next(it)                                  # (ch, cop)           bf16
        pw_sc_ref = next(it)                                 # (1, cop)
        pw_bi_ref = next(it)
        eye_ref = next(it) if use_residual else None         # (Cin, cop)          f32
        out_ref = next(it)                                   # (Ho*Wo, cop)        f32
        buf_ref = next(it) if expand else None               # VMEM scratch (expand only)

        # ---- expand 3x3 / s1 / p1 conv + BN + SiLU: 9 MXU taps, bf16 x bf16 -> f32 acc ----
        if expand:
            acc = jnp.zeros((H * W, ch), jnp.float32)
            for a in range(3):
                for b in range(3):
                    tap = x_ref[a:a + H, b:b + W, :].reshape(H * W, Cin)
                    acc = acc + jnp.dot(tap.astype(jnp.bfloat16), exp_w_ref[a * 3 + b],
                                        preferred_element_type=jnp.float32)
            hact = acc * exp_sc_ref[...] + exp_bi_ref[...]
            hact = hact * jax.nn.sigmoid(hact)               # SiLU
            # Stage into a zero-padded VMEM buffer; interior column offset `coff` keeps the
            # store sublane-tile aligned. Depthwise taps are then plain in-VMEM slices.
            buf_ref[...] = jnp.zeros(buf_ref.shape, jnp.float32)
            buf_ref[padding:padding + H, coff:coff + W, :] = hact.reshape(H, W, ch)
            src = buf_ref
        else:
            src = x_ref                                      # already zero-padded by `padding`

        # ---------------- depthwise kxk conv + BN + SiLU (VPU, f32) ----------------
        dacc = jnp.zeros((Ho * Wo, ch), jnp.float32)
        for a in range(k):
            for b in range(k):
                if s == 1:
                    tap = src[a:a + Ho, cbase + b:cbase + b + Wo, :]
                else:
                    tap = src[pl.ds(a, Ho, s), pl.ds(cbase + b, Wo, s), :]
                dacc = dacc + tap.reshape(Ho * Wo, ch) * dw_w_ref[a * k + b]
        d = dacc * dw_sc_ref[...] + dw_bi_ref[...]
        d = d * jax.nn.sigmoid(d)                            # (Ho*Wo, ch)

        # ---- squeeze-excitation, fused: pool straight from VMEM (no HBM re-read of d) ----
        pooled = jnp.mean(d, axis=0, keepdims=True)          # (1, ch)
        p8 = jnp.broadcast_to(pooled, (8, ch))               # MXU-friendly M
        h1 = jnp.dot(p8, se_w1_ref[...], preferred_element_type=jnp.float32) + se_b1_ref[...]
        h1 = h1 * jax.nn.sigmoid(h1)                         # SiLU
        s2 = jnp.dot(h1, se_w2_ref[...], preferred_element_type=jnp.float32) + se_b2_ref[...]
        gate = jax.nn.sigmoid(s2[0:1, :])                    # (1, ch)

        # ---- SE scale + 1x1 pointwise conv (bf16 MXU) + BN (+ residual); lane-dense store ----
        y = jnp.dot((d * gate).astype(jnp.bfloat16), pw_w_ref[...],
                    preferred_element_type=jnp.float32)      # (Ho*Wo, cop)
        y = y * pw_sc_ref[...] + pw_bi_ref[...]
        if use_residual:
            res = x_ref[pe:pe + H, pe:pe + W, :].reshape(H * W, Cin)
            # lane-pad the Cin-wide residual to cop via a tiny identity matmul (keeps the add fused)
            y = y + jnp.dot(res, eye_ref[...], preferred_element_type=jnp.float32)
        out_ref[...] = y

    return kernel


# ------------------------------ forward wrapper ------------------------------

def inverted_residual_block(x_nchw, p, *, kernel_size, stride, padding, expand_ratio):
    N, Cin, H, W = x_nchw.shape
    hidden = Cin * expand_ratio
    Cout = p['pw_w'].shape[0]
    expand = hidden != Cin
    use_residual = (Cin == Cout) and (stride == 1)
    k = kernel_size
    Ho = (H + 2 * padding - k) // stride + 1
    Wo = (W + 2 * padding - k) // stride + 1

    ch = _round_up(hidden, _LANE) if expand else hidden      # lane-padded hidden channels
    rp = _round_up(p['se_w1'].shape[0], _LANE)               # lane-padded SE reduced dim
    cop = _round_up(Cout, _LANE)                             # lane-padded output channels
    coff = _round_up(padding, 8) if expand else 0            # aligned interior column offset

    # NCHW -> NHWC once at the boundary (module API is NCHW); channels map to the lane axis.
    x = jnp.transpose(x_nchw, (0, 2, 3, 1)).astype(jnp.float32)
    pe = 1 if expand else padding
    xp = jnp.pad(x, ((0, 0), (pe, pe), (pe, pe), (0, 0)))
    Hx, Wx = H + 2 * pe, W + 2 * pe

    inputs = [xp]
    in_specs = [pl.BlockSpec((None, Hx, Wx, Cin), lambda n: (n, 0, 0, 0))]

    def add_const(arr):
        # grid-invariant block: loaded once, stays resident across grid steps
        inputs.append(arr)
        nd = arr.ndim
        in_specs.append(pl.BlockSpec(arr.shape, lambda n, _nd=nd: (0,) * _nd))

    if expand:
        w_exp = jnp.transpose(p['exp_w'], (2, 3, 1, 0)).reshape(9, Cin, hidden)
        add_const(_pad_to(w_exp, (9, Cin, ch)).astype(jnp.bfloat16))
        sc, bi = _bn_affine(p['exp_bn_g'], p['exp_bn_b'], p['exp_bn_m'], p['exp_bn_v'])
        add_const(_pad_to(sc.reshape(1, hidden), (1, ch)))
        add_const(_pad_to(bi.reshape(1, hidden), (1, ch)))

    w_dw = p['dw_w'].reshape(hidden, k * k).T.reshape(k * k, 1, hidden)
    add_const(_pad_to(w_dw, (k * k, 1, ch)).astype(jnp.float32))
    sc, bi = _bn_affine(p['dw_bn_g'], p['dw_bn_b'], p['dw_bn_m'], p['dw_bn_v'])
    add_const(_pad_to(sc.reshape(1, hidden), (1, ch)))
    add_const(_pad_to(bi.reshape(1, hidden), (1, ch)))

    reduced = p['se_w1'].shape[0]
    w1 = p['se_w1'].reshape(reduced, hidden).T               # (hidden, reduced)
    w2 = p['se_w2'].reshape(hidden, reduced).T               # (reduced, hidden)
    add_const(_pad_to(w1, (ch, rp)).astype(jnp.float32))
    add_const(_pad_to(p['se_b1'].reshape(1, reduced), (1, rp)))
    add_const(_pad_to(w2, (rp, ch)).astype(jnp.float32))
    add_const(_pad_to(p['se_b2'].reshape(1, hidden), (1, ch)))

    w_pw = p['pw_w'].reshape(Cout, hidden).T                 # (hidden, Cout)
    add_const(_pad_to(w_pw, (ch, cop)).astype(jnp.bfloat16))
    sc, bi = _bn_affine(p['pw_bn_g'], p['pw_bn_b'], p['pw_bn_m'], p['pw_bn_v'])
    add_const(_pad_to(sc.reshape(1, Cout), (1, cop)))
    add_const(_pad_to(bi.reshape(1, Cout), (1, cop)))

    if use_residual:
        add_const(jnp.eye(Cin, cop, dtype=jnp.float32))

    kernel = _make_fused_kernel(H=H, W=W, Cin=Cin, ksize=k, stride=stride, padding=padding,
                                expand=expand, use_residual=use_residual,
                                ch=ch, Ho=Ho, Wo=Wo, coff=coff)

    scratch = ([pltpu.VMEM((H + 2 * padding, coff + W + padding, ch), jnp.float32)]
               if expand else [])

    out_flat = pl.pallas_call(
        kernel,
        out_shape=jax.ShapeDtypeStruct((N, Ho * Wo, cop), jnp.float32),
        grid=(N,),
        in_specs=in_specs,
        out_specs=pl.BlockSpec((None, Ho * Wo, cop), lambda n: (n, 0, 0)),
        scratch_shapes=scratch,
        compiler_params=pltpu.CompilerParams(
            dimension_semantics=("parallel",),          # shard samples across TensorCores
            vmem_limit_bytes=32 * 1024 * 1024),         # safe on v5e/v6e/v7x (64 MiB phys)
    )(*inputs)

    out = out_flat[:, :, :Cout].reshape(N, Ho, Wo, Cout)
    return jnp.transpose(out, (0, 3, 1, 2))              # back to NCHW to match the PyTorch module


# --------------------------- deterministic params ---------------------------

def init_params(key, in_channels, out_channels, kernel_size, expand_ratio, reduction):
    hidden = in_channels * expand_ratio
    reduced = int(in_channels / reduction)
    ks = jax.random.split(key, 19)

    def w(k_, shape, s=0.1):
        return (s * jax.random.normal(k_, shape)).astype(jnp.float32)

    def bn(k0, k1, k2, k3, c):
        return {
            'g': (1.0 + 0.1 * jax.random.normal(k0, (c,))).astype(jnp.float32),
            'b': w(k1, (c,)),
            'm': w(k2, (c,)),
            'v': jax.random.uniform(k3, (c,), minval=0.5, maxval=1.5).astype(jnp.float32),
        }

    p = {}
    p['exp_w'] = w(ks[0], (hidden, in_channels, 3, 3))
    b = bn(ks[1], ks[2], ks[3], ks[4], hidden)
    p['exp_bn_g'], p['exp_bn_b'], p['exp_bn_m'], p['exp_bn_v'] = b['g'], b['b'], b['m'], b['v']

    p['dw_w'] = w(ks[5], (hidden, 1, kernel_size, kernel_size))
    b = bn(ks[6], ks[7], ks[8], ks[9], hidden)
    p['dw_bn_g'], p['dw_bn_b'], p['dw_bn_m'], p['dw_bn_v'] = b['g'], b['b'], b['m'], b['v']

    p['se_w1'] = w(ks[10], (reduced, hidden, 1, 1))
    p['se_b1'] = w(ks[11], (reduced,))
    p['se_w2'] = w(ks[12], (hidden, reduced, 1, 1))
    p['se_b2'] = w(ks[13], (hidden,))

    p['pw_w'] = w(ks[14], (out_channels, hidden, 1, 1))
    b = bn(ks[15], ks[16], ks[17], ks[18], out_channels)
    p['pw_bn_g'], p['pw_bn_b'], p['pw_bn_m'], p['pw_bn_v'] = b['g'], b['b'], b['m'], b['v']
    return p


# ------------------------- pure-JAX reference (NCHW) -------------------------

def reference_forward(x, p, kernel_size, stride, padding, expand_ratio):
    def bn(y, g, b, m, v):
        return (y - m[None, :, None, None]) / jnp.sqrt(v[None, :, None, None] + _EPS) \
               * g[None, :, None, None] + b[None, :, None, None]

    def silu(y):
        return y * jax.nn.sigmoid(y)

    Cin = x.shape[1]
    hidden = Cin * expand_ratio
    dn = ('NCHW', 'OIHW', 'NCHW')
    h = x
    if hidden != Cin:
        h = lax.conv_general_dilated(x, p['exp_w'], (1, 1), ((1, 1), (1, 1)),
                                     dimension_numbers=dn)
        h = silu(bn(h, p['exp_bn_g'], p['exp_bn_b'], p['exp_bn_m'], p['exp_bn_v']))
    d = lax.conv_general_dilated(h, p['dw_w'], (stride, stride),
                                 ((padding, padding), (padding, padding)),
                                 dimension_numbers=dn, feature_group_count=hidden)
    d = silu(bn(d, p['dw_bn_g'], p['dw_bn_b'], p['dw_bn_m'], p['dw_bn_v']))
    pooled = jnp.mean(d, axis=(2, 3))
    W1 = p['se_w1'].reshape(-1, hidden)
    W2 = p['se_w2'].reshape(hidden, -1)
    s = pooled @ W1.T + p['se_b1'][None]
    s = silu(s)
    s = s @ W2.T + p['se_b2'][None]
    s = jax.nn.sigmoid(s)
    d = d * s[:, :, None, None]
    Wp = p['pw_w'].reshape(-1, hidden)
    y = jnp.einsum('nchw,oc->nohw', d, Wp)
    y = bn(y, p['pw_bn_g'], p['pw_bn_b'], p['pw_bn_m'], p['pw_bn_v'])
    if x.shape[1] == y.shape[1] and stride == 1:
        y = y + x
    return y


# ----------------------------------- main ------------------------------------

if __name__ == "__main__":
    key = jax.random.PRNGKey(0)
    kx, kp = jax.random.split(key)

    N, Cin, H, W = 2, 4, 16, 16
    Cout, ksize, stride, padding = 4, 3, 1, 1
    expand_ratio, reduction = 6, 4            # hidden=24, reduced=1, residual path active

    x = jax.random.normal(kx, (N, Cin, H, W), jnp.float32)
    params = init_params(kp, Cin, Cout, ksize, expand_ratio, reduction)

    out = inverted_residual_block(x, params, kernel_size=ksize, stride=stride,
                                  padding=padding, expand_ratio=expand_ratio)
    out = jax.block_until_ready(out)

    ref = reference_forward(x, params, ksize, stride, padding, expand_ratio)
    assert out.shape == ref.shape == (N, Cout, H, W), (out.shape, ref.shape)
    max_err = float(jnp.max(jnp.abs(out - ref)))
    assert max_err < 5e-2, f"max abs err too large: {max_err}"

    print("KERNEL_OK")
</pallas_src>

<mosaic_0001>
module attributes {stable_mosaic.version = 11 : i64} {
  func.func @kernel(%arg0: i32, %arg1: memref<1x18x18x4xf32, #tpu.memory_space<vmem>>, %arg2: memref<9x4x128xbf16, #tpu.memory_space<vmem>>, %arg3: memref<1x128xf32, #tpu.memory_space<vmem>>, %arg4: memref<1x128xf32, #tpu.memory_space<vmem>>, %arg5: memref<9x1x128xf32, #tpu.memory_space<vmem>>, %arg6: memref<1x128xf32, #tpu.memory_space<vmem>>, %arg7: memref<1x128xf32, #tpu.memory_space<vmem>>, %arg8: memref<128x128xf32, #tpu.memory_space<vmem>>, %arg9: memref<1x128xf32, #tpu.memory_space<vmem>>, %arg10: memref<128x128xf32, #tpu.memory_space<vmem>>, %arg11: memref<1x128xf32, #tpu.memory_space<vmem>>, %arg12: memref<128x128xbf16, #tpu.memory_space<vmem>>, %arg13: memref<1x128xf32, #tpu.memory_space<vmem>>, %arg14: memref<1x128xf32, #tpu.memory_space<vmem>>, %arg15: memref<4x128xf32, #tpu.memory_space<vmem>>, %arg16: memref<1x256x128xf32, #tpu.memory_space<vmem>>, %arg17: memref<18x25x128xf32, #tpu.memory_space<vmem>>) attributes {dimension_semantics = [#tpu.dimension_semantics<parallel>], iteration_bounds = array<i64: 2>, scalar_prefetch = 0 : i64, scratch_operands = 1 : i64, tpu.core_type = #tpu.core_type<tc>, window_params = [{transform_indices = @transform_0, window_bounds = array<i64: 1, 18, 18, 4>}, {pipeline_mode = #tpu.pipeline_mode<synchronous>, transform_indices = @transform_1, window_bounds = array<i64: 9, 4, 128>}, {pipeline_mode = #tpu.pipeline_mode<synchronous>, transform_indices = @transform_2, window_bounds = array<i64: 1, 128>}, {pipeline_mode = #tpu.pipeline_mode<synchronous>, transform_indices = @transform_3, window_bounds = array<i64: 1, 128>}, {pipeline_mode = #tpu.pipeline_mode<synchronous>, transform_indices = @transform_4, window_bounds = array<i64: 9, 1, 128>}, {pipeline_mode = #tpu.pipeline_mode<synchronous>, transform_indices = @transform_5, window_bounds = array<i64: 1, 128>}, {pipeline_mode = #tpu.pipeline_mode<synchronous>, transform_indices = @transform_6, window_bounds = array<i64: 1, 128>}, {pipeline_mode = #tpu.pipeline_mode<synchronous>, transform_indices = @transform_7, window_bounds = array<i64: 128, 128>}, {pipeline_mode = #tpu.pipeline_mode<synchronous>, transform_indices = @transform_8, window_bounds = array<i64: 1, 128>}, {pipeline_mode = #tpu.pipeline_mode<synchronous>, transform_indices = @transform_9, window_bounds = array<i64: 128, 128>}, {pipeline_mode = #tpu.pipeline_mode<synchronous>, transform_indices = @transform_10, window_bounds = array<i64: 1, 128>}, {pipeline_mode = #tpu.pipeline_mode<synchronous>, transform_indices = @transform_11, window_bounds = array<i64: 128, 128>}, {pipeline_mode = #tpu.pipeline_mode<synchronous>, transform_indices = @transform_12, window_bounds = array<i64: 1, 128>}, {pipeline_mode = #tpu.pipeline_mode<synchronous>, transform_indices = @transform_13, window_bounds = array<i64: 1, 128>}, {pipeline_mode = #tpu.pipeline_mode<synchronous>, transform_indices = @transform_14, window_bounds = array<i64: 4, 128>}, {transform_indices = @transform_15, window_bounds = array<i64: 1, 256, 128>}]} {
    %cst = arith.constant 0.000000e+00 : f32
    %0 = vector.broadcast %cst : f32 to vector<256x128xf32>
    %c0 = arith.constant 0 : index
    %c0_0 = arith.constant 0 : index
    %c0_1 = arith.constant 0 : index
    %c0_2 = arith.constant 0 : index
    %1 = vector.load %arg1[%c0, %c0_0, %c0_1, %c0_2] : memref<1x18x18x4xf32, #tpu.memory_space<vmem>>, vector<1x16x16x4xf32>
    %2 = vector.shape_cast %1 : vector<1x16x16x4xf32> to vector<16x16x4xf32>
    %3 = vector.shape_cast %2 : vector<16x16x4xf32> to vector<256x4xf32>
    %4 = arith.truncf %3 : vector<256x4xf32> to vector<256x4xbf16>
    %c0_3 = arith.constant 0 : index
    %c0_4 = arith.constant 0 : index
    %c0_5 = arith.constant 0 : index
    %5 = vector.load %arg2[%c0_3, %c0_4, %c0_5] : memref<9x4x128xbf16, #tpu.memory_space<vmem>>, vector<1x4x128xbf16>
    %6 = vector.shape_cast %5 : vector<1x4x128xbf16> to vector<4x128xbf16>
    %cst_6 = arith.constant dense<0.000000e+00> : vector<256x128xf32>
    %7 = tpu.matmul %4, %6, %cst_6 {dimension_numbers = #tpu.dot_dimension_numbers<[1], [0], [0], [1], [0, 0, 1, 1], [], []>} : vector<256x4xbf16>, vector<4x128xbf16>, vector<256x128xf32> -> vector<256x128xf32>
    %8 = arith.addf %0, %7 : vector<256x128xf32>
    %c0_7 = arith.constant 0 : index
    %c0_8 = arith.constant 0 : index
    %c1 = arith.constant 1 : index
    %c0_9 = arith.constant 0 : index
    %9 = vector.load %arg1[%c0_7, %c0_8, %c1, %c0_9] : memref<1x18x18x4xf32, #tpu.memory_space<vmem>>, vector<1x16x16x4xf32>
    %10 = vector.shape_cast %9 : vector<1x16x16x4xf32> to vector<16x16x4xf32>
    %11 = vector.shape_cast %10 : vector<16x16x4xf32> to vector<256x4xf32>
    %12 = arith.truncf %11 : vector<256x4xf32> to vector<256x4xbf16>
    %c1_10 = arith.constant 1 : index
    %c0_11 = arith.constant 0 : index
    %c0_12 = arith.constant 0 : index
    %13 = vector.load %arg2[%c1_10, %c0_11, %c0_12] : memref<9x4x128xbf16, #tpu.memory_space<vmem>>, vector<1x4x128xbf16>
    %14 = vector.shape_cast %13 : vector<1x4x128xbf16> to vector<4x128xbf16>
    %cst_13 = arith.constant dense<0.000000e+00> : vector<256x128xf32>
    %15 = tpu.matmul %12, %14, %cst_13 {dimension_numbers = #tpu.dot_dimension_numbers<[1], [0], [0], [1], [0, 0, 1, 1], [], []>} : vector<256x4xbf16>, vector<4x128xbf16>, vector<256x128xf32> -> vector<256x128xf32>
    %16 = arith.addf %8, %15 : vector<256x128xf32>
    %c0_14 = arith.constant 0 : index
    %c0_15 = arith.constant 0 : index
    %c2 = arith.constant 2 : index
    %c0_16 = arith.constant 0 : index
    %17 = vector.load %arg1[%c0_14, %c0_15, %c2, %c0_16] : memref<1x18x18x4xf32, #tpu.memory_space<vmem>>, vector<1x16x16x4xf32>
    %18 = vector.shape_cast %17 : vector<1x16x16x4xf32> to vector<16x16x4xf32>
    %19 = vector.shape_cast %18 : vector<16x16x4xf32> to vector<256x4xf32>
    %20 = arith.truncf %19 : vector<256x4xf32> to vector<256x4xbf16>
    %c2_17 = arith.constant 2 : index
    %c0_18 = arith.constant 0 : index
    %c0_19 = arith.constant 0 : index
    %21 = vector.load %arg2[%c2_17, %c0_18, %c0_19] : memref<9x4x128xbf16, #tpu.memory_space<vmem>>, vector<1x4x128xbf16>
    %22 = vector.shape_cast %21 : vector<1x4x128xbf16> to vector<4x128xbf16>
    %cst_20 = arith.constant dense<0.000000e+00> : vector<256x128xf32>
    %23 = tpu.matmul %20, %22, %cst_20 {dimension_numbers = #tpu.dot_dimension_numbers<[1], [0], [0], [1], [0, 0, 1, 1], [], []>} : vector<256x4xbf16>, vector<4x128xbf16>, vector<256x128xf32> -> vector<256x128xf32>
    %24 = arith.addf %16, %23 : vector<256x128xf32>
    %c0_21 = arith.constant 0 : index
    %c1_22 = arith.constant 1 : index
    %c0_23 = arith.constant 0 : index
    %c0_24 = arith.constant 0 : index
    %25 = vector.load %arg1[%c0_21, %c1_22, %c0_23, %c0_24] : memref<1x18x18x4xf32, #tpu.memory_space<vmem>>, vector<1x16x16x4xf32>
    %26 = vector.shape_cast %25 : vector<1x16x16x4xf32> to vector<16x16x4xf32>
    %27 = vector.shape_cast %26 : vector<16x16x4xf32> to vector<256x4xf32>
    %28 = arith.truncf %27 : vector<256x4xf32> to vector<256x4xbf16>
    %c3 = arith.constant 3 : index
    %c0_25 = arith.constant 0 : index
    %c0_26 = arith.constant 0 : index
    %29 = vector.load %arg2[%c3, %c0_25, %c0_26] : memref<9x4x128xbf16, #tpu.memory_space<vmem>>, vector<1x4x128xbf16>
    %30 = vector.shape_cast %29 : vector<1x4x128xbf16> to vector<4x128xbf16>
    %cst_27 = arith.constant dense<0.000000e+00> : vector<256x128xf32>
    %31 = tpu.matmul %28, %30, %cst_27 {dimension_numbers = #tpu.dot_dimension_numbers<[1], [0], [0], [1], [0, 0, 1, 1], [], []>} : vector<256x4xbf16>, vector<4x128xbf16>, vector<256x128xf32> -> vector<256x128xf32>
    %32 = arith.addf %24, %31 : vector<256x128xf32>
    %c0_28 = arith.constant 0 : index
    %c1_29 = arith.constant 1 : index
    %c1_30 = arith.constant 1 : index
    %c0_31 = arith.constant 0 : index
    %33 = vector.load %arg1[%c0_28, %c1_29, %c1_30, %c0_31] : memref<1x18x18x4xf32, #tpu.memory_space<vmem>>, vector<1x16x16x4xf32>
    %34 = vector.shape_cast %33 : vector<1x16x16x4xf32> to vector<16x16x4xf32>
    %35 = vector.shape_cast %34 : vector<16x16x4xf32> to vector<256x4xf32>
    %36 = arith.truncf %35 : vector<256x4xf32> to vector<256x4xbf16>
    %c4 = arith.constant 4 : index
    %c0_32 = arith.constant 0 : index
    %c0_33 = arith.constant 0 : index
    %37 = vector.load %arg2[%c4, %c0_32, %c0_33] : memref<9x4x128xbf16, #tpu.memory_space<vmem>>, vector<1x4x128xbf16>
    %38 = vector.shape_cast %37 : vector<1x4x128xbf16> to vector<4x128xbf16>
    %cst_34 = arith.constant dense<0.000000e+00> : vector<256x128xf32>
    %39 = tpu.matmul %36, %38, %cst_34 {dimension_numbers = #tpu.dot_dimension_numbers<[1], [0], [0], [1], [0, 0, 1, 1], [], []>} : vector<256x4xbf16>, vector<4x128xbf16>, vector<256x128xf32> -> vector<256x128xf32>
    %40 = arith.addf %32, %39 : vector<256x128xf32>
    %c0_35 = arith.constant 0 : index
    %c1_36 = arith.constant 1 : index
    %c2_37 = arith.constant 2 : index
    %c0_38 = arith.constant 0 : index
    %41 = vector.load %arg1[%c0_35, %c1_36, %c2_37, %c0_38] : memref<1x18x18x4xf32, #tpu.memory_space<vmem>>, vector<1x16x16x4xf32>
    %42 = vector.shape_cast %41 : vector<1x16x16x4xf32> to vector<16x16x4xf32>
    %43 = vector.shape_cast %42 : vector<16x16x4xf32> to vector<256x4xf32>
    %44 = arith.truncf %43 : vector<256x4xf32> to vector<256x4xbf16>
    %c5 = arith.constant 5 : index
    %c0_39 = arith.constant 0 : index
    %c0_40 = arith.constant 0 : index
    %45 = vector.load %arg2[%c5, %c0_39, %c0_40] : memref<9x4x128xbf16, #tpu.memory_space<vmem>>, vector<1x4x128xbf16>
    %46 = vector.shape_cast %45 : vector<1x4x128xbf16> to vector<4x128xbf16>
    %cst_41 = arith.constant dense<0.000000e+00> : vector<256x128xf32>
    %47 = tpu.matmul %44, %46, %cst_41 {dimension_numbers = #tpu.dot_dimension_numbers<[1], [0], [0], [1], [0, 0, 1, 1], [], []>} : vector<256x4xbf16>, vector<4x128xbf16>, vector<256x128xf32> -> vector<256x128xf32>
    %48 = arith.addf %40, %47 : vector<256x128xf32>
    %c0_42 = arith.constant 0 : index
    %c2_43 = arith.constant 2 : index
    %c0_44 = arith.constant 0 : index
    %c0_45 = arith.constant 0 : index
    %49 = vector.load %arg1[%c0_42, %c2_43, %c0_44, %c0_45] : memref<1x18x18x4xf32, #tpu.memory_space<vmem>>, vector<1x16x16x4xf32>
    %50 = vector.shape_cast %49 : vector<1x16x16x4xf32> to vector<16x16x4xf32>
    %51 = vector.shape_cast %50 : vector<16x16x4xf32> to vector<256x4xf32>
    %52 = arith.truncf %51 : vector<256x4xf32> to vector<256x4xbf16>
    %c6 = arith.constant 6 : index
    %c0_46 = arith.constant 0 : index
    %c0_47 = arith.constant 0 : index
    %53 = vector.load %arg2[%c6, %c0_46, %c0_47] : memref<9x4x128xbf16, #tpu.memory_space<vmem>>, vector<1x4x128xbf16>
    %54 = vector.shape_cast %53 : vector<1x4x128xbf16> to vector<4x128xbf16>
    %cst_48 = arith.constant dense<0.000000e+00> : vector<256x128xf32>
    %55 = tpu.matmul %52, %54, %cst_48 {dimension_numbers = #tpu.dot_dimension_numbers<[1], [0], [0], [1], [0, 0, 1, 1], [], []>} : vector<256x4xbf16>, vector<4x128xbf16>, vector<256x128xf32> -> vector<256x128xf32>
    %56 = arith.addf %48, %55 : vector<256x128xf32>
    %c0_49 = arith.constant 0 : index
    %c2_50 = arith.constant 2 : index
    %c1_51 = arith.constant 1 : index
    %c0_52 = arith.constant 0 : index
    %57 = vector.load %arg1[%c0_49, %c2_50, %c1_51, %c0_52] : memref<1x18x18x4xf32, #tpu.memory_space<vmem>>, vector<1x16x16x4xf32>
    %58 = vector.shape_cast %57 : vector<1x16x16x4xf32> to vector<16x16x4xf32>
    %59 = vector.shape_cast %58 : vector<16x16x4xf32> to vector<256x4xf32>
    %60 = arith.truncf %59 : vector<256x4xf32> to vector<256x4xbf16>
    %c7 = arith.constant 7 : index
    %c0_53 = arith.constant 0 : index
    %c0_54 = arith.constant 0 : index
    %61 = vector.load %arg2[%c7, %c0_53, %c0_54] : memref<9x4x128xbf16, #tpu.memory_space<vmem>>, vector<1x4x128xbf16>
    %62 = vector.shape_cast %61 : vector<1x4x128xbf16> to vector<4x128xbf16>
    %cst_55 = arith.constant dense<0.000000e+00> : vector<256x128xf32>
    %63 = tpu.matmul %60, %62, %cst_55 {dimension_numbers = #tpu.dot_dimension_numbers<[1], [0], [0], [1], [0, 0, 1, 1], [], []>} : vector<256x4xbf16>, vector<4x128xbf16>, vector<256x128xf32> -> vector<256x128xf32>
    %64 = arith.addf %56, %63 : vector<256x128xf32>
    %c0_56 = arith.constant 0 : index
    %c2_57 = arith.constant 2 : index
    %c2_58 = arith.constant 2 : index
    %c0_59 = arith.constant 0 : index
    %65 = vector.load %arg1[%c0_56, %c2_57, %c2_58, %c0_59] : memref<1x18x18x4xf32, #tpu.memory_space<vmem>>, vector<1x16x16x4xf32>
    %66 = vector.shape_cast %65 : vector<1x16x16x4xf32> to vector<16x16x4xf32>
    %67 = vector.shape_cast %66 : vector<16x16x4xf32> to vector<256x4xf32>
    %68 = arith.truncf %67 : vector<256x4xf32> to vector<256x4xbf16>
    %c8 = arith.constant 8 : index
    %c0_60 = arith.constant 0 : index
    %c0_61 = arith.constant 0 : index
    %69 = vector.load %arg2[%c8, %c0_60, %c0_61] : memref<9x4x128xbf16, #tpu.memory_space<vmem>>, vector<1x4x128xbf16>
    %70 = vector.shape_cast %69 : vector<1x4x128xbf16> to vector<4x128xbf16>
    %cst_62 = arith.constant dense<0.000000e+00> : vector<256x128xf32>
    %71 = tpu.matmul %68, %70, %cst_62 {dimension_numbers = #tpu.dot_dimension_numbers<[1], [0], [0], [1], [0, 0, 1, 1], [], []>} : vector<256x4xbf16>, vector<4x128xbf16>, vector<256x128xf32> -> vector<256x128xf32>
    %72 = arith.addf %64, %71 : vector<256x128xf32>
    %c0_63 = arith.constant 0 : index
    %c0_64 = arith.constant 0 : index
    %73 = vector.load %arg3[%c0_63, %c0_64] : memref<1x128xf32, #tpu.memory_space<vmem>>, vector<1x128xf32>
    %74 = vector.broadcast %73 : vector<1x128xf32> to vector<256x128xf32>
    %75 = arith.mulf %72, %74 : vector<256x128xf32>
    %c0_65 = arith.constant 0 : index
    %c0_66 = arith.constant 0 : index
    %76 = vector.load %arg4[%c0_65, %c0_66] : memref<1x128xf32, #tpu.memory_space<vmem>>, vector<1x128xf32>
    %77 = vector.broadcast %76 : vector<1x128xf32> to vector<256x128xf32>
    %78 = arith.addf %75, %77 : vector<256x128xf32>
    %79 = arith.negf %78 : vector<256x128xf32>
    %80 = math.exp %79 : vector<256x128xf32>
    %cst_67 = arith.constant 1.000000e+00 : f32
    %81 = vector.broadcast %cst_67 : f32 to vector<256x128xf32>
    %82 = arith.addf %81, %80 : vector<256x128xf32>
    %83 = arith.divf %81, %82 : vector<256x128xf32>
    %84 = arith.mulf %78, %83 : vector<256x128xf32>
    %cst_68 = arith.constant 0.000000e+00 : f32
    %85 = vector.broadcast %cst_68 : f32 to vector<18x25x128xf32>
    %c0_69 = arith.constant 0 : index
    %c0_70 = arith.constant 0 : index
    %c0_71 = arith.constant 0 : index
    %86 = vector.load %arg17[%c0_69, %c0_70, %c0_71] : memref<18x25x128xf32, #tpu.memory_space<vmem>>, vector<18x25x128xf32>
    tpu.vector_store %arg17[%c0_69, %c0_70, %c0_71], %85 {strides = array<i32>} : memref<18x25x128xf32, #tpu.memory_space<vmem>>, vector<18x25x128xf32>,
    %87 = vector.shape_cast %84 : vector<256x128xf32> to vector<16x16x128xf32>
    %c1_72 = arith.constant 1 : index
    %c8_73 = arith.constant 8 : index
    %c0_74 = arith.constant 0 : index
    %88 = vector.load %arg17[%c1_72, %c8_73, %c0_74] : memref<18x25x128xf32, #tpu.memory_space<vmem>>, vector<16x16x128xf32>
    tpu.vector_store %arg17[%c1_72, %c8_73, %c0_74], %87 {strides = array<i32>} : memref<18x25x128xf32, #tpu.memory_space<vmem>>, vector<16x16x128xf32>,
    %cst_75 = arith.constant 0.000000e+00 : f32
    %89 = vector.broadcast %cst_75 : f32 to vector<256x128xf32>
    %c0_76 = arith.constant 0 : index
    %c7_77 = arith.constant 7 : index
    %c0_78 = arith.constant 0 : index
    %90 = vector.load %arg17[%c0_76, %c7_77, %c0_78] : memref<18x25x128xf32, #tpu.memory_space<vmem>>, vector<16x16x128xf32>
    %91 = vector.shape_cast %90 : vector<16x16x128xf32> to vector<256x128xf32>
    %c0_79 = arith.constant 0 : index
    %c0_80 = arith.constant 0 : index
    %c0_81 = arith.constant 0 : index
    %92 = vector.load %arg5[%c0_79, %c0_80, %c0_81] : memref<9x1x128xf32, #tpu.memory_space<vmem>>, vector<1x1x128xf32>
    %93 = vector.shape_cast %92 : vector<1x1x128xf32> to vector<1x128xf32>
    %94 = vector.broadcast %93 : vector<1x128xf32> to vector<256x128xf32>
    %95 = arith.mulf %91, %94 : vector<256x128xf32>
    %96 = arith.addf %89, %95 : vector<256x128xf32>
    %c0_82 = arith.constant 0 : index
    %c8_83 = arith.constant 8 : index
    %c0_84 = arith.constant 0 : index
    %97 = vector.load %arg17[%c0_82, %c8_83, %c0_84] : memref<18x25x128xf32, #tpu.memory_space<vmem>>, vector<16x16x128xf32>
    %98 = vector.shape_cast %97 : vector<16x16x128xf32> to vector<256x128xf32>
    %c1_85 = arith.constant 1 : index
    %c0_86 = arith.constant 0 : index
    %c0_87 = arith.constant 0 : index
    %99 = vector.load %arg5[%c1_85, %c0_86, %c0_87] : memref<9x1x128xf32, #tpu.memory_space<vmem>>, vector<1x1x128xf32>
    %100 = vector.shape_cast %99 : vector<1x1x128xf32> to vector<1x128xf32>
    %101 = vector.broadcast %100 : vector<1x128xf32> to vector<256x128xf32>
    %102 = arith.mulf %98, %101 : vector<256x128xf32>
    %103 = arith.addf %96, %102 : vector<256x128xf32>
    %c0_88 = arith.constant 0 : index
    %c9 = arith.constant 9 : index
    %c0_89 = arith.constant 0 : index
    %104 = vector.load %arg17[%c0_88, %c9, %c0_89] : memref<18x25x128xf32, #tpu.memory_space<vmem>>, vector<16x16x128xf32>
    %105 = vector.shape_cast %104 : vector<16x16x128xf32> to vector<256x128xf32>
    %c2_90 = arith.constant 2 : index
    %c0_91 = arith.constant 0 : index
    %c0_92 = arith.constant 0 : index
    %106 = vector.load %arg5[%c2_90, %c0_91, %c0_92] : memref<9x1x128xf32, #tpu.memory_space<vmem>>, vector<1x1x128xf32>
    %107 = vector.shape_cast %106 : vector<1x1x128xf32> to vector<1x128xf32>
    %108 = vector.broadcast %107 : vector<1x128xf32> to vector<256x128xf32>
    %109 = arith.mulf %105, %108 : vector<256x128xf32>
    %110 = arith.addf %103, %109 : vector<256x128xf32>
    %c1_93 = arith.constant 1 : index
    %c7_94 = arith.constant 7 : index
    %c0_95 = arith.constant 0 : index
    %111 = vector.load %arg17[%c1_93, %c7_94, %c0_95] : memref<18x25x128xf32, #tpu.memory_space<vmem>>, vector<16x16x128xf32>
    %112 = vector.shape_cast %111 : vector<16x16x128xf32> to vector<256x128xf32>
    %c3_96 = arith.constant 3 : index
    %c0_97 = arith.constant 0 : index
    %c0_98 = arith.constant 0 : index
    %113 = vector.load %arg5[%c3_96, %c0_97, %c0_98] : memref<9x1x128xf32, #tpu.memory_space<vmem>>, vector<1x1x128xf32>
    %114 = vector.shape_cast %113 : vector<1x1x128xf32> to vector<1x128xf32>
    %115 = vector.broadcast %114 : vector<1x128xf32> to vector<256x128xf32>
    %116 = arith.mulf %112, %115 : vector<256x128xf32>
    %117 = arith.addf %110, %116 : vector<256x128xf32>
    %c1_99 = arith.constant 1 : index
    %c8_100 = arith.constant 8 : index
    %c0_101 = arith.constant 0 : index
    %118 = vector.load %arg17[%c1_99, %c8_100, %c0_101] : memref<18x25x128xf32, #tpu.memory_space<vmem>>, vector<16x16x128xf32>
    %119 = vector.shape_cast %118 : vector<16x16x128xf32> to vector<256x128xf32>
    %c4_102 = arith.constant 4 : index
    %c0_103 = arith.constant 0 : index
    %c0_104 = arith.constant 0 : index
    %120 = vector.load %arg5[%c4_102, %c0_103, %c0_104] : memref<9x1x128xf32, #tpu.memory_space<vmem>>, vector<1x1x128xf32>
    %121 = vector.shape_cast %120 : vector<1x1x128xf32> to vector<1x128xf32>
    %122 = vector.broadcast %121 : vector<1x128xf32> to vector<256x128xf32>
    %123 = arith.mulf %119, %122 : vector<256x128xf32>
    %124 = arith.addf %117, %123 : vector<256x128xf32>
    %c1_105 = arith.constant 1 : index
    %c9_106 = arith.constant 9 : index
    %c0_107 = arith.constant 0 : index
    %125 = vector.load %arg17[%c1_105, %c9_106, %c0_107] : memref<18x25x128xf32, #tpu.memory_space<vmem>>, vector<16x16x128xf32>
    %126 = vector.shape_cast %125 : vector<16x16x128xf32> to vector<256x128xf32>
    %c5_108 = arith.constant 5 : index
    %c0_109 = arith.constant 0 : index
    %c0_110 = arith.constant 0 : index
    %127 = vector.load %arg5[%c5_108, %c0_109, %c0_110] : memref<9x1x128xf32, #tpu.memory_space<vmem>>, vector<1x1x128xf32>
    %128 = vector.shape_cast %127 : vector<1x1x128xf32> to vector<1x128xf32>
    %129 = vector.broadcast %128 : vector<1x128xf32> to vector<256x128xf32>
    %130 = arith.mulf %126, %129 : vector<256x128xf32>
    %131 = arith.addf %124, %130 : vector<256x128xf32>
    %c2_111 = arith.constant 2 : index
    %c7_112 = arith.constant 7 : index
    %c0_113 = arith.constant 0 : index
    %132 = vector.load %arg17[%c2_111, %c7_112, %c0_113] : memref<18x25x128xf32, #tpu.memory_space<vmem>>, vector<16x16x128xf32>
    %133 = vector.shape_cast %132 : vector<16x16x128xf32> to vector<256x128xf32>
    %c6_114 = arith.constant 6 : index
    %c0_115 = arith.constant 0 : index
    %c0_116 = arith.constant 0 : index
    %134 = vector.load %arg5[%c6_114, %c0_115, %c0_116] : memref<9x1x128xf32, #tpu.memory_space<vmem>>, vector<1x1x128xf32>
    %135 = vector.shape_cast %134 : vector<1x1x128xf32> to vector<1x128xf32>
    %136 = vector.broadcast %135 : vector<1x128xf32> to vector<256x128xf32>
    %137 = arith.mulf %133, %136 : vector<256x128xf32>
    %138 = arith.addf %131, %137 : vector<256x128xf32>
    %c2_117 = arith.constant 2 : index
    %c8_118 = arith.constant 8 : index
    %c0_119 = arith.constant 0 : index
    %139 = vector.load %arg17[%c2_117, %c8_118, %c0_119] : memref<18x25x128xf32, #tpu.memory_space<vmem>>, vector<16x16x128xf32>
    %140 = vector.shape_cast %139 : vector<16x16x128xf32> to vector<256x128xf32>
    %c7_120 = arith.constant 7 : index
    %c0_121 = arith.constant 0 : index
    %c0_122 = arith.constant 0 : index
    %141 = vector.load %arg5[%c7_120, %c0_121, %c0_122] : memref<9x1x128xf32, #tpu.memory_space<vmem>>, vector<1x1x128xf32>
    %142 = vector.shape_cast %141 : vector<1x1x128xf32> to vector<1x128xf32>
    %143 = vector.broadcast %142 : vector<1x128xf32> to vector<256x128xf32>
    %144 = arith.mulf %140, %143 : vector<256x128xf32>
    %145 = arith.addf %138, %144 : vector<256x128xf32>
    %c2_123 = arith.constant 2 : index
    %c9_124 = arith.constant 9 : index
    %c0_125 = arith.constant 0 : index
    %146 = vector.load %arg17[%c2_123, %c9_124, %c0_125] : memref<18x25x128xf32, #tpu.memory_space<vmem>>, vector<16x16x128xf32>
    %147 = vector.shape_cast %146 : vector<16x16x128xf32> to vector<256x128xf32>
    %c8_126 = arith.constant 8 : index
    %c0_127 = arith.constant 0 : index
    %c0_128 = arith.constant 0 : index
    %148 = vector.load %arg5[%c8_126, %c0_127, %c0_128] : memref<9x1x128xf32, #tpu.memory_space<vmem>>, vector<1x1x128xf32>
    %149 = vector.shape_cast %148 : vector<1x1x128xf32> to vector<1x128xf32>
    %150 = vector.broadcast %149 : vector<1x128xf32> to vector<256x128xf32>
    %151 = arith.mulf %147, %150 : vector<256x128xf32>
    %152 = arith.addf %145, %151 : vector<256x128xf32>
    %c0_129 = arith.constant 0 : index
    %c0_130 = arith.constant 0 : index
    %153 = vector.load %arg6[%c0_129, %c0_130] : memref<1x128xf32, #tpu.memory_space<vmem>>, vector<1x128xf32>
    %154 = vector.broadcast %153 : vector<1x128xf32> to vector<256x128xf32>
    %155 = arith.mulf %152, %154 : vector<256x128xf32>
    %c0_131 = arith.constant 0 : index
    %c0_132 = arith.constant 0 : index
    %156 = vector.load %arg7[%c0_131, %c0_132] : memref<1x128xf32, #tpu.memory_space<vmem>>, vector<1x128xf32>
    %157 = vector.broadcast %156 : vector<1x128xf32> to vector<256x128xf32>
    %158 = arith.addf %155, %157 : vector<256x128xf32>
    %159 = arith.negf %158 : vector<256x128xf32>
    %160 = math.exp %159 : vector<256x128xf32>
    %cst_133 = arith.constant 1.000000e+00 : f32
    %161 = vector.broadcast %cst_133 : f32 to vector<256x128xf32>
    %162 = arith.addf %161, %160 : vector<256x128xf32>
    %163 = arith.divf %161, %162 : vector<256x128xf32>
    %164 = arith.mulf %158, %163 : vector<256x128xf32>
    %cst_134 = arith.constant dense<0.000000e+00> : vector<128xf32>
    %165 = vector.multi_reduction <add>, %164, %cst_134 [0] : vector<256x128xf32> to vector<128xf32>
    %166 = vector.shape_cast %165 : vector<128xf32> to vector<1x128xf32>
    %cst_135 = arith.constant 2.560000e+02 : f32
    %167 = vector.broadcast %cst_135 : f32 to vector<1x128xf32>
    %168 = arith.divf %166, %167 : vector<1x128xf32>
    %169 = vector.shape_cast %168 : vector<1x128xf32> to vector<1x128xf32>
    %170 = vector.broadcast %169 : vector<1x128xf32> to vector<8x128xf32>
    %c0_136 = arith.constant 0 : index
    %c0_137 = arith.constant 0 : index
    %171 = vector.load %arg8[%c0_136, %c0_137] : memref<128x128xf32, #tpu.memory_space<vmem>>, vector<128x128xf32>
    %cst_138 = arith.constant dense<0.000000e+00> : vector<8x128xf32>
    %172 = tpu.matmul %170, %171, %cst_138 {dimension_numbers = #tpu.dot_dimension_numbers<[1], [0], [0], [1], [0, 0, 1, 1], [], []>} : vector<8x128xf32>, vector<128x128xf32>, vector<8x128xf32> -> vector<8x128xf32>
    %c0_139 = arith.constant 0 : index
    %c0_140 = arith.constant 0 : index
    %173 = vector.load %arg9[%c0_139, %c0_140] : memref<1x128xf32, #tpu.memory_space<vmem>>, vector<1x128xf32>
    %174 = vector.broadcast %173 : vector<1x128xf32> to vector<8x128xf32>
    %175 = arith.addf %172, %174 : vector<8x128xf32>
    %176 = arith.negf %175 : vector<8x128xf32>
    %177 = math.exp %176 : vector<8x128xf32>
    %cst_141 = arith.constant 1.000000e+00 : f32
    %178 = vector.broadcast %cst_141 : f32 to vector<8x128xf32>
    %179 = arith.addf %178, %177 : vector<8x128xf32>
    %180 = arith.divf %178, %179 : vector<8x128xf32>
    %181 = arith.mulf %175, %180 : vector<8x128xf32>
    %c0_142 = arith.constant 0 : index
    %c0_143 = arith.constant 0 : index
    %182 = vector.load %arg10[%c0_142, %c0_143] : memref<128x128xf32, #tpu.memory_space<vmem>>, vector<128x128xf32>
    %cst_144 = arith.constant dense<0.000000e+00> : vector<8x128xf32>
    %183 = tpu.matmul %181, %182, %cst_144 {dimension_numbers = #tpu.dot_dimension_numbers<[1], [0], [0], [1], [0, 0, 1, 1], [], []>} : vector<8x128xf32>, vector<128x128xf32>, vector<8x128xf32> -> vector<8x128xf32>
    %c0_145 = arith.constant 0 : index
    %c0_146 = arith.constant 0 : index
    %184 = vector.load %arg11[%c0_145, %c0_146] : memref<1x128xf32, #tpu.memory_space<vmem>>, vector<1x128xf32>
    %185 = vector.broadcast %184 : vector<1x128xf32> to vector<8x128xf32>
    %186 = arith.addf %183, %185 : vector<8x128xf32>
    %187 = vector.extract_strided_slice %186 {offsets = [0, 0], sizes = [1, 128], strides = [1, 1]} : vector<8x128xf32> to vector<1x128xf32>
    %188 = arith.negf %187 : vector<1x128xf32>
    %189 = math.exp %188 : vector<1x128xf32>
    %cst_147 = arith.constant 1.000000e+00 : f32
    %190 = vector.broadcast %cst_147 : f32 to vector<1x128xf32>
    %191 = arith.addf %190, %189 : vector<1x128xf32>
    %192 = arith.divf %190, %191 : vector<1x128xf32>
    %193 = vector.broadcast %192 : vector<1x128xf32> to vector<256x128xf32>
    %194 = arith.mulf %164, %193 : vector<256x128xf32>
    %195 = arith.truncf %194 : vector<256x128xf32> to vector<256x128xbf16>
    %c0_148 = arith.constant 0 : index
    %c0_149 = arith.constant 0 : index
    %196 = vector.load %arg12[%c0_148, %c0_149] : memref<128x128xbf16, #tpu.memory_space<vmem>>, vector<128x128xbf16>
    %cst_150 = arith.constant dense<0.000000e+00> : vector<256x128xf32>
    %197 = tpu.matmul %195, %196, %cst_150 {dimension_numbers = #tpu.dot_dimension_numbers<[1], [0], [0], [1], [0, 0, 1, 1], [], []>} : vector<256x128xbf16>, vector<128x128xbf16>, vector<256x128xf32> -> vector<256x128xf32>
    %c0_151 = arith.constant 0 : index
    %c0_152 = arith.constant 0 : index
    %198 = vector.load %arg13[%c0_151, %c0_152] : memref<1x128xf32, #tpu.memory_space<vmem>>, vector<1x128xf32>
    %199 = vector.broadcast %198 : vector<1x128xf32> to vector<256x128xf32>
    %200 = arith.mulf %197, %199 : vector<256x128xf32>
    %c0_153 = arith.constant 0 : index
    %c0_154 = arith.constant 0 : index
    %201 = vector.load %arg14[%c0_153, %c0_154] : memref<1x128xf32, #tpu.memory_space<vmem>>, vector<1x128xf32>
    %202 = vector.broadcast %201 : vector<1x128xf32> to vector<256x128xf32>
    %203 = arith.addf %200, %202 : vector<256x128xf32>
    %c0_155 = arith.constant 0 : index
    %c1_156 = arith.constant 1 : index
    %c1_157 = arith.constant 1 : index
    %c0_158 = arith.constant 0 : index
    %204 = vector.load %arg1[%c0_155, %c1_156, %c1_157, %c0_158] : memref<1x18x18x4xf32, #tpu.memory_space<vmem>>, vector<1x16x16x4xf32>
    %205 = vector.shape_cast %204 : vector<1x16x16x4xf32> to vector<16x16x4xf32>
    %206 = vector.shape_cast %205 : vector<16x16x4xf32> to vector<256x4xf32>
    %c0_159 = arith.constant 0 : index
    %c0_160 = arith.constant 0 : index
    %207 = vector.load %arg15[%c0_159, %c0_160] : memref<4x128xf32, #tpu.memory_space<vmem>>, vector<4x128xf32>
    %cst_161 = arith.constant dense<0.000000e+00> : vector<256x128xf32>
    %208 = tpu.matmul %206, %207, %cst_161 {dimension_numbers = #tpu.dot_dimension_numbers<[1], [0], [0], [1], [0, 0, 1, 1], [], []>} : vector<256x4xf32>, vector<4x128xf32>, vector<256x128xf32> -> vector<256x128xf32>
    %209 = arith.addf %203, %208 : vector<256x128xf32>
    %c0_162 = arith.constant 0 : index
    %c0_163 = arith.constant 0 : index
    %c0_164 = arith.constant 0 : index
    %210 = vector.load %arg16[%c0_162, %c0_163, %c0_164] : memref<1x256x128xf32, #tpu.memory_space<vmem>>, vector<1x256x128xf32>
    %211 = vector.shape_cast %210 : vector<1x256x128xf32> to vector<256x128xf32>
    %212 = vector.shape_cast %209 : vector<256x128xf32> to vector<1x256x128xf32>
    tpu.vector_store %arg16[%c0_162, %c0_163, %c0_164], %212 {strides = array<i32>} : memref<1x256x128xf32, #tpu.memory_space<vmem>>, vector<1x256x128xf32>,
    return
  }
  func.func @transform_0(%arg0: i32) -> (i32, i32, i32, i32) {
    %c0_i32 = arith.constant 0 : i32
    %c0_i32_0 = arith.constant 0 : i32
    %c0_i32_1 = arith.constant 0 : i32
    %c0_i32_2 = arith.constant 0 : i32
    return %arg0, %c0_i32, %c0_i32_0, %c0_i32_1 : i32, i32, i32, i32
  }
  func.func @transform_1(%arg0: i32) -> (i32, i32, i32) {
    %c0_i32 = arith.constant 0 : i32
    %c0_i32_0 = arith.constant 0 : i32
    %c0_i32_1 = arith.constant 0 : i32
    %c0_i32_2 = arith.constant 0 : i32
    return %c0_i32, %c0_i32_0, %c0_i32_1 : i32, i32, i32
  }
  func.func @transform_2(%arg0: i32) -> (i32, i32) {
    %c0_i32 = arith.constant 0 : i32
    %c0_i32_0 = arith.constant 0 : i32
    %c0_i32_1 = arith.constant 0 : i32
    return %c0_i32, %c0_i32_0 : i32, i32
  }
  func.func @transform_3(%arg0: i32) -> (i32, i32) {
    %c0_i32 = arith.constant 0 : i32
    %c0_i32_0 = arith.constant 0 : i32
    %c0_i32_1 = arith.constant 0 : i32
    return %c0_i32, %c0_i32_0 : i32, i32
  }
  func.func @transform_4(%arg0: i32) -> (i32, i32, i32) {
    %c0_i32 = arith.constant 0 : i32
    %c0_i32_0 = arith.constant 0 : i32
    %c0_i32_1 = arith.constant 0 : i32
    %c0_i32_2 = arith.constant 0 : i32
    return %c0_i32, %c0_i32_0, %c0_i32_1 : i32, i32, i32
  }
  func.func @transform_5(%arg0: i32) -> (i32, i32) {
    %c0_i32 = arith.constant 0 : i32
    %c0_i32_0 = arith.constant 0 : i32
    %c0_i32_1 = arith.constant 0 : i32
    return %c0_i32, %c0_i32_0 : i32, i32
  }
  func.func @transform_6(%arg0: i32) -> (i32, i32) {
    %c0_i32 = arith.constant 0 : i32
    %c0_i32_0 = arith.constant 0 : i32
    %c0_i32_1 = arith.constant 0 : i32
    return %c0_i32, %c0_i32_0 : i32, i32
  }
  func.func @transform_7(%arg0: i32) -> (i32, i32) {
    %c0_i32 = arith.constant 0 : i32
    %c0_i32_0 = arith.constant 0 : i32
    %c0_i32_1 = arith.constant 0 : i32
    return %c0_i32, %c0_i32_0 : i32, i32
  }
  func.func @transform_8(%arg0: i32) -> (i32, i32) {
    %c0_i32 = arith.constant 0 : i32
    %c0_i32_0 = arith.constant 0 : i32
    %c0_i32_1 = arith.constant 0 : i32
    return %c0_i32, %c0_i32_0 : i32, i32
  }
  func.func @transform_9(%arg0: i32) -> (i32, i32) {
    %c0_i32 = arith.constant 0 : i32
    %c0_i32_0 = arith.constant 0 : i32
    %c0_i32_1 = arith.constant 0 : i32
    return %c0_i32, %c0_i32_0 : i32, i32
  }
  func.func @transform_10(%arg0: i32) -> (i32, i32) {
    %c0_i32 = arith.constant 0 : i32
    %c0_i32_0 = arith.constant 0 : i32
    %c0_i32_1 = arith.constant 0 : i32
    return %c0_i32, %c0_i32_0 : i32, i32
  }
  func.func @transform_11(%arg0: i32) -> (i32, i32) {
    %c0_i32 = arith.constant 0 : i32
    %c0_i32_0 = arith.constant 0 : i32
    %c0_i32_1 = arith.constant 0 : i32
    return %c0_i32, %c0_i32_0 : i32, i32
  }
  func.func @transform_12(%arg0: i32) -> (i32, i32) {
    %c0_i32 = arith.constant 0 : i32
    %c0_i32_0 = arith.constant 0 : i32
    %c0_i32_1 = arith.constant 0 : i32
    return %c0_i32, %c0_i32_0 : i32, i32
  }
  func.func @transform_13(%arg0: i32) -> (i32, i32) {
    %c0_i32 = arith.constant 0 : i32
    %c0_i32_0 = arith.constant 0 : i32
    %c0_i32_1 = arith.constant 0 : i32
    return %c0_i32, %c0_i32_0 : i32, i32
  }
  func.func @transform_14(%arg0: i32) -> (i32, i32) {
    %c0_i32 = arith.constant 0 : i32
    %c0_i32_0 = arith.constant 0 : i32
    %c0_i32_1 = arith.constant 0 : i32
    return %c0_i32, %c0_i32_0 : i32, i32
  }
  func.func @transform_15(%arg0: i32) -> (i32, i32, i32) {
    %c0_i32 = arith.constant 0 : i32
    %c0_i32_0 = arith.constant 0 : i32
    %c0_i32_1 = arith.constant 0 : i32
    return %arg0, %c0_i32, %c0_i32_0 : i32, i32, i32
  }
}

</mosaic_0001>

<bundles_post_ra>
// kernel: tpu_custom_call.1
= control target key start
LH: loop header
LB: loop body
LE: loop exit
PB: predicated region body
PF: predicated region fallthrough
CT: control target
= control target key end

     0   :  { %s10497_s0 = inlined_call_operand.vmem [shape: f32[2,18,18,4], index: 0, kind: input, shape index: {}]   ;;  %s10498_s1 = inlined_call_operand.vmem [shape: bf16[9,4,128], index: 1, kind: input, shape index: {}]   ;;  %s10499_s2 = inlined_call_operand.vmem [shape: f32[1,128], index: 2, kind: input, shape index: {}]   ;;  %s10500_s3 = inlined_call_operand.vmem [shape: f32[1,128], index: 3, kind: input, shape index: {}]   ;;  %s10501_s4 = inlined_call_operand.vmem [shape: f32[9,1,128], index: 4, kind: input, shape index: {}]   ;;  %s10502_s5 = inlined_call_operand.vmem [shape: f32[1,128], index: 5, kind: input, shape index: {}]   ;;  %s10503_s6 = inlined_call_operand.vmem [shape: f32[1,128], index: 6, kind: input, shape index: {}]   ;;  %s10504_s7 = inlined_call_operand.vmem [shape: f32[128,128], index: 7, kind: input, shape index: {}]   ;;  %s10505_s8 = inlined_call_operand.vmem [shape: f32[1,128], index: 8, kind: input, shape index: {}]   ;;  %s10506_s9 = inlined_call_operand.vmem [shape: f32[128,128], index: 9, kind: input, shape index: {}]   ;;  %s10507_s10 = inlined_call_operand.vmem [shape: f32[1,128], index: 10, kind: input, shape index: {}]   ;;  %s10508_s11 = inlined_call_operand.vmem [shape: bf16[128,128], index: 11, kind: input, shape index: {}]   ;;  %s10509_s12 = inlined_call_operand.vmem [shape: f32[1,128], index: 12, kind: input, shape index: {}]   ;;  %s10510_s13 = inlined_call_operand.vmem [shape: f32[1,128], index: 13, kind: input, shape index: {}]   ;;  %s10511_s14 = inlined_call_operand.vmem [shape: f32[4,128], index: 14, kind: input, shape index: {}]   ;;  %s10512_s15 = inlined_call_operand.hbm [shape: f32[2,256,128], index: 15, kind: output, shape index: {}]  }
   0x1   :  { %10559 = sst [smem:[#allocation45_spill]] %s10497_s0 }
   0x2   :  { %10560 = sst [smem:[#allocation46_spill]] %s10498_s1 }
   0x3   :  { %20 = vsyncpa [#allocation4], 0 }
   0x4   :  { %22 = vsyncpa [#allocation4 + $0x1], 0  ;;  %s7853_s18 = smov 0   ;;  %s7855_s19 = smov 0  }
   0x5   :  { %s7857_s20 = smov 0   ;;  %s7859_s21 = smov 0  }
   0x6 LB: > { %10561 = sst [smem:[#allocation6_spill]] %s7761_s20  ;;  %s7874_s22 = sadd.s32 4294967295, %s7765_s21   ;;  %s7765_s21 = sphi %s7859_s21, %s10728_s21   ;;  %s7761_s20 = sphi %s7857_s20, %s10727_s20   ;;  %s7757_s19 = sphi %s7855_s19, %s10726_s19   ;;  %s7753_s18 = sphi %s7853_s18, %s10725_s18  }
   0x7   : > { %s5815_s23 = sadd.s32 4294967294, %s7765_s21   ;;  %s7878_s24 = sadd.s32 1, %s7765_s21  }
   0x8   : > { %s355_s25 = sadd.s32 1, %s7761_s20  ;;  %s352_s26 = ssub.s32 %s7765_s21, %s7878_s24 }
   0x9   : > { %p365_p0 = scmp.ne.s32.totalorder %s7761_s20, %s7757_s19  ;;  %p353_p1 = scmp.eq.s32.totalorder %s352_s26, 0 }
   0xa   : > { %p366_p2 = scmp.eq.s32.totalorder %s7874_s22, 1  ;;  %p371_p3 = scmp.ne.s32.totalorder %s7757_s19, %s7753_s18 }
   0xb   : > { %p372_p4 = scmp.eq.s32.totalorder %s5815_s23, 1  ;;  %p5818_p7 = scmp.ge.s32.totalorder %s7765_s21, 1 }
   0xc   : > { %s7889_s27 = scalar_select %p353_p1, %s7761_s20, %s355_s25  }
   0xd   : > { %p7891_p5 = por %p366_p2, %p365_p0  ;;  %p7895_p6 = por %p372_p4, %p371_p3 }
   0xe   : > { %10562 = sst [smem:[#allocation7_spill]] %s7889_s27  ;;  %p440_p8 = scmp.lt.s32.totalorder %s7765_s21, 3 }
  0x10   : > { %p441_p9 = pnand %p5818_p7, %p440_p8 }
  0x12   : > { %444 = sbr.rel (%p441_p9) target bundleno = 1728 (0x6c0), region = 80 }
  0x19   : > { %vm642_vm0 = vcmask 1041408   ;;  %s10565_s1 = sld [smem:[#allocation46_spill]]  ;;  %p488_p10 = scmp.lt.s32.totalorder %s7874_s22, 1  ;;  %vm593_vm1 = vcmask 31744   ;;  %vm7769_vm2 = vmmov 0   ;;  %vm5446_vm3 = vcmask 1043456  }
  0x1a   : > { %s10566_s0 = sld [smem:[#allocation45_spill]]  ;;  %s485_s30 = sand.u32 1, %s7757_s19  }
  0x1b   : > { %s489_s27 = scalar_select %p488_p10, %s7874_s22, 1 }
  0x1c   : > { %s5819_s16 = sshll.u32 %s485_s30, 8  ;;  %s7770_s23 = smov [#allocation3]  }
  0x1d   : > { %s7366_s20 = smul.u32 432, %s489_s27 }
  0x1f   : > { %v5903_v0 = vld [vmem:[%s10565_s1 + $0x6] sm:$0x3]  ;;  %v5952_v2 = vld [vmem:[%s10565_s1 + $0x8] sm:$0x3]  ;;  %v5821_v3 = vld [vmem:[%s10565_s1 + $0x2] sm:$0x3] }
  0x20   : > { %7360 = vmatprep.subr.msk.bf16.mxu0 %vm642_vm0, %v5903_v0  ;;  %v1413_v1 = vsel %vm642_vm0, %v5903_v0, 0  ;;  %7357 = vmatprep.subr.msk.bf16.mxu1 %vm642_vm0, %v5821_v3  ;;  %v644_v4 = vsel %vm642_vm0, %v5821_v3, 0  ;;  %v542_v5 = vld [vmem:[%s10565_s1] sm:$0x3]  ;;  %s7924_s25 = scalar_lea.vmem %s10566_s0, %s7366_s20  ;;  %v1707_v14 = vsel %vm642_vm0, %v5952_v2, 0  ;;  %s10332_s20 = scalar_lea.vmem [#allocation3], %s5819_s16 }
  0x21   : > { %6682 = vmatpush3.bf16.msra.mxu0 %v1413_v1  ;;  %6580 = vmatpush3.bf16.msra.mxu1 %v644_v4  ;;  %v5871_v6 = vld [vmem:[%s7924_s25 + $0x18] sm:$0xff]  ;;  %v5872_v7 = vld [vmem:[%s7924_s25 + $0x20] sm:$0xff]  ;;  %v5873_v8 = vld [vmem:[%s7924_s25 + $0x30] sm:$0xff]  ;;  %v856_v33 = vsel %vm642_vm0, %v542_v5, 0  ;;  %s6334_s0 = sshll.u32 %s7874_s22, 12  ;;  %s5753_s27 = sshll.u32 %s10332_s20, 4  ;;  %s10450_s27 = int_to_ptr.vmem [resolvable:$true] %s5753_s27 }
  0x22   : > { %7361 = vmatprep.subr.msk.bf16.mxu0 %vm642_vm0, %v5952_v2  ;;  %7358 = vmatprep.subr.msk.bf16.mxu1 %vm642_vm0, %v542_v5  ;;  %v7929_v9 = vpack.c.bf16 %v5872_v7, %v5871_v6  ;;  %v5874_v10 = vld [vmem:[%s7924_s25 + $0x38] sm:$0xff]  ;;  %v5875_v11 = vld [vmem:[%s7924_s25 + $0x48] sm:$0xff]  ;;  %v5876_v12 = vld [vmem:[%s7924_s25 + $0x50] sm:$0xff]  ;;  %s10448_s16 = scalar_lea.hbm %s10512_s15, %s6334_s0  ;;  %s10456_s22 = scalar_lea.sflag [#allocation4], %s485_s30 }
  0x23   : > { %v7934_v13 = vpack.c.bf16 %v5874_v10, %v5873_v8  ;;  %v7937_v15 = vpack.c.bf16 %v5876_v12, %v5875_v11  ;;  %v7944_v16 = vld [vmem:[%s10565_s1 + $0xa] sm:$0x3]  ;;  %v5877_v17 = vld [vmem:[%s7924_s25 + $0x60] sm:$0xff]  ;;  %v5879_v19 = vld [vmem:[%s7924_s25 + $0x78] sm:$0xff]  ;;  %s7703_s17 = scalar_lea.vmem %s10450_s27, 4096 }
  0x24   : > { %6683 = vmatprep.mubr.msk.bf16.mxu0 %vm593_vm1, %v7929_v9  ;;  %v5878_v18 = vld [vmem:[%s7924_s25 + $0x68] sm:$0xff]  ;;  %v5880_v20 = vld [vmem:[%s7924_s25 + $0x80] sm:$0xff]  ;;  %v5922_v29 = vld [vmem:[%s7924_s25 + $0x31] sm:$0xff]  ;;  %p7704_p11 = scmp.ne.s32.totalorder %s10450_s27, %s7703_s17 }
  0x25   : > { %6684 = vmatmul.mubr.msk.bf16.vlgmr.msra.gmra.mrb[0].mxu0 %vm593_vm1, %v7934_v13  ;;  %v7956_v21 = vpack.c.bf16 %v5878_v18, %v5877_v17  ;;  %v7958_v22 = vpack.c.bf16 %v5880_v20, %v5879_v19  ;;  %v543_v23 = vld [vmem:[%s7924_s25 + $0x1] sm:$0xff]  ;;  %v544_v24 = vld [vmem:[%s7924_s25 + $0x9] sm:$0xff]  ;;  %v545_v25 = vld [vmem:[%s7924_s25 + $0x19] sm:$0xff] }
  0x26   : > { %6716 = vmatpush3.bf16.msra.mxu0 %v1707_v14  ;;  %6687 = vmatprep.mubr.msk.bf16.mxu0 %vm593_vm1, %v7937_v15  ;;  %v546_v26 = vld [vmem:[%s7924_s25 + $0x21] sm:$0xff]  ;;  %v575_v27 = vpack.c.bf16 %v544_v24, %v543_v23  ;;  %v5923_v30 = vld [vmem:[%s7924_s25 + $0x39] sm:$0xff]  ;;  %v5881_v31 = vld [vmem:[%s7924_s25 + $0x90] sm:$0xff]  ;;  %p7705_p12 = pnand %p7704_p11, %p7891_p5 }
  0x27   : > { %7362 = vmatprep.subr.msk.bf16.mxu0 %vm642_vm0, %v7944_v16  ;;  %v7966_v28 = vpack.c.bf16 %v546_v26, %v545_v25  ;;  %v5882_v32 = vld [vmem:[%s7924_s25 + $0x98] sm:$0xff]  ;;  %v5883_v34 = vld [vmem:[%s7924_s25 + $0xa8] sm:$0xff]  ;;  %v5884_v35 = vld [vmem:[%s7924_s25 + $0xb0] sm:$0xff]  ;;  %v7978_v36 = vpack.c.bf16 %v5923_v30, %v5922_v29 }
  0x28   : > { %6581 = vmatprep.mubr.msk.bf16.mxu1 %vm593_vm1, %v575_v27  ;;  %v7982_v37 = vpack.c.bf16 %v5882_v32, %v5881_v31  ;;  %v549_v38 = vld [vmem:[%s7924_s25 + $0x49] sm:$0xff]  ;;  %v550_v39 = vld [vmem:[%s7924_s25 + $0x51] sm:$0xff]  ;;  %v7988_v40 = vpack.c.bf16 %v5884_v35, %v5883_v34  ;;  %v5926_v42 = vld [vmem:[%s7924_s25 + $0x61] sm:$0xff]  ;;  %p7706_p13 = pneg %p7705_p12 }
  0x29   : > { %6582 = vmatmul.mubr.msk.bf16.vlgmr.msra.gmra.mrb[0].mxu1 %vm593_vm1, %v7966_v28  ;;  %v7990_v41 = vpack.c.bf16 %v550_v39, %v549_v38  ;;  %v5927_v43 = vld [vmem:[%s7924_s25 + $0x69] sm:$0xff]  ;;  %v5885_v44 = vld [vmem:[%s7924_s25 + $0xc0] sm:$0xff]  ;;  %v5887_v46 = vld [vmem:[%s7924_s25 + $0xd8] sm:$0xff] }
  0x2a   : > { %6585 = vmatprep.mubr.msk.bf16.mxu1 %vm593_vm1, %v7978_v36  ;;  %6614 = vmatpush3.bf16.msra.mxu1 %v856_v33  ;;  %v5886_v45 = vld [vmem:[%s7924_s25 + $0xc8] sm:$0xff]  ;;  %v5888_v47 = vld [vmem:[%s7924_s25 + $0xe0] sm:$0xff]  ;;  %v8002_v48 = vpack.c.bf16 %v5927_v43, %v5926_v42  ;;  %v5930_v54 = vld [vmem:[%s7924_s25 + $0x91] sm:$0xff] }
  0x2b   : > { %v8006_v49 = vpack.c.bf16 %v5886_v45, %v5885_v44  ;;  %v553_v50 = vld [vmem:[%s7924_s25 + $0x79] sm:$0xff]  ;;  %v554_v51 = vld [vmem:[%s7924_s25 + $0x81] sm:$0xff]  ;;  %v8012_v52 = vpack.c.bf16 %v5888_v47, %v5887_v46  ;;  %v5889_v56 = vld [vmem:[%s7924_s25 + $0xf0] sm:$0xff] }
  0x2c   : > { %v8014_v53 = vpack.c.bf16 %v554_v51, %v553_v50  ;;  %v5931_v55 = vld [vmem:[%s7924_s25 + $0x99] sm:$0xff]  ;;  %v5891_v58 = vld [vmem:[%s7924_s25 + $0x108] sm:$0xff]  ;;  %v5892_v59 = vld [vmem:[%s7924_s25 + $0x110] sm:$0xff] }
  0x2d   : > { %6688 = vmatmul.mubr.msk.bf16.gmra.mrb[4].mxu0 %vm593_vm1, %v7956_v21  ;;  %v5890_v57 = vld [vmem:[%s7924_s25 + $0xf8] sm:$0xff]  ;;  %v8026_v60 = vpack.c.bf16 %v5931_v55, %v5930_v54  ;;  %v557_v62 = vld [vmem:[%s7924_s25 + $0xa9] sm:$0xff]  ;;  %v8036_v0 = vpack.c.bf16 %v5892_v59, %v5891_v58  ;;  %v5934_v2 = vld [vmem:[%s7924_s25 + $0xc1] sm:$0xff]  ;;  %v2001_v58 = vsel %vm642_vm0, %v7944_v16, 0 }
  0x2e   : > { %6691 = vmatprep.mubr.msk.bf16.mxu0 %vm593_vm1, %v7958_v22  ;;  %v8030_v61 = vpack.c.bf16 %v5890_v57, %v5889_v56  ;;  %v558_v63 = vld [vmem:[%s7924_s25 + $0xb1] sm:$0xff]  ;;  %v5935_v3 = vld [vmem:[%s7924_s25 + $0xc9] sm:$0xff]  ;;  %v5893_v4 = vld [vmem:[%s7924_s25 + $0x120] sm:$0xff] }
  0x2f   : > { %v8038_v1 = vpack.c.bf16 %v558_v63, %v557_v62  ;;  %v5894_v5 = vld [vmem:[%s7924_s25 + $0x128] sm:$0xff]  ;;  %v5895_v6 = vld [vmem:[%s7924_s25 + $0x138] sm:$0xff]  ;;  %v5896_v7 = vld [vmem:[%s7924_s25 + $0x140] sm:$0xff]  ;;  %v8050_v8 = vpack.c.bf16 %v5935_v3, %v5934_v2 }
  0x30   : > { %v8054_v10 = vpack.c.bf16 %v5894_v5, %v5893_v4  ;;  %v561_v11 = vld [vmem:[%s7924_s25 + $0xd9] sm:$0xff]  ;;  %v562_v12 = vld [vmem:[%s7924_s25 + $0xe1] sm:$0xff]  ;;  %v8060_v14 = vpack.c.bf16 %v5896_v7, %v5895_v6  ;;  %v5938_v18 = vld [vmem:[%s7924_s25 + $0xf1] sm:$0xff] }
  0x31   : > { %6586 = vmatmul.mubr.msk.bf16.gmra.mrb[4].mxu1 %vm593_vm1, %v7990_v41  ;;  %v8062_v17 = vpack.c.bf16 %v562_v12, %v561_v11  ;;  %v5939_v19 = vld [vmem:[%s7924_s25 + $0xf9] sm:$0xff]  ;;  %v5897_v20 = vld [vmem:[%s7924_s25 + $0x150] sm:$0xff]  ;;  %v5899_v24 = vld [vmem:[%s7924_s25 + $0x168] sm:$0xff] }
  0x32   : > { %6589 = vmatprep.mubr.msk.bf16.mxu1 %vm593_vm1, %v8002_v48  ;;  %v5898_v23 = vld [vmem:[%s7924_s25 + $0x158] sm:$0xff]  ;;  %v5900_v25 = vld [vmem:[%s7924_s25 + $0x170] sm:$0xff]  ;;  %v8074_v26 = vpack.c.bf16 %v5939_v19, %v5938_v18  ;;  %v5942_v33 = vld [vmem:[%s7924_s25 + $0x121] sm:$0xff] }
  0x33   : > { %v8078_v27 = vpack.c.bf16 %v5898_v23, %v5897_v20  ;;  %v565_v29 = vld [vmem:[%s7924_s25 + $0x109] sm:$0xff]  ;;  %v566_v30 = vld [vmem:[%s7924_s25 + $0x111] sm:$0xff]  ;;  %v8084_v31 = vpack.c.bf16 %v5900_v25, %v5899_v24  ;;  %v5901_v35 = vld [vmem:[%s7924_s25 + $0x180] sm:$0xff] }
  0x34   : > { %v8086_v32 = vpack.c.bf16 %v566_v30, %v565_v29  ;;  %v5943_v34 = vld [vmem:[%s7924_s25 + $0x129] sm:$0xff]  ;;  %v569_v43 = vld [vmem:[%s7924_s25 + $0x139] sm:$0xff]  ;;  %v570_v44 = vld [vmem:[%s7924_s25 + $0x141] sm:$0xff] }
  0x35   : > { %6692 = vmatmul.mubr.msk.bf16.gmra.mrb[8].mxu0 %vm593_vm1, %v7982_v37  ;;  %v5902_v38 = vld [vmem:[%s7924_s25 + $0x188] sm:$0xff]  ;;  %v8096_v39 = vpack.c.bf16 %v5943_v34, %v5942_v33  ;;  %v8106_v45 = vpack.c.bf16 %v570_v44, %v569_v43  ;;  %v5946_v46 = vld [vmem:[%s7924_s25 + $0x151] sm:$0xff]  ;;  %v5947_v47 = vld [vmem:[%s7924_s25 + $0x159] sm:$0xff] }
  0x36   : > { %6695 = vmatprep.mubr.msk.bf16.mxu0 %vm593_vm1, %v7988_v40  ;;  %v8100_v42 = vpack.c.bf16 %v5902_v38, %v5901_v35  ;;  %v5854_v50 = vld [vmem:[%s10565_s1 + $0x4] sm:$0x3]  ;;  %v8118_v51 = vpack.c.bf16 %v5947_v47, %v5946_v46  ;;  %v573_v54 = vld [vmem:[%s7924_s25 + $0x169] sm:$0xff]  ;;  %v574_v55 = vld [vmem:[%s7924_s25 + $0x171] sm:$0xff] }
  0x37   : > { %7359 = vmatprep.subr.msk.bf16.mxu1 %vm642_vm0, %v5854_v50  ;;  %v494_v56 = vld [vmem:[%s7924_s25] sm:$0xff]  ;;  %v495_v57 = vld [vmem:[%s7924_s25 + $0x8] sm:$0xff]  ;;  %v8130_v59 = vpack.c.bf16 %v574_v55, %v573_v54  ;;  %v1118_v16 = vsel %vm642_vm0, %v5854_v50, 0  ;;  %v5971_v6 = vld [vmem:[%s7924_s25 + $0x32] sm:$0xff] }
  0x38   : > { %v526_v62 = vpack.c.bf16 %v495_v57, %v494_v56  ;;  %v5951_v63 = vld [vmem:[%s7924_s25 + $0x189] sm:$0xff]  ;;  %v5969_v2 = vld [vmem:[%s7924_s25 + $0x1a] sm:$0xff]  ;;  %v5974_v12 = vld [vmem:[%s7924_s25 + $0x52] sm:$0xff] }
  0x39   : > { %6590 = vmatmul.mubr.msk.bf16.gmra.mrb[8].mxu1 %vm593_vm1, %v8014_v53  ;;  %v5970_v3 = vld [vmem:[%s7924_s25 + $0x22] sm:$0xff]  ;;  %v5972_v7 = vld [vmem:[%s7924_s25 + $0x3a] sm:$0xff]  ;;  %v5973_v11 = vld [vmem:[%s7924_s25 + $0x4a] sm:$0xff] }
  0x3a   : > { %6593 = vmatprep.mubr.msk.bf16.mxu1 %vm593_vm1, %v8026_v60  ;;  %v1934_v5 = vpack.c.bf16 %v5970_v3, %v5969_v2  ;;  %v8207_v18 = vpack.c.bf16 %v5972_v7, %v5971_v6  ;;  %v8211_v19 = vpack.c.bf16 %v5974_v12, %v5973_v11  ;;  %v1019_v20 = vld [vmem:[%s7924_s25 + $0x2] sm:$0xff]  ;;  %v1020_v23 = vld [vmem:[%s7924_s25 + $0xa] sm:$0xff]  ;;  %v5977_v34 = vld [vmem:[%s7924_s25 + $0x7a] sm:$0xff] }
  0x3b   : > { %v8219_v25 = vld [vmem:[%s10565_s1 + $0xe] sm:$0x3]  ;;  %v1051_v29 = vpack.c.bf16 %v1020_v23, %v1019_v20  ;;  %v5975_v30 = vld [vmem:[%s7924_s25 + $0x62] sm:$0xff]  ;;  %v5979_v44 = vld [vmem:[%s7924_s25 + $0x92] sm:$0xff] }
  0x3c   : > { %v5976_v33 = vld [vmem:[%s7924_s25 + $0x6a] sm:$0xff]  ;;  %v5978_v35 = vld [vmem:[%s7924_s25 + $0x82] sm:$0xff]  ;;  %v5980_v46 = vld [vmem:[%s7924_s25 + $0x9a] sm:$0xff] }
  0x3d   : > { %6696 = vmatmul.mubr.msk.bf16.gmra.mrb[12].mxu0 %vm593_vm1, %v8006_v49  ;;  %v8233_v38 = vpack.c.bf16 %v5976_v33, %v5975_v30  ;;  %v8236_v43 = vpack.c.bf16 %v5978_v35, %v5977_v34  ;;  %v5981_v47 = vld [vmem:[%s7924_s25 + $0xaa] sm:$0xff]  ;;  %v5982_v50 = vld [vmem:[%s7924_s25 + $0xb2] sm:$0xff]  ;;  %v8247_v54 = vpack.c.bf16 %v5980_v46, %v5979_v44  ;;  %v5983_v56 = vld [vmem:[%s7924_s25 + $0xc2] sm:$0xff] }
  0x3e   : > { %6699 = vmatprep.mubr.msk.bf16.mxu0 %vm593_vm1, %v8012_v52  ;;  %v8251_v55 = vpack.c.bf16 %v5982_v50, %v5981_v47  ;;  %v5984_v57 = vld [vmem:[%s7924_s25 + $0xca] sm:$0xff]  ;;  %v5990_v3 = vld [vmem:[%s7924_s25 + $0x112] sm:$0xff]  ;;  %v5991_v7 = vld [vmem:[%s7924_s25 + $0x122] sm:$0xff] }
  0x3f   : > { %v5989_v2 = vld [vmem:[%s7924_s25 + $0x10a] sm:$0xff]  ;;  %v5993_v12 = vld [vmem:[%s7924_s25 + $0x13a] sm:$0xff]  ;;  %v5994_v20 = vld [vmem:[%s7924_s25 + $0x142] sm:$0xff] }
  0x40   : > { %v8283_v6 = vpack.c.bf16 %v5990_v3, %v5989_v2  ;;  %v5992_v11 = vld [vmem:[%s7924_s25 + $0x12a] sm:$0xff]  ;;  %v5996_v30 = vld [vmem:[%s7924_s25 + $0x15a] sm:$0xff]  ;;  %v5998_v34 = vld [vmem:[%s7924_s25 + $0x172] sm:$0xff] }
  0x41   : > { %6594 = vmatmul.mubr.msk.bf16.gmra.mrb[12].mxu1 %vm593_vm1, %v8038_v1  ;;  %v8295_v23 = vpack.c.bf16 %v5992_v11, %v5991_v7  ;;  %v5997_v33 = vld [vmem:[%s7924_s25 + $0x16a] sm:$0xff]  ;;  %v5999_v46 = vld [vmem:[%s7924_s25 + $0x182] sm:$0xff]  ;;  %v8510_v3 = vld [vmem:[%s10499_s2] ss:$0 sm:$0xff] }
  0x42   : > { %6597 = vmatprep.mubr.msk.bf16.mxu1 %vm593_vm1, %v8050_v8  ;;  %v8315_v44 = vpack.c.bf16 %v5998_v34, %v5997_v33  ;;  %v6000_v47 = vld [vmem:[%s7924_s25 + $0x18a] sm:$0xff]  ;;  %v8516_v7 = vld [vmem:[%s10500_s3] ss:$0 sm:$0xff] }
  0x43   : > { %v8325_v50 = vpack.c.bf16 %v6000_v47, %v5999_v46  ;;  %10579 = vst [vmem:[#allocation20_spill] sm:$0xff] %v8516_v7 }
  0x45   : > { %6700 = vmatmul.mubr.msk.bf16.gmra.mrb[16].mxu0 %vm593_vm1, %v8030_v61 }
  0x46   : > { %6703 = vmatprep.mubr.msk.bf16.mxu0 %vm593_vm1, %v8036_v0 }
  0x49   : > { %6598 = vmatmul.mubr.msk.bf16.gmra.mrb[16].mxu1 %vm593_vm1, %v8062_v17 }
  0x4a   : > { %6601 = vmatprep.mubr.msk.bf16.mxu1 %vm593_vm1, %v8074_v26 }
  0x4d   : > { %6704 = vmatmul.mubr.msk.bf16.gmra.mrb[20].mxu0 %vm593_vm1, %v8054_v10 }
  0x4e   : > { %6707 = vmatprep.mubr.msk.bf16.mxu0 %vm593_vm1, %v8060_v14 }
  0x51   : > { %6602 = vmatmul.mubr.msk.bf16.gmra.mrb[20].mxu1 %vm593_vm1, %v8086_v32 }
  0x52   : > { %6605 = vmatprep.mubr.msk.bf16.mxu1 %vm593_vm1, %v8096_v39 }
  0x55   : > { %6708 = vmatmul.mubr.msk.bf16.gmra.mrb[24].mxu0 %vm593_vm1, %v8078_v27 }
  0x56   : > { %6711 = vmatprep.mubr.msk.bf16.mxu0 %vm593_vm1, %v8084_v31 }
  0x59   : > { %6606 = vmatmul.mubr.msk.bf16.gmra.mrb[24].mxu1 %vm593_vm1, %v8106_v45 }
  0x5a   : > { %6609 = vmatprep.mubr.msk.bf16.mxu1 %vm593_vm1, %v8118_v51 }
  0x5d   : > { %6712 = vmatmul.mubr.msk.bf16.gmra.mrb[28].mxu0 %vm593_vm1, %v8100_v42 }
  0x5e   : > { %6717 = vmatprep.mubr.msk.bf16.mxu0 %vm593_vm1, %v7966_v28  ;;  %v6050_v28 = vld [vmem:[%s10565_s1 + $0xc] sm:$0x3] }
  0x5f   : > { %v2296_v24 = vsel %vm642_vm0, %v6050_v28, 0 }
  0x61   : > { %6610 = vmatmul.mubr.msk.bf16.gmra.mrb[28].mxu1 %vm593_vm1, %v8130_v59 }
  0x62   : > { %6615 = vmatprep.mubr.msk.bf16.mxu1 %vm593_vm1, %v526_v62  ;;  %v8263_v62 = vpack.c.bf16 %v5984_v57, %v5983_v56  ;;  %v2590_v56 = vsel %vm642_vm0, %v8219_v25, 0  ;;  %v6148_v57 = vld [vmem:[%s10565_s1 + $0x10] sm:$0x3] }
  0x65   : > { %6718 = vmatmul.mubr.msk.bf16.vlgmr.msra.gmra.mrb[0].mxu0 %vm593_vm1, %v7978_v36 }
  0x66   : > { %6750 = vmatpush3.bf16.msra.mxu0 %v2001_v58  ;;  %6721 = vmatprep.mubr.msk.bf16.mxu0 %vm593_vm1, %v7990_v41  ;;  %v5985_v58 = vld [vmem:[%s7924_s25 + $0xda] sm:$0xff] }
  0x67   : > { %7363 = vmatprep.subr.msk.bf16.mxu0 %vm642_vm0, %v6050_v28  ;;  %v5986_v28 = vld [vmem:[%s7924_s25 + $0xe2] sm:$0xff] }
  0x69   : > { %6616 = vmatmul.mubr.msk.bf16.vlgmr.msra.gmra.mrb[0].mxu1 %vm593_vm1, %v7929_v9  ;;  %v5950_v9 = vld [vmem:[%s7924_s25 + $0x181] sm:$0xff] }
  0x6a   : > { %6619 = vmatprep.mubr.msk.bf16.mxu1 %vm593_vm1, %v7934_v13  ;;  %6648 = vmatpush3.bf16.msra.mxu1 %v1118_v16  ;;  %v8194_v4 = vpack.c.bf16 %v5951_v63, %v5950_v9  ;;  %v8267_v16 = vpack.c.bf16 %v5986_v28, %v5985_v58  ;;  %v5987_v9 = vld [vmem:[%s7924_s25 + $0xf2] sm:$0xff]  ;;  %v5988_v63 = vld [vmem:[%s7924_s25 + $0xfa] sm:$0xff] }
  0x6d   : > { %6722 = vmatmul.mubr.msk.bf16.gmra.mrb[4].mxu0 %vm593_vm1, %v8002_v48 }
  0x6e   : > { %6725 = vmatprep.mubr.msk.bf16.mxu0 %vm593_vm1, %v8014_v53 }
  0x71   : > { %6620 = vmatmul.mubr.msk.bf16.gmra.mrb[4].mxu1 %vm593_vm1, %v7937_v15 }
  0x72   : > { %6623 = vmatprep.mubr.msk.bf16.mxu1 %vm593_vm1, %v7956_v21 }
  0x75   : > { %6726 = vmatmul.mubr.msk.bf16.gmra.mrb[8].mxu0 %vm593_vm1, %v8026_v60 }
  0x76   : > { %6729 = vmatprep.mubr.msk.bf16.mxu0 %vm593_vm1, %v8038_v1 }
  0x79   : > { %6624 = vmatmul.mubr.msk.bf16.gmra.mrb[8].mxu1 %vm593_vm1, %v7958_v22 }
  0x7a   : > { %6627 = vmatprep.mubr.msk.bf16.mxu1 %vm593_vm1, %v7982_v37 }
  0x7d   : > { %6730 = vmatmul.mubr.msk.bf16.gmra.mrb[12].mxu0 %vm593_vm1, %v8050_v8 }
  0x7e   : > { %6733 = vmatprep.mubr.msk.bf16.mxu0 %vm593_vm1, %v8062_v17 }
  0x81   : > { %6628 = vmatmul.mubr.msk.bf16.gmra.mrb[12].mxu1 %vm593_vm1, %v7988_v40 }
  0x82   : > { %6631 = vmatprep.mubr.msk.bf16.mxu1 %vm593_vm1, %v8006_v49 }
  0x85   : > { %6734 = vmatmul.mubr.msk.bf16.gmra.mrb[16].mxu0 %vm593_vm1, %v8074_v26 }
  0x86   : > { %6737 = vmatprep.mubr.msk.bf16.mxu0 %vm593_vm1, %v8086_v32 }
  0x89   : > { %6632 = vmatmul.mubr.msk.bf16.gmra.mrb[16].mxu1 %vm593_vm1, %v8012_v52 }
  0x8a   : > { %6635 = vmatprep.mubr.msk.bf16.mxu1 %vm593_vm1, %v8030_v61 }
  0x8d   : > { %6738 = vmatmul.mubr.msk.bf16.gmra.mrb[20].mxu0 %vm593_vm1, %v8096_v39 }
  0x8e   : > { %6741 = vmatprep.mubr.msk.bf16.mxu0 %vm593_vm1, %v8106_v45 }
  0x91   : > { %6636 = vmatmul.mubr.msk.bf16.gmra.mrb[20].mxu1 %vm593_vm1, %v8036_v0 }
  0x92   : > { %6639 = vmatprep.mubr.msk.bf16.mxu1 %vm593_vm1, %v8054_v10 }
  0x95   : > { %6742 = vmatmul.mubr.msk.bf16.gmra.mrb[24].mxu0 %vm593_vm1, %v8118_v51 }
  0x96   : > { %6745 = vmatprep.mubr.msk.bf16.mxu0 %vm593_vm1, %v8130_v59 }
  0x99   : > { %6640 = vmatmul.mubr.msk.bf16.gmra.mrb[24].mxu1 %vm593_vm1, %v8060_v14 }
  0x9a   : > { %6643 = vmatprep.mubr.msk.bf16.mxu1 %vm593_vm1, %v8078_v27 }
  0x9d   : > { %6746 = vmatmul.mubr.msk.bf16.gmra.mrb[28].mxu0 %vm593_vm1, %v8194_v4 }
  0x9e   : > { %6751 = vmatprep.mubr.msk.bf16.mxu0 %vm593_vm1, %v1934_v5 }
  0xa1   : > { %6644 = vmatmul.mubr.msk.bf16.gmra.mrb[28].mxu1 %vm593_vm1, %v8084_v31 }
  0xa2   : > { %6649 = vmatprep.mubr.msk.bf16.mxu1 %vm593_vm1, %v1051_v29  ;;  %v5995_v29 = vld [vmem:[%s7924_s25 + $0x152] sm:$0xff] }
  0xa3   : > { %v8311_v35 = vpack.c.bf16 %v5996_v30, %v5995_v29 }
  0xa5   : > { %6752 = vmatmul.mubr.msk.bf16.vlgmr.msra.gmra.mrb[0].mxu0 %vm593_vm1, %v8207_v18 }
  0xa6   : > { %6784 = vmatpush3.bf16.msra.mxu0 %v2296_v24  ;;  %6755 = vmatprep.mubr.msk.bf16.mxu0 %vm593_vm1, %v8211_v19  ;;  %v8299_v24 = vpack.c.bf16 %v5994_v20, %v5993_v12 }
  0xa7   : > { %7364 = vmatprep.subr.msk.bf16.mxu0 %vm642_vm0, %v8219_v25 }
  0xa9   : > { %6650 = vmatmul.mubr.msk.bf16.vlgmr.msra.gmra.mrb[0].mxu1 %vm593_vm1, %v1934_v5  ;;  %v8279_v5 = vpack.c.bf16 %v5988_v63, %v5987_v9  ;;  %v7767_v63 = vmov 0.0  }
  0xaa   : > { %6653 = vmatprep.mubr.msk.bf16.mxu1 %vm593_vm1, %v8207_v18  ;;  %3389 = vst [vmem:[#allocation2 + $0x40] sm:$0xff] %v7767_v63  ;;  %3381 = vst [vmem:[#allocation2] sm:$0xff] %v7767_v63 }
  0xab   : > { %3382 = vst [vmem:[#allocation2 + $0x8] sm:$0xff] %v7767_v63  ;;  %3383 = vst [vmem:[#allocation2 + $0x10] sm:$0xff] %v7767_v63 }
  0xac   : > { %3384 = vst [vmem:[#allocation2 + $0x18] sm:$0x1] %v7767_v63  ;;  %3385 = vst [vmem:[#allocation2 + $0x20] sm:$0xff] %v7767_v63 }
  0xad   : > { %6756 = vmatmul.mubr.msk.bf16.gmra.mrb[4].mxu0 %vm593_vm1, %v8233_v38  ;;  %3388 = vst [vmem:[#allocation2 + $0x38] sm:$0x1] %v7767_v63  ;;  %3392 = vst [vmem:[#allocation2 + $0x58] sm:$0x1] %v7767_v63 }
  0xae   : > { %6759 = vmatprep.mubr.msk.bf16.mxu0 %vm593_vm1, %v8236_v43  ;;  %3393 = vst [vmem:[#allocation2 + $0x60] sm:$0xff] %v7767_v63  ;;  %3396 = vst [vmem:[#allocation2 + $0x78] sm:$0x1] %v7767_v63 }
  0xaf   : > { %3397 = vst [vmem:[#allocation2 + $0x80] sm:$0xff] %v7767_v63  ;;  %3400 = vst [vmem:[#allocation2 + $0x98] sm:$0x1] %v7767_v63 }
  0xb0   : > { %3401 = vst [vmem:[#allocation2 + $0xa0] sm:$0xff] %v7767_v63  ;;  %3404 = vst [vmem:[#allocation2 + $0xb8] sm:$0x1] %v7767_v63 }
  0xb1   : > { %6654 = vmatmul.mubr.msk.bf16.gmra.mrb[4].mxu1 %vm593_vm1, %v8211_v19  ;;  %3405 = vst [vmem:[#allocation2 + $0xc0] sm:$0xff] %v7767_v63  ;;  %3408 = vst [vmem:[#allocation2 + $0xd8] sm:$0x1] %v7767_v63 }
  0xb2   : > { %6657 = vmatprep.mubr.msk.bf16.mxu1 %vm593_vm1, %v8233_v38  ;;  %3409 = vst [vmem:[#allocation2 + $0xe0] sm:$0xff] %v7767_v63  ;;  %3412 = vst [vmem:[#allocation2 + $0xf8] sm:$0x1] %v7767_v63 }
  0xb3   : > { %3413 = vst [vmem:[#allocation2 + $0x100] sm:$0xff] %v7767_v63  ;;  %3416 = vst [vmem:[#allocation2 + $0x118] sm:$0x1] %v7767_v63 }
  0xb4   : > { %3417 = vst [vmem:[#allocation2 + $0x120] sm:$0xff] %v7767_v63  ;;  %3420 = vst [vmem:[#allocation2 + $0x138] sm:$0x1] %v7767_v63 }
  0xb5   : > { %6760 = vmatmul.mubr.msk.bf16.gmra.mrb[8].mxu0 %vm593_vm1, %v8247_v54  ;;  %3421 = vst [vmem:[#allocation2 + $0x140] sm:$0xff] %v7767_v63  ;;  %3424 = vst [vmem:[#allocation2 + $0x158] sm:$0x1] %v7767_v63 }
  0xb6   : > { %6763 = vmatprep.mubr.msk.bf16.mxu0 %vm593_vm1, %v8251_v55  ;;  %3425 = vst [vmem:[#allocation2 + $0x160] sm:$0xff] %v7767_v63  ;;  %3428 = vst [vmem:[#allocation2 + $0x178] sm:$0x1] %v7767_v63 }
  0xb7   : > { %3429 = vst [vmem:[#allocation2 + $0x180] sm:$0xff] %v7767_v63  ;;  %3432 = vst [vmem:[#allocation2 + $0x198] sm:$0x1] %v7767_v63 }
  0xb8   : > { %3433 = vst [vmem:[#allocation2 + $0x1a0] sm:$0xff] %v7767_v63  ;;  %3436 = vst [vmem:[#allocation2 + $0x1b8] sm:$0x1] %v7767_v63 }
  0xb9   : > { %6658 = vmatmul.mubr.msk.bf16.gmra.mrb[8].mxu1 %vm593_vm1, %v8236_v43  ;;  %3437 = vst [vmem:[#allocation2 + $0x1c0] sm:$0xff] %v7767_v63  ;;  %3440 = vst [vmem:[#allocation2 + $0x1d8] sm:$0x1] %v7767_v63 }
  0xba   : > { %6661 = vmatprep.mubr.msk.bf16.mxu1 %vm593_vm1, %v8247_v54  ;;  %3441 = vst [vmem:[#allocation2 + $0x1e0] sm:$0xff] %v7767_v63  ;;  %3444 = vst [vmem:[#allocation2 + $0x1f8] sm:$0x1] %v7767_v63 }
  0xbb   : > { %3445 = vst [vmem:[#allocation2 + $0x200] sm:$0xff] %v7767_v63  ;;  %3448 = vst [vmem:[#allocation2 + $0x218] sm:$0x1] %v7767_v63 }
  0xbc   : > { %3449 = vst [vmem:[#allocation2 + $0x220] sm:$0xff] %v7767_v63  ;;  %3450 = vst [vmem:[#allocation2 + $0x228] sm:$0xff] %v7767_v63 }
  0xbd   : > { %6764 = vmatmul.mubr.msk.bf16.gmra.mrb[12].mxu0 %vm593_vm1, %v8263_v62  ;;  %3451 = vst [vmem:[#allocation2 + $0x230] sm:$0xff] %v7767_v63  ;;  %3452 = vst [vmem:[#allocation2 + $0x238] sm:$0x1] %v7767_v63 }
  0xbe   : > { %6767 = vmatprep.mubr.msk.bf16.mxu0 %vm593_vm1, %v8267_v16 }
  0xc1   : > { %6662 = vmatmul.mubr.msk.bf16.gmra.mrb[12].mxu1 %vm593_vm1, %v8251_v55 }
  0xc2   : > { %6665 = vmatprep.mubr.msk.bf16.mxu1 %vm593_vm1, %v8263_v62 }
  0xc5   : > { %6768 = vmatmul.mubr.msk.bf16.gmra.mrb[16].mxu0 %vm593_vm1, %v8279_v5 }
  0xc6   : > { %6771 = vmatprep.mubr.msk.bf16.mxu0 %vm593_vm1, %v8283_v6 }
  0xc9   : > { %6666 = vmatmul.mubr.msk.bf16.gmra.mrb[16].mxu1 %vm593_vm1, %v8267_v16 }
  0xca   : > { %6669 = vmatprep.mubr.msk.bf16.mxu1 %vm593_vm1, %v8279_v5 }
  0xcd   : > { %6772 = vmatmul.mubr.msk.bf16.gmra.mrb[20].mxu0 %vm593_vm1, %v8295_v23 }
  0xce   : > { %6775 = vmatprep.mubr.msk.bf16.mxu0 %vm593_vm1, %v8299_v24 }
  0xd1   : > { %6670 = vmatmul.mubr.msk.bf16.gmra.mrb[20].mxu1 %vm593_vm1, %v8283_v6 }
  0xd2   : > { %6673 = vmatprep.mubr.msk.bf16.mxu1 %vm593_vm1, %v8295_v23 }
  0xd5   : > { %6776 = vmatmul.mubr.msk.bf16.gmra.mrb[24].mxu0 %vm593_vm1, %v8311_v35 }
  0xd6   : > { %6779 = vmatprep.mubr.msk.bf16.mxu0 %vm593_vm1, %v8315_v44 }
  0xd9   : > { %6674 = vmatmul.mubr.msk.bf16.gmra.mrb[24].mxu1 %vm593_vm1, %v8299_v24 }
  0xda   : > { %6677 = vmatprep.mubr.msk.bf16.mxu1 %vm593_vm1, %v8311_v35 }
  0xdd   : > { %6780 = vmatmul.mubr.msk.bf16.gmra.mrb[28].mxu0 %vm593_vm1, %v8325_v50 }
  0xde   : > { %6785 = vmatprep.mubr.msk.bf16.mxu0 %vm593_vm1, %v7934_v13  ;;  %v6048_v13 = vld [vmem:[%s7924_s25 + $0x198] sm:$0xff] }
  0xe1   : > { %6678 = vmatmul.mubr.msk.bf16.gmra.mrb[28].mxu1 %vm593_vm1, %v8315_v44 }
  0xe5   : > { %6786 = vmatmul.mubr.msk.bf16.vlgmr.msra.gmra.mrb[0].mxu0 %vm593_vm1, %v7937_v15  ;;  %v6049_v15 = vld [vmem:[%s7924_s25 + $0x1a0] sm:$0xff] }
  0xe6   : > { %6818 = vmatpush3.bf16.msra.mxu0 %v2590_v56  ;;  %6789 = vmatprep.mubr.msk.bf16.mxu0 %vm593_vm1, %v7956_v21  ;;  %v2244_v21 = vpack.c.bf16 %v6049_v15, %v6048_v13 }
  0xe7   : > { %7365 = vmatprep.subr.msk.bf16.mxu0 %vm642_vm0, %v6148_v57 }
  0xed   : > { %6790 = vmatmul.mubr.msk.bf16.gmra.mrb[4].mxu0 %vm593_vm1, %v7958_v22  ;;  %v2884_v22 = vsel %vm642_vm0, %v6148_v57, 0 }
  0xee   : > { %6793 = vmatprep.mubr.msk.bf16.mxu0 %vm593_vm1, %v7982_v37  ;;  %v6098_v37 = vld [vmem:[%s7924_s25 + $0x1a1] sm:$0xff] }
  0xf5   : > { %6794 = vmatmul.mubr.msk.bf16.gmra.mrb[8].mxu0 %vm593_vm1, %v7988_v40 }
  0xf6   : > { %6797 = vmatprep.mubr.msk.bf16.mxu0 %vm593_vm1, %v8006_v49 }
  0xfd   : > { %6798 = vmatmul.mubr.msk.bf16.gmra.mrb[12].mxu0 %vm593_vm1, %v8012_v52 }
  0xfe   : > { %6801 = vmatprep.mubr.msk.bf16.mxu0 %vm593_vm1, %v8030_v61 }
 0x105   : > { %6802 = vmatmul.mubr.msk.bf16.gmra.mrb[16].mxu0 %vm593_vm1, %v8036_v0 }
 0x106   : > { %6805 = vmatprep.mubr.msk.bf16.mxu0 %vm593_vm1, %v8054_v10 }
 0x10d   : > { %6806 = vmatmul.mubr.msk.bf16.gmra.mrb[20].mxu0 %vm593_vm1, %v8060_v14  ;;  %v6146_v14 = vld [vmem:[%s7924_s25 + $0x19a] sm:$0xff] }
 0x10e   : > { %6809 = vmatprep.mubr.msk.bf16.mxu0 %vm593_vm1, %v8078_v27 }
 0x115   : > { %6810 = vmatmul.mubr.msk.bf16.gmra.mrb[24].mxu0 %vm593_vm1, %v8084_v31 }
 0x116   : > { %6813 = vmatprep.mubr.msk.bf16.mxu0 %vm593_vm1, %v8100_v42 }
 0x11d   : > { %6814 = vmatmul.mubr.msk.bf16.gmra.mrb[28].mxu0 %vm593_vm1, %v2244_v21 }
 0x11e   : > { %6819 = vmatprep.mubr.msk.bf16.mxu0 %vm593_vm1, %v7978_v36  ;;  %v6097_v36 = vld [vmem:[%s7924_s25 + $0x199] sm:$0xff] }
 0x11f   : > { %v2538_v40 = vpack.c.bf16 %v6098_v37, %v6097_v36 }
 0x125   : > { %6820 = vmatmul.mubr.msk.bf16.vlgmr.msra.gmra.mrb[0].mxu0 %vm593_vm1, %v7990_v41 }
 0x126   : > { %6852 = vmatpush3.bf16.msra.mxu0 %v2884_v22  ;;  %6823 = vmatprep.mubr.msk.bf16.mxu0 %vm593_vm1, %v8002_v48 }
 0x12d   : > { %6824 = vmatmul.mubr.msk.bf16.gmra.mrb[4].mxu0 %vm593_vm1, %v8014_v53 }
 0x12e   : > { %6827 = vmatprep.mubr.msk.bf16.mxu0 %vm593_vm1, %v8026_v60 }
 0x135   : > { %6828 = vmatmul.mubr.msk.bf16.gmra.mrb[8].mxu0 %vm593_vm1, %v8038_v1 }
 0x136   : > { %6831 = vmatprep.mubr.msk.bf16.mxu0 %vm593_vm1, %v8050_v8 }
 0x13d   : > { %6832 = vmatmul.mubr.msk.bf16.gmra.mrb[12].mxu0 %vm593_vm1, %v8062_v17  ;;  %v6147_v17 = vld [vmem:[%s7924_s25 + $0x1a2] sm:$0xff] }
 0x13e   : > { %6835 = vmatprep.mubr.msk.bf16.mxu0 %vm593_vm1, %v8074_v26  ;;  %v2832_v27 = vpack.c.bf16 %v6147_v17, %v6146_v14 }
 0x145   : > { %6836 = vmatmul.mubr.msk.bf16.gmra.mrb[16].mxu0 %vm593_vm1, %v8086_v32 }
 0x146   : > { %6839 = vmatprep.mubr.msk.bf16.mxu0 %vm593_vm1, %v8096_v39 }
 0x14d   : > { %6840 = vmatmul.mubr.msk.bf16.gmra.mrb[20].mxu0 %vm593_vm1, %v8106_v45 }
 0x14e   : > { %6843 = vmatprep.mubr.msk.bf16.mxu0 %vm593_vm1, %v8118_v51 }
 0x155   : > { %6844 = vmatmul.mubr.msk.bf16.gmra.mrb[24].mxu0 %vm593_vm1, %v8130_v59 }
 0x156   : > { %6847 = vmatprep.mubr.msk.bf16.mxu0 %vm593_vm1, %v8194_v4 }
 0x15d   : > { %6848 = vmatmul.mubr.msk.bf16.gmra.mrb[28].mxu0 %vm593_vm1, %v2538_v40 }
 0x15e   : > { %6853 = vmatprep.mubr.msk.bf16.mxu0 %vm593_vm1, %v8207_v18 }
 0x165   : > { %6854 = vmatmul.mubr.msk.bf16.vlgmr.msra.gmra.mrb[0].mxu0 %vm593_vm1, %v8211_v19 }
 0x166   : > { %6857 = vmatprep.mubr.msk.bf16.mxu0 %vm593_vm1, %v8233_v38 }
 0x16d   : > { %6858 = vmatmul.mubr.msk.bf16.gmra.mrb[4].mxu0 %vm593_vm1, %v8236_v43 }
 0x16e   : > { %6861 = vmatprep.mubr.msk.bf16.mxu0 %vm593_vm1, %v8247_v54 }
 0x175   : > { %6862 = vmatmul.mubr.msk.bf16.gmra.mrb[8].mxu0 %vm593_vm1, %v8251_v55 }
 0x176   : > { %6865 = vmatprep.mubr.msk.bf16.mxu0 %vm593_vm1, %v8263_v62 }
 0x17c   : > { %v8428_v41 = vpop.f32.mrb[0].mxu1 }
 0x17d   : > { %6866 = vmatmul.mubr.msk.bf16.gmra.mrb[12].mxu0 %vm593_vm1, %v8267_v16  ;;  %v8430_v48 = vpop.f32.mrb[1].mxu1 }
 0x17e   : > { %6869 = vmatprep.mubr.msk.bf16.mxu0 %vm593_vm1, %v8279_v5  ;;  %v8434_v49 = vpop.f32.mrb[2].mxu1 }
 0x17f   : > { %v8438_v52 = vpop.f32.mrb[3].mxu1 }
 0x184   : > { %v8440_v53 = vpop.f32.mrb[4].mxu1 }
 0x185   : > { %6870 = vmatmul.mubr.msk.bf16.gmra.mrb[16].mxu0 %vm593_vm1, %v8283_v6  ;;  %v8442_v60 = vpop.f32.mrb[5].mxu1 }
 0x186   : > { %6873 = vmatprep.mubr.msk.bf16.mxu0 %vm593_vm1, %v8295_v23  ;;  %v8446_v61 = vpop.f32.mrb[6].mxu1 }
 0x187   : > { %v8450_v0 = vpop.f32.mrb[7].mxu1 }
 0x18c   : > { %v8452_v1 = vpop.f32.mrb[8].mxu1 }
 0x18d   : > { %6874 = vmatmul.mubr.msk.bf16.gmra.mrb[20].mxu0 %vm593_vm1, %v8299_v24  ;;  %v8454_v8 = vpop.f32.mrb[9].mxu1 }
 0x18e   : > { %6877 = vmatprep.mubr.msk.bf16.mxu0 %vm593_vm1, %v8311_v35  ;;  %v8458_v10 = vpop.f32.mrb[10].mxu1 }
 0x18f   : > { %v8464_v26 = vpop.f32.mrb[11].mxu1 }
 0x194   : > { %v8466_v31 = vpop.f32.mrb[12].mxu1 }
 0x195   : > { %6878 = vmatmul.mubr.msk.bf16.gmra.mrb[24].mxu0 %vm593_vm1, %v8315_v44  ;;  %v8468_v32 = vpop.f32.mrb[13].mxu1 }
 0x196   : > { %6881 = vmatprep.mubr.msk.bf16.mxu0 %vm593_vm1, %v8325_v50  ;;  %v8471_v39 = vpop.f32.mrb[14].mxu1 }
 0x197   : > { %v8473_v42 = vpop.f32.mrb[15].mxu1 }
 0x19c   : > { %v8475_v45 = vpop.f32.mrb[16].mxu1 }
 0x19d   : > { %6882 = vmatmul.mubr.msk.bf16.gmra.mrb[28].mxu0 %vm593_vm1, %v2832_v27  ;;  %v8477_v51 = vpop.f32.mrb[17].mxu1 }
 0x19e   : > { %v8479_v59 = vpop.f32.mrb[18].mxu1 }
 0x19f   : > { %v8481_v4 = vpop.f32.mrb[19].mxu1 }
 0x1a4   : > { %v8483_v18 = vpop.f32.mrb[20].mxu1 }
 0x1a5   : > { %10567 = vst [vmem:[#allocation8_spill] sm:$0xff] %v8483_v18  ;;  %v8485_v19 = vpop.f32.mrb[21].mxu1 }
 0x1a6   : > { %10568 = vst [vmem:[#allocation9_spill] sm:$0xff] %v8485_v19  ;;  %v8487_v25 = vpop.f32.mrb[22].mxu1 }
 0x1a7   : > { %10569 = vst [vmem:[#allocation10_spill] sm:$0xff] %v8487_v25  ;;  %v8489_v38 = vpop.f32.mrb[23].mxu1 }
 0x1a8   : > { %10570 = vst [vmem:[#allocation11_spill] sm:$0xff] %v8489_v38 }
 0x1ac   : > { %v8491_v43 = vpop.f32.mrb[24].mxu1 }
 0x1ad   : > { %10571 = vst [vmem:[#allocation12_spill] sm:$0xff] %v8491_v43  ;;  %v8493_v54 = vpop.f32.mrb[25].mxu1 }
 0x1ae   : > { %10572 = vst [vmem:[#allocation13_spill] sm:$0xff] %v8493_v54  ;;  %v8495_v55 = vpop.f32.mrb[26].mxu1 }
 0x1af   : > { %10573 = vst [vmem:[#allocation14_spill] sm:$0xff] %v8495_v55  ;;  %v8497_v58 = vpop.f32.mrb[27].mxu1 }
 0x1b0   : > { %10574 = vst [vmem:[#allocation15_spill] sm:$0xff] %v8497_v58 }
 0x1b4   : > { %v8499_v28 = vpop.f32.mrb[28].mxu1 }
 0x1b5   : > { %10575 = vst [vmem:[#allocation16_spill] sm:$0xff] %v8499_v28  ;;  %v8501_v62 = vpop.f32.mrb[29].mxu1 }
 0x1b6   : > { %10576 = vst [vmem:[#allocation17_spill] sm:$0xff] %v8501_v62  ;;  %v8503_v16 = vpop.f32.mrb[30].mxu1 }
 0x1b7   : > { %10577 = vst [vmem:[#allocation18_spill] sm:$0xff] %v8503_v16  ;;  %v8505_v9 = vpop.f32.mrb[31].mxu1 }
 0x1b8   : > { %10578 = vst [vmem:[#allocation19_spill] sm:$0xff] %v8505_v9 }
 0x238   : > { %v6855_v2 = vpop.f32.mrb[0].mxu0 }
 0x239   : > { %v7101_v5 = vadd.f32 %v6855_v2, %v8428_v41  ;;  %v2920_v6 = vpop.f32.mrb[1].mxu0 }
 0x23a   : > { %v7102_v11 = vadd.f32 %v2920_v6, %v8430_v48  ;;  %v6856_v12 = vpop.f32.mrb[2].mxu0 }
 0x23b   : > { %v3088_v20 = vmul.f32 %v7101_v5, %v8510_v3  ;;  %v7103_v23 = vadd.f32 %v6856_v12, %v8434_v49  ;;  %v2923_v24 = vpop.f32.mrb[3].mxu0 }
 0x23c   : > { %v3086_v29 = vmul.f32 %v7102_v11, %v8510_v3  ;;  %v7104_v30 = vadd.f32 %v2923_v24, %v8438_v52 }
 0x23d   : > { %v8524_v33 = vadd.f32 %v8516_v7, %v3088_v20  ;;  %v3089_v34 = vmul.f32 %v7103_v23, %v8510_v3 }
 0x23e   : > { %v8528_v35 = vadd.f32 %v8516_v7, %v3086_v29  ;;  %v3087_v44 = vmul.f32 %v7104_v30, %v8510_v3 }
 0x23f   : > { %v6169_v46 = vmul.f32 -1.442695, %v8524_v33  ;;  %v8533_v47 = vadd.f32 %v8516_v7, %v3089_v34 }
 0x240   : > { %v6167_v50 = vmul.f32 -1.442695, %v8528_v35  ;;  %v8537_v56 = vadd.f32 %v8516_v7, %v3087_v44  ;;  %v6859_v57 = vpop.f32.mrb[4].mxu0 }
 0x241   : > { %7419 = vpow2.f32 %v6169_v46  ;;  %v6170_v13 = vmul.f32 -1.442695, %v8533_v47  ;;  %v7105_v15 = vadd.f32 %v6859_v57, %v8440_v53  ;;  %v2936_v21 = vpop.f32.mrb[5].mxu0 }
 0x242   : > { %7421 = vpow2.f32 %v6167_v50  ;;  %v6168_v22 = vmul.f32 -1.442695, %v8537_v56  ;;  %v7106_v36 = vadd.f32 %v2936_v21, %v8442_v60  ;;  %v6860_v37 = vpop.f32.mrb[6].mxu0 }
 0x243   : > { %7423 = vpow2.f32 %v6170_v13  ;;  %v3092_v40 = vmul.f32 %v7105_v15, %v8510_v3  ;;  %v7107_v41 = vadd.f32 %v6860_v37, %v8446_v61  ;;  %v2939_v48 = vpop.f32.mrb[7].mxu0 }
 0x244   : > { %7425 = vpow2.f32 %v6168_v22  ;;  %v3090_v49 = vmul.f32 %v7106_v36, %v8510_v3  ;;  %v7108_v52 = vadd.f32 %v2939_v48, %v8450_v0  ;;  %v3486_v48 = vld [vmem:[#allocation2 + $0x7] sm:$0xff] }
 0x245   : > { %v8548_v53 = vadd.f32 %v8516_v7, %v3092_v40  ;;  %v3093_v14 = vmul.f32 %v7107_v41, %v8510_v3  ;;  %v8586_v41 = vld [vmem:[%s10501_s4] ss:$0 sm:$0xff] }
 0x246   : > { %v8552_v17 = vadd.f32 %v8516_v7, %v3090_v49  ;;  %v3091_v60 = vmul.f32 %v7108_v52, %v8510_v3 }
 0x247   : > { %v6173_v27 = vmul.f32 -1.442695, %v8548_v53  ;;  %v8557_v61 = vadd.f32 %v8516_v7, %v3093_v14 }
 0x248   : > { %v6171_v63 = vmul.f32 -1.442695, %v8552_v17  ;;  %v8561_v2 = vadd.f32 %v8516_v7, %v3091_v60  ;;  %v6863_v0 = vpop.f32.mrb[8].mxu0 }
 0x249   : > { %7427 = vpow2.f32 %v6173_v27  ;;  %v6174_v5 = vmul.f32 -1.442695, %v8557_v61  ;;  %v7109_v6 = vadd.f32 %v6863_v0, %v8452_v1  ;;  %v2952_v11 = vpop.f32.mrb[9].mxu0  ;;  %v8597_v0 = vld [vmem:[%s10501_s4 + $0x1] ss:$0 sm:$0xff] }
 0x24a   : > { %7429 = vpow2.f32 %v6171_v63  ;;  %v6172_v12 = vmul.f32 -1.442695, %v8561_v2  ;;  %v7110_v20 = vadd.f32 %v2952_v11, %v8454_v8  ;;  %v6864_v23 = vpop.f32.mrb[10].mxu0 }
 0x24b   : > { %v7420_v24 = vpop.eup %7419  ;;  %v3096_v29 = vmul.f32 %v7109_v6, %v8510_v3  ;;  %v7111_v30 = vadd.f32 %v6864_v23, %v8458_v10  ;;  %v2955_v34 = vpop.f32.mrb[11].mxu0  ;;  %7431 = vpow2.f32 %v6174_v5  ;;  %v3487_v23 = vld [vmem:[#allocation2 + $0xf] sm:$0xff] }
 0x24c   : > { %v7422_v44 = vpop.eup %7421  ;;  %v3255_v46 = vadd.f32 1.0, %v7420_v24  ;;  %v3094_v50 = vmul.f32 %v7110_v20, %v8510_v3  ;;  %v7112_v1 = vadd.f32 %v2955_v34, %v8464_v26  ;;  %7433 = vpow2.f32 %v6172_v12 }
 0x24d   : > { %v7424_v57 = vpop.eup %7423  ;;  %v3253_v13 = vadd.f32 1.0, %v7422_v44  ;;  %v8572_v15 = vadd.f32 %v8516_v7, %v3096_v29  ;;  %v3097_v8 = vmul.f32 %v7111_v30, %v8510_v3  ;;  %v3525_v12 = vmul.f32 %v8586_v41, %v3486_v48 }
 0x24e   : > { %v7426_v21 = vpop.eup %7425  ;;  %7435 = vrcp.f32 %v3255_v46  ;;  %v3256_v22 = vadd.f32 1.0, %v7424_v57  ;;  %v8576_v10 = vadd.f32 %v8516_v7, %v3094_v50  ;;  %v3095_v36 = vmul.f32 %v7112_v1, %v8510_v3 }
 0x24f   : > { %7437 = vrcp.f32 %v3253_v13  ;;  %v3254_v37 = vadd.f32 1.0, %v7426_v21  ;;  %v6177_v26 = vmul.f32 -1.442695, %v8572_v15  ;;  %v8581_v40 = vadd.f32 %v8516_v7, %v3097_v8  ;;  %v3693_v13 = vld [vmem:[#allocation2 + $0x9] sm:$0xff] }
 0x250   : > { %7439 = vrcp.f32 %v3256_v22  ;;  %v6175_v49 = vmul.f32 -1.442695, %v8576_v10  ;;  %v8590_v52 = vadd.f32 %v8516_v7, %v3095_v36  ;;  %v6867_v14 = vpop.f32.mrb[12].mxu0  ;;  %v3629_v20 = vmul.f32 0.0, %v8597_v0  ;;  %v3694_v22 = vld [vmem:[#allocation2 + $0x11] sm:$0xff] }
 0x251   : > { %7441 = vrcp.f32 %v3254_v37  ;;  %v6178_v60 = vmul.f32 -1.442695, %v8581_v40  ;;  %v7113_v27 = vadd.f32 %v6867_v14, %v8466_v31  ;;  %v2968_v63 = vpop.f32.mrb[13].mxu0  ;;  %v3526_v1 = vmul.f32 %v8586_v41, %v3487_v23 }
 0x252   : > { %v7114_v5 = vadd.f32 %v2968_v63, %v8468_v32  ;;  %v6868_v6 = vpop.f32.mrb[14].mxu0  ;;  %7443 = vpow2.f32 %v6177_v26  ;;  %v6176_v34 = vmul.f32 -1.442695, %v8590_v52 }
 0x253   : > { %v7428_v11 = vpop.eup %7427  ;;  %v7115_v24 = vadd.f32 %v6868_v6, %v8471_v39  ;;  %v2971_v29 = vpop.f32.mrb[15].mxu0  ;;  %7445 = vpow2.f32 %v6175_v49  ;;  %v3100_v32 = vmul.f32 %v7113_v27, %v8510_v3  ;;  %v8610_v39 = vld [vmem:[%s10501_s4 + $0x2] ss:$0 sm:$0xff] }
 0x254   : > { %v7430_v31 = vpop.eup %7429  ;;  %v3259_v30 = vadd.f32 1.0, %v7428_v11  ;;  %v7116_v44 = vadd.f32 %v2971_v29, %v8473_v42  ;;  %7447 = vpow2.f32 %v6178_v60  ;;  %v3098_v8 = vmul.f32 %v7114_v5, %v8510_v3 }
 0x255   : > { %v3257_v46 = vadd.f32 1.0, %v7430_v31  ;;  %v7432_v50 = vpop.eup %7431  ;;  %v3661_v42 = vadd.f32 %v3629_v20, %v3525_v12  ;;  %v3101_v36 = vmul.f32 %v7115_v24, %v8510_v3  ;;  %v8616_v49 = vadd.f32 %v8516_v7, %v3100_v32 }
 0x256   : > { %7449 = vrcp.f32 %v3259_v30  ;;  %v7434_v57 = vpop.eup %7433  ;;  %v3099_v14 = vmul.f32 %v7116_v44, %v8510_v3  ;;  %v3733_v6 = vmul.f32 %v8610_v39, %v3693_v13  ;;  %v3662_v11 = vadd.f32 %v3629_v20, %v3526_v1 }
 0x257   : > { %7451 = vrcp.f32 %v3257_v46  ;;  %10580 = vst [vmem:[#allocation21_spill] sm:$0xff] %v8616_v49  ;;  %v3734_v29 = vmul.f32 %v8610_v39, %v3694_v22  ;;  %v3260_v31 = vadd.f32 1.0, %v7432_v50  ;;  %v3258_v20 = vadd.f32 1.0, %v7434_v57 }
 0x258   : > { %v7436_v21 = vpop.eup %7435  ;;  %7453 = vpow2.f32 %v6176_v34  ;;  %v6871_v37 = vpop.f32.mrb[16].mxu0  ;;  %v6181_v44 = vmul.f32 -1.442695, %v8616_v49  ;;  %v3765_v50 = vadd.f32 %v3733_v6, %v3661_v42 }
 0x259   : > { %v7438_v26 = vpop.eup %7437  ;;  %v3351_v48 = vmul.f32 %v7436_v21, %v8524_v33  ;;  %v8620_v60 = vadd.f32 %v6871_v37, %v8475_v45  ;;  %v2984_v27 = vpop.f32.mrb[17].mxu0  ;;  %v8630_v45 = vadd.f32 %v8516_v7, %v3098_v8  ;;  %v8648_v1 = vadd.f32 %v3734_v29, %v3662_v11  ;;  %v8654_v8 = vld [vmem:[%s10501_s4 + $0x7] ss:$0 sm:$0xff] }
 0x25a   : > { %v7440_v63 = vpop.eup %7439  ;;  %v3349_v5 = vmul.f32 %v7438_v26, %v8528_v35  ;;  %v8625_v12 = vadd.f32 %v2984_v27, %v8477_v51  ;;  %v6872_v23 = vpop.f32.mrb[18].mxu0  ;;  %v8636_v51 = vadd.f32 %v8516_v7, %v3101_v36  ;;  %7455 = vrcp.f32 %v3260_v31  ;;  %v8668_v26 = vld [vmem:[%s10501_s4 + $0x3] ss:$0 sm:$0xff] }
 0x25b   : > { %v7442_v33 = vpop.eup %7441  ;;  %3456 = vst [vmem:[#allocation2 + $0x48] sm:$0xff] %v3351_v48  ;;  %v3352_v24 = vmul.f32 %v7440_v63, %v8533_v47  ;;  %10581 = vst [vmem:[#allocation22_spill] sm:$0xff] %v8630_v45  ;;  %v2987_v30 = vpop.f32.mrb[19].mxu0  ;;  %v8640_v47 = vadd.f32 %v8516_v7, %v3099_v14  ;;  %v6179_v57 = vmul.f32 -1.442695, %v8630_v45  ;;  %7457 = vrcp.f32 %v3258_v20 }
 0x25c   : > { %3454 = vst [vmem:[#allocation2 + $0x28] sm:$0xff] %v3349_v5  ;;  %v8633_v35 = vmul.f32 %v7442_v33, %v8537_v56  ;;  %10582 = vst [vmem:[#allocation23_spill] sm:$0xff] %v8636_v51  ;;  %v7444_v34 = vpop.eup %7443  ;;  %v8646_v56 = vld [vmem:[%s10501_s4 + $0x4] ss:$0 sm:$0xff]  ;;  %v6182_v21 = vmul.f32 -1.442695, %v8636_v51  ;;  %v8658_v22 = vadd.f32 %v6872_v23, %v8479_v59  ;;  %v8661_v36 = vadd.f32 %v2987_v30, %v8481_v4 }
 0x25d   : > { %3457 = vst [vmem:[#allocation2 + $0x50] sm:$0xff] %v3352_v24  ;;  %10583 = vst [vmem:[#allocation24_spill] sm:$0xff] %v8640_v47  ;;  %v7446_v46 = vpop.eup %7445  ;;  %v3263_v27 = vadd.f32 1.0, %v7444_v34  ;;  %7459 = vpow2.f32 %v6181_v44  ;;  %v8674_v63 = vmul.f32 -1.442695, %v8640_v47  ;;  %v3633_v11 = vmul.f32 %v8597_v0, %v3351_v48 }
 0x25e   : > { %3455 = vst [vmem:[#allocation2 + $0x30] sm:$0xff] %v8633_v35  ;;  %v7448_v32 = vpop.eup %7447  ;;  %10584 = vst [vmem:[#allocation25_spill] sm:$0xff] %v8661_v36  ;;  %v8680_v23 = vmul.f32 %v8646_v56, %v3351_v48  ;;  %v3261_v29 = vadd.f32 1.0, %v7446_v46  ;;  %v8688_v31 = vmul.f32 %v8654_v8, %v3351_v48  ;;  %v3631_v20 = vmul.f32 %v8597_v0, %v3349_v5 }
 0x25f   : > { %10586 = vst [vmem:[#allocation27_spill] sm:$0xff] %v8674_v63  ;;  %v3264_v34 = vadd.f32 1.0, %v7448_v32  ;;  %7461 = vpow2.f32 %v6179_v57  ;;  %v3941_v48 = vmul.f32 %v8646_v56, %v3349_v5  ;;  %v8703_v62 = vmul.f32 %v8646_v56, %v3352_v24  ;;  %v8711_v5 = vld [vmem:[%s10501_s4 + $0x6] ss:$0 sm:$0xff] }
 0x260   : > { %v7450_v13 = vpop.eup %7449  ;;  %v8663_v42 = vpop.f32.mrb[20].mxu0  ;;  %7463 = vpow2.f32 %v6182_v21  ;;  %v8706_v28 = vmul.f32 %v8654_v8, %v3352_v24 }
 0x261   : > { %10585 = vst [vmem:[#allocation26_spill] sm:$0xff] %v8663_v42  ;;  %v7452_v37 = vpop.eup %7451  ;;  %v8671_v14 = vmul.f32 %v7450_v13, %v8548_v53  ;;  %v8676_v59 = vpop.f32.mrb[21].mxu0  ;;  %7465 = vrcp.f32 %v3263_v27  ;;  %v8716_v27 = vld [vmem:[%s10501_s4 + $0x5] ss:$0 sm:$0xff] }
 0x262   : > { %10587 = vst [vmem:[#allocation28_spill] sm:$0xff] %v8676_v59  ;;  %v7454_v4 = vpop.eup %7453  ;;  %v3490_v6 = vld [vmem:[#allocation2 + $0x47] sm:$0xff]  ;;  %v8683_v33 = vmul.f32 %v7452_v37, %v8552_v17  ;;  %v8685_v53 = vpop.f32.mrb[22].mxu0  ;;  %v8700_v37 = vmul.f32 %v8597_v0, %v3352_v24  ;;  %7467 = vrcp.f32 %v3261_v29  ;;  %v3942_v24 = vmul.f32 %v8646_v56, %v8633_v35 }
 0x263   : > { %10588 = vst [vmem:[#allocation29_spill] sm:$0xff] %v8685_v53  ;;  %v3488_v30 = vld [vmem:[#allocation2 + $0x27] sm:$0xff]  ;;  %3460 = vst [vmem:[#allocation2 + $0x88] sm:$0xff] %v8671_v14  ;;  %v8692_v44 = vpop.f32.mrb[23].mxu0  ;;  %v3529_v13 = vmul.f32 %v8586_v41, %v3490_v6  ;;  %v3262_v32 = vadd.f32 1.0, %v7454_v4  ;;  %7469 = vrcp.f32 %v3264_v34  ;;  %v3839_v51 = vmul.f32 %v8668_v26, %v3490_v6 }
 0x264   : > { %10589 = vst [vmem:[#allocation30_spill] sm:$0xff] %v8692_v44  ;;  %v3527_v17 = vmul.f32 %v8586_v41, %v3488_v30  ;;  %v3837_v46 = vmul.f32 %v8668_v26, %v3488_v30  ;;  %3458 = vst [vmem:[#allocation2 + $0x68] sm:$0xff] %v8683_v33  ;;  %v3697_v9 = vld [vmem:[#allocation2 + $0x49] sm:$0xff]  ;;  %v7456_v55 = vpop.eup %7455 }
 0x265   : > { %v3489_v16 = vld [vmem:[#allocation2 + $0x2f] sm:$0xff]  ;;  %v3665_v29 = vadd.f32 %v3633_v11, %v3529_v13  ;;  %v3737_v58 = vmul.f32 %v8610_v39, %v3697_v9  ;;  %7471 = vrcp.f32 %v3262_v32  ;;  %v4150_v11 = vmul.f32 %v8711_v5, %v3490_v6 }
 0x266   : > { %v3869_v57 = vadd.f32 %v3837_v46, %v3765_v50  ;;  %v3695_v30 = vld [vmem:[#allocation2 + $0x29] sm:$0xff]  ;;  %v3663_v21 = vadd.f32 %v3631_v20, %v3527_v17  ;;  %v3632_v50 = vmul.f32 %v8597_v0, %v8633_v35  ;;  %v3696_v4 = vld [vmem:[#allocation2 + $0x31] sm:$0xff]  ;;  %v3528_v20 = vmul.f32 %v8586_v41, %v3489_v16  ;;  %v7458_v35 = vpop.eup %7457 }
 0x267   : > { %v3491_v47 = vld [vmem:[#allocation2 + $0x4f] sm:$0xff]  ;;  %v3735_v54 = vmul.f32 %v8610_v39, %v3695_v30  ;;  %v3838_v45 = vmul.f32 %v8668_v26, %v3489_v16  ;;  %v3736_v13 = vmul.f32 %v8610_v39, %v3696_v4  ;;  %v8743_v16 = vld [vmem:[%s10501_s4 + $0x8] ss:$0 sm:$0xff]  ;;  %v4046_v59 = vmul.f32 %v8716_v27, %v3696_v4 }
 0x268   : > { %v3973_v46 = vadd.f32 %v3941_v48, %v3869_v57  ;;  %v8724_v17 = vpop.f32.mrb[24].mxu0  ;;  %v3664_v34 = vadd.f32 %v3632_v50, %v3528_v20  ;;  %v4045_v48 = vmul.f32 %v8716_v27, %v3695_v30  ;;  %v3530_v49 = vmul.f32 %v8586_v41, %v3491_v47  ;;  %v3698_v4 = vld [vmem:[#allocation2 + $0x51] sm:$0xff] }
 0x269   : > { %10590 = vst [vmem:[#allocation31_spill] sm:$0xff] %v8724_v17  ;;  %v8729_v43 = vpop.f32.mrb[25].mxu0  ;;  %v8736_v17 = vpop.eup %7459  ;;  %v3840_v44 = vmul.f32 %v8668_v26, %v3491_v47  ;;  %v3767_v32 = vadd.f32 %v3735_v54, %v3663_v21  ;;  %v3870_v6 = vadd.f32 %v3838_v45, %v8648_v1  ;;  %v3769_v30 = vadd.f32 %v3737_v58, %v3665_v29 }
 0x26a   : > { %10591 = vst [vmem:[#allocation32_spill] sm:$0xff] %v8729_v43  ;;  %v8734_v57 = vpop.f32.mrb[26].mxu0  ;;  %v3768_v43 = vadd.f32 %v3736_v13, %v3664_v34  ;;  %v4077_v38 = vadd.f32 %v4045_v48, %v3973_v46  ;;  %v8749_v63 = vpop.eup %7461  ;;  %v4151_v54 = vmul.f32 %v8711_v5, %v3491_v47  ;;  %v4358_v45 = vmul.f32 %v8743_v16, %v3697_v9 }
 0x26b   : > { %10592 = vst [vmem:[#allocation33_spill] sm:$0xff] %v8734_v57  ;;  %v3492_v50 = vld [vmem:[#allocation2 + $0x67] sm:$0xff]  ;;  %v8746_v20 = vpop.f32.mrb[27].mxu0  ;;  %v4047_v57 = vmul.f32 %v8716_v27, %v3697_v9  ;;  %v3871_v53 = vadd.f32 %v3839_v51, %v3767_v32  ;;  %v3974_v25 = vadd.f32 %v3942_v24, %v3870_v6  ;;  %v8753_v42 = vpop.eup %7463  ;;  %v3945_v46 = vmul.f32 %v8646_v56, %v8683_v33 }
 0x26c   : > { %10593 = vst [vmem:[#allocation34_spill] sm:$0xff] %v8746_v20  ;;  %v3841_v19 = vmul.f32 %v8668_v26, %v3492_v50  ;;  %10594 = vst [vmem:[#allocation35_spill] sm:$0xff] %v8753_v42  ;;  %v3872_v1 = vadd.f32 %v3840_v44, %v3768_v43  ;;  %v4182_v58 = vadd.f32 %v4150_v11, %v4077_v38  ;;  %v7466_v21 = vpop.eup %7465  ;;  %v8771_v43 = vld [vmem:[%s10502_s5] ss:$0 sm:$0xff] }
 0x26d   : > { %v4078_v29 = vadd.f32 %v4046_v59, %v3974_v25  ;;  %v3975_v51 = vadd.f32 %v8680_v23, %v3871_v53  ;;  %v7468_v24 = vpop.eup %7467  ;;  %v4152_v48 = vmul.f32 %v8711_v5, %v3492_v50  ;;  %v3356_v47 = vmul.f32 %v7456_v55, %v8557_v61  ;;  %v3494_v59 = vld [vmem:[#allocation2 + $0x87] sm:$0xff] }
 0x26e   : > { %v3873_v34 = vadd.f32 %v3841_v19, %v3769_v30  ;;  %v4286_v13 = vadd.f32 %v8688_v31, %v4182_v58  ;;  %v8764_v9 = vmul.f32 %v7458_v35, %v8561_v2  ;;  %v7470_v25 = vpop.eup %7469  ;;  %v3976_v31 = vadd.f32 %v8703_v62, %v3872_v1  ;;  %v8791_v62 = vld [vmem:[%s10503_s6] ss:$0 sm:$0xff] }
 0x26f   : > { %v4183_v19 = vadd.f32 %v4151_v54, %v4078_v29  ;;  %v4079_v53 = vadd.f32 %v4047_v57, %v3975_v51  ;;  %v3666_v55 = vadd.f32 %v8700_v37, %v3530_v49  ;;  %3461 = vst [vmem:[#allocation2 + $0x90] sm:$0xff] %v3356_v47  ;;  %v8780_v2 = vmul.f32 %v8620_v60, %v8510_v3  ;;  %v7472_v35 = vpop.eup %7471 }
 0x270   : > { %v8766_v38 = vpop.f32.mrb[28].mxu0  ;;  %v8773_v23 = vadd.f32 %v3945_v46, %v3873_v34  ;;  %v4390_v61 = vadd.f32 %v4358_v45, %v4286_v13  ;;  %3459 = vst [vmem:[#allocation2 + $0x70] sm:$0xff] %v8764_v9  ;;  %v8784_v44 = vmul.f32 %v8625_v12, %v8510_v3  ;;  %v4359_v11 = vmul.f32 %v8743_v16, %v3698_v4 }
 0x271   : > { %10595 = vst [vmem:[#allocation36_spill] sm:$0xff] %v8766_v38  ;;  %10596 = vst [vmem:[#allocation37_spill] sm:$0xff] %v8780_v2  ;;  %v4287_v57 = vadd.f32 %v8706_v28, %v4183_v19  ;;  %v4184_v49 = vadd.f32 %v4152_v48, %v4079_v53  ;;  %v4256_v37 = vmul.f32 %v8654_v8, %v8683_v33 }
 0x272   : > { %10597 = vst [vmem:[#allocation38_spill] sm:$0xff] %v8784_v44  ;;  %v4429_v60 = vmul.f32 %v8771_v43, %v4390_v61  ;;  %v3533_v32 = vmul.f32 %v8586_v41, %v3494_v59  ;;  %v3531_v12 = vmul.f32 %v8586_v41, %v3492_v50  ;;  %v8799_v6 = vmul.f32 %v7466_v21, %v8572_v15 }
 0x273   : > { %v4391_v30 = vadd.f32 %v4359_v11, %v4287_v57  ;;  %v8801_v28 = vadd.f32 %v4256_v37, %v4184_v49  ;;  %v3357_v54 = vmul.f32 %v7468_v24, %v8576_v10  ;;  %v8805_v45 = vmul.f32 %v7470_v25, %v8581_v40 }
 0x274   : > { %10598 = vst [vmem:[#allocation39_spill] sm:$0xff] %v8799_v6  ;;  %v3738_v1 = vmul.f32 %v8610_v39, %v3698_v4  ;;  %v8809_v58 = vadd.f32 %v8791_v62, %v4429_v60  ;;  %v3637_v29 = vmul.f32 %v8597_v0, %v8671_v14  ;;  %v8815_v15 = vmul.f32 %v8646_v56, %v8671_v14 }
 0x275   : > { %3464 = vst [vmem:[#allocation2 + $0xc8] sm:$0xff] %v8799_v6  ;;  %v4048_v50 = vmul.f32 %v8716_v27, %v3698_v4  ;;  %v4430_v10 = vmul.f32 %v8771_v43, %v4391_v30  ;;  %v8822_v40 = vmul.f32 %v8654_v8, %v8671_v14  ;;  %v3635_v21 = vmul.f32 %v8597_v0, %v8683_v33  ;;  %v8830_v4 = vpop.f32.mrb[29].mxu0 }
 0x276   : > { %10599 = vst [vmem:[#allocation40_spill] sm:$0xff] %v8809_v58  ;;  %3462 = vst [vmem:[#allocation2 + $0xa8] sm:$0xff] %v3357_v54  ;;  %v3770_v34 = vadd.f32 %v3738_v1, %v3666_v55  ;;  %v6218_v46 = vmul.f32 -1.442695, %v8809_v58  ;;  %v3843_v51 = vmul.f32 %v8668_v26, %v3494_v59  ;;  %v4154_v24 = vmul.f32 %v8711_v5, %v3494_v59  ;;  %v8838_v33 = vpop.f32.mrb[30].mxu0  ;;  %v3495_v37 = vld [vmem:[#allocation2 + $0x8f] sm:$0xff] }
 0x277   : > { %3465 = vst [vmem:[#allocation2 + $0xd0] sm:$0xff] %v8805_v45  ;;  %10600 = vst [vmem:[#allocation41_spill] sm:$0xff] %v8830_v4  ;;  %v8833_v13 = vadd.f32 %v8791_v62, %v4430_v10  ;;  %v3669_v14 = vadd.f32 %v3637_v29, %v3533_v32  ;;  %v3667_v48 = vadd.f32 %v3635_v21, %v3531_v12  ;;  %v3699_v61 = vld [vmem:[#allocation2 + $0x69] sm:$0xff]  ;;  %v8851_v11 = vpop.f32.mrb[31].mxu0  ;;  %v8882_v21 = vadd.f32 1.0, %v8736_v17  ;;  %v3702_v7 = vld [vmem:[#allocation2 + $0x91] sm:$0xff] }
 0x278   : > { %v8836_v25 = vmul.f32 %v7472_v35, %v8590_v52  ;;  %10602 = vst [vmem:[#allocation43_spill] sm:$0xff] %v8838_v33  ;;  %v8841_v19 = vmul.f32 %v8597_v0, %v3356_v47  ;;  %v8844_v53 = vmul.f32 %v8646_v56, %v3356_v47  ;;  %v8847_v59 = vmul.f32 %v8654_v8, %v3356_v47  ;;  %v3493_v35 = vld [vmem:[#allocation2 + $0x6f] sm:$0xff] }
 0x279   : > { %10601 = vst [vmem:[#allocation42_spill] sm:$0xff] %v8833_v13  ;;  %v3636_v55 = vmul.f32 %v8597_v0, %v8764_v9  ;;  %10603 = vst [vmem:[#allocation44_spill] sm:$0xff] %v8851_v11  ;;  %7473 = vpow2.f32 %v6218_v46  ;;  %v6219_v52 = vmul.f32 -1.442695, %v8833_v13  ;;  %v3946_v57 = vmul.f32 %v8646_v56, %v8764_v9  ;;  %v3701_v60 = vld [vmem:[#allocation2 + $0x89] sm:$0xff]  ;;  %v3700_v33 = vld [vmem:[#allocation2 + $0x71] sm:$0xff] }
 0x27a   : > { %v4080_v49 = vadd.f32 %v4048_v50, %v3976_v31  ;;  %3463 = vst [vmem:[#allocation2 + $0xb0] sm:$0xff] %v8836_v25  ;;  %v4257_v47 = vmul.f32 %v8654_v8, %v8764_v9  ;;  %v8861_v32 = vmul.f32 %v8646_v56, %v8799_v6  ;;  %v8865_v12 = vmul.f32 %v8654_v8, %v8799_v6 }
 0x27b   : > { %v8868_v30 = vmul.f32 %v8597_v0, %v3357_v54  ;;  %v3739_v31 = vmul.f32 %v8610_v39, %v3699_v61  ;;  %v3949_v1 = vmul.f32 %v8646_v56, %v3357_v54  ;;  %v8873_v29 = vmul.f32 %v8654_v8, %v3357_v54 }
 0x27c   : > { %v8877_v9 = vmul.f32 %v8646_v56, %v8805_v45  ;;  %7475 = vpow2.f32 %v6219_v52  ;;  %v3842_v50 = vmul.f32 %v8668_v26, %v3493_v35  ;;  %v4049_v10 = vmul.f32 %v8716_v27, %v3699_v61 }
 0x27d   : > { %v3534_v46 = vmul.f32 %v8586_v41, %v3495_v37  ;;  %v3741_v11 = vmul.f32 %v8610_v39, %v3701_v60  ;;  %v3771_v4 = vadd.f32 %v3739_v31, %v3667_v48  ;;  %v4153_v54 = vmul.f32 %v8711_v5, %v3493_v35  ;;  %v3496_v31 = vld [vmem:[#allocation2 + $0xa7] sm:$0xff] }
 0x27e   : > { %v3844_v38 = vmul.f32 %v8668_v26, %v3495_v37  ;;  %v3874_v20 = vadd.f32 %v3842_v50, %v3770_v34  ;;  %v4081_v52 = vadd.f32 %v4049_v10, %v8773_v23  ;;  %v4360_v6 = vmul.f32 %v8743_v16, %v3699_v61 }
 0x27f   : > { %v4051_v58 = vmul.f32 %v8716_v27, %v3701_v60  ;;  %v3532_v17 = vmul.f32 %v8586_v41, %v3493_v35  ;;  %v3875_v13 = vadd.f32 %v3843_v51, %v3771_v4  ;;  %v4185_v18 = vadd.f32 %v4153_v54, %v4080_v49 }
 0x280   : > { %v3978_v42 = vadd.f32 %v3946_v57, %v3874_v20  ;;  %v4050_v36 = vmul.f32 %v8716_v27, %v3700_v33  ;;  %v4186_v44 = vadd.f32 %v4154_v24, %v4081_v52  ;;  %v4392_v48 = vadd.f32 %v4360_v6, %v8801_v28 }
 0x281   : > { %v3773_v2 = vadd.f32 %v3741_v11, %v3669_v14  ;;  %v4155_v34 = vmul.f32 %v8711_v5, %v3495_v37  ;;  %v4289_v23 = vadd.f32 %v4257_v47, %v4185_v18  ;;  %v4361_v61 = vmul.f32 %v8743_v16, %v3700_v33 }
 0x282   : > { %v4362_v50 = vmul.f32 %v8743_v16, %v3701_v60  ;;  %v4082_v10 = vadd.f32 %v4050_v36, %v3978_v42  ;;  %v4290_v51 = vadd.f32 %v8822_v40, %v4186_v44  ;;  %v4431_v20 = vmul.f32 %v8771_v43, %v4392_v48 }
 0x283   : > { %v7474_v4 = vpop.eup %7473  ;;  %v3668_v35 = vadd.f32 %v3636_v55, %v3532_v17  ;;  %v4393_v24 = vadd.f32 %v4361_v61, %v4289_v23  ;;  %v3845_v6 = vmul.f32 %v8668_v26, %v3496_v31  ;;  %v3979_v28 = vadd.f32 %v8815_v15, %v3875_v13 }
 0x284   : > { %v4363_v14 = vmul.f32 %v8743_v16, %v3702_v7  ;;  %v4187_v11 = vadd.f32 %v4155_v34, %v4082_v10  ;;  %v4394_v18 = vadd.f32 %v4362_v50, %v4290_v51  ;;  %v8903_v57 = vadd.f32 %v8791_v62, %v4431_v20  ;;  %v8923_v50 = vld [vmem:[#allocation2 + $0xc7] sm:$0xff]  ;;  %v8927_v51 = vld [vmem:[#allocation2 + $0xcf] sm:$0xff] }
 0x285   : > { %v3740_v36 = vmul.f32 %v8610_v39, %v3700_v33  ;;  %v4432_v42 = vmul.f32 %v8771_v43, %v4393_v24  ;;  %v3877_v44 = vadd.f32 %v3845_v6, %v3773_v2  ;;  %v4083_v40 = vadd.f32 %v4051_v58, %v3979_v28  ;;  %v3703_v20 = vld [vmem:[#allocation2 + $0xa9] sm:$0xff]  ;;  %v3704_v28 = vld [vmem:[#allocation2 + $0xb1] sm:$0xff] }
 0x286   : > { %v7476_v49 = vpop.eup %7475  ;;  %v4596_v55 = vadd.f32 1.0, %v7474_v4  ;;  %v4291_v37 = vadd.f32 %v8847_v59, %v4187_v11  ;;  %v4433_v60 = vmul.f32 %v8771_v43, %v4394_v18  ;;  %v6220_v15 = vmul.f32 -1.442695, %v8903_v57 }
 0x287   : > { %v3772_v13 = vadd.f32 %v3740_v36, %v3668_v35  ;;  %v8911_v47 = vadd.f32 %v8791_v62, %v4432_v42  ;;  %v3981_v54 = vadd.f32 %v3949_v1, %v3877_v44  ;;  %v4156_v52 = vmul.f32 %v8711_v5, %v3496_v31 }
 0x288   : > { %v3670_v33 = vadd.f32 %v8841_v19, %v3534_v46  ;;  %v4395_v17 = vadd.f32 %v4363_v14, %v4291_v37  ;;  %v8916_v2 = vadd.f32 %v8791_v62, %v4433_v60  ;;  %v3535_v58 = vmul.f32 %v8586_v41, %v3496_v31  ;;  %v3497_v19 = vld [vmem:[#allocation2 + $0xaf] sm:$0xff] }
 0x289   : > { %v4597_v59 = vadd.f32 1.0, %v7476_v49  ;;  %7477 = vpow2.f32 %v6220_v15  ;;  %v6221_v48 = vmul.f32 -1.442695, %v8911_v47  ;;  %v4188_v34 = vadd.f32 %v4156_v52, %v4083_v40 }
 0x28a   : > { %7479 = vrcp.f32 %v4596_v55  ;;  %v3742_v23 = vmul.f32 %v8610_v39, %v3702_v7  ;;  %v4434_v1 = vmul.f32 %v8771_v43, %v4395_v17  ;;  %v6222_v61 = vmul.f32 -1.442695, %v8916_v2 }
 0x28b   : > { %v4052_v46 = vmul.f32 %v8716_v27, %v3702_v7  ;;  %v3876_v10 = vadd.f32 %v3844_v38, %v3772_v13  ;;  %7481 = vpow2.f32 %v6221_v48  ;;  %v4292_v31 = vadd.f32 %v8873_v29, %v4188_v34  ;;  %v8937_v38 = vld [vmem:[#allocation2 + $0xc9] sm:$0xff] }
 0x28c   : > { %v3774_v4 = vadd.f32 %v3742_v23, %v3670_v33  ;;  %v8930_v35 = vadd.f32 %v8791_v62, %v4434_v1  ;;  %7483 = vpow2.f32 %v6222_v61  ;;  %v3671_v24 = vadd.f32 %v8868_v30, %v3535_v58 }
 0x28d   : > { %7485 = vrcp.f32 %v4597_v59  ;;  %v3847_v6 = vmul.f32 %v8668_v26, %v8923_v50  ;;  %v4158_v7 = vmul.f32 %v8711_v5, %v8923_v50  ;;  %v3536_v29 = vmul.f32 %v8586_v41, %v3497_v19 }
 0x28e   : > { %v6223_v14 = vmul.f32 -1.442695, %v8930_v35  ;;  %v3848_v11 = vmul.f32 %v8668_v26, %v8927_v51  ;;  %v3640_v30 = vmul.f32 %v8597_v0, %v8836_v25  ;;  %v3743_v18 = vmul.f32 %v8610_v39, %v3703_v20 }
 0x28f   : > { %v4159_v36 = vmul.f32 %v8711_v5, %v8927_v51  ;;  %v3846_v42 = vmul.f32 %v8668_v26, %v3497_v19  ;;  %v3980_v44 = vadd.f32 %v8844_v53, %v3876_v10  ;;  %v4053_v40 = vmul.f32 %v8716_v27, %v3703_v20 }
 0x290   : > { %v4366_v49 = vmul.f32 %v8743_v16, %v8937_v38  ;;  %v3672_v55 = vadd.f32 %v3640_v30, %v3536_v29  ;;  %v3744_v37 = vmul.f32 %v8610_v39, %v3704_v28  ;;  %v3775_v60 = vadd.f32 %v3743_v18, %v3671_v24  ;;  %v8961_v29 = vld [vmem:[#allocation2 + $0xd1] sm:$0xff] }
 0x291   : > { %v3878_v15 = vadd.f32 %v3846_v42, %v3774_v4  ;;  %v3950_v13 = vmul.f32 %v8646_v56, %v8836_v25  ;;  %v4084_v52 = vadd.f32 %v4052_v46, %v3980_v44  ;;  %v4085_v33 = vadd.f32 %v4053_v40, %v3981_v54 }
 0x292   : > { %7487 = vpow2.f32 %v6223_v14  ;;  %v3776_v17 = vadd.f32 %v3744_v37, %v3672_v55  ;;  %v3879_v58 = vadd.f32 %v3847_v6, %v3775_v60  ;;  %v4157_v53 = vmul.f32 %v8711_v5, %v3497_v19 }
 0x293   : > { %v7478_v59 = vpop.eup %7477  ;;  %v3982_v48 = vadd.f32 %v3950_v13, %v3878_v15  ;;  %v4054_v34 = vmul.f32 %v8716_v27, %v3704_v28  ;;  %v4190_v23 = vadd.f32 %v4158_v7, %v4085_v33  ;;  %v4364_v1 = vmul.f32 %v8743_v16, %v3703_v20 }
 0x294   : > { %v7480_v61 = vpop.eup %7479  ;;  %v4598_v10 = vadd.f32 1.0, %v7478_v59  ;;  %v3880_v4 = vadd.f32 %v3848_v11, %v3776_v17  ;;  %v4189_v24 = vadd.f32 %v4157_v53, %v4084_v52  ;;  %v4261_v46 = vmul.f32 %v8654_v8, %v8836_v25  ;;  %v10604_v17 = vld [vmem:[#allocation37_spill] sm:$0xff] }
 0x295   : > { %v7482_v54 = vpop.eup %7481  ;;  %v4086_v6 = vadd.f32 %v4054_v34, %v3982_v48  ;;  %v4294_v19 = vadd.f32 %v8865_v12, %v4190_v23  ;;  %v4365_v14 = vmul.f32 %v8743_v16, %v3704_v28  ;;  %v4396_v30 = vadd.f32 %v4364_v1, %v4292_v31 }
 0x296   : > { %v7484_v18 = vpop.eup %7483  ;;  %v4599_v7 = vadd.f32 1.0, %v7482_v54  ;;  %7489 = vrcp.f32 %v4598_v10  ;;  %v4293_v20 = vadd.f32 %v4261_v46, %v4189_v24  ;;  %v8966_v42 = vadd.f32 %v8861_v32, %v3879_v58  ;;  %v10605_v58 = vld [vmem:[#allocation20_spill] sm:$0xff]  ;;  %v10608_v10 = vld [vmem:[#allocation35_spill] sm:$0xff] }
 0x297   : > { %v7486_v11 = vpop.eup %7485  ;;  %v4263_v25 = vmul.f32 %v8654_v8, %v8805_v45  ;;  %v4191_v44 = vadd.f32 %v4159_v36, %v4086_v6  ;;  %v4398_v40 = vadd.f32 %v4366_v49, %v4294_v19  ;;  %v4435_v55 = vmul.f32 %v8771_v43, %v4396_v30  ;;  %v10609_v54 = vld [vmem:[#allocation8_spill] sm:$0xff]  ;;  %v10610_v6 = vld [vmem:[#allocation26_spill] sm:$0xff] }
 0x298   : > { %v4600_v37 = vadd.f32 1.0, %v7484_v18  ;;  %v4367_v12 = vmul.f32 %v8743_v16, %v8961_v29  ;;  %v4397_v31 = vadd.f32 %v4365_v14, %v4293_v20  ;;  %v3265_v28 = vadd.f32 1.0, %v8749_v63  ;;  %v10611_v30 = vld [vmem:[#allocation42_spill] sm:$0xff]  ;;  %v10614_v20 = vld [vmem:[#allocation28_spill] sm:$0xff] }
 0x299   : > { %7491 = vrcp.f32 %v4599_v7  ;;  %v4295_v60 = vadd.f32 %v4263_v25, %v4191_v44  ;;  %v4437_v32 = vmul.f32 %v8771_v43, %v4398_v40  ;;  %v8976_v15 = vadd.f32 %v8791_v62, %v4435_v55  ;;  %v10613_v7 = vld [vmem:[#allocation9_spill] sm:$0xff] }
 0x29a   : > { %v4436_v13 = vmul.f32 %v8771_v43, %v4397_v31  ;;  %7493 = vrcp.f32 %v8882_v21  ;;  %v8981_v36 = vadd.f32 %v8877_v9, %v3880_v4  ;;  %v3105_v49 = vmul.f32 %v8658_v22, %v8510_v3  ;;  %v10606_v9 = vld [vmem:[#allocation38_spill] sm:$0xff]  ;;  %v10607_v22 = vld [vmem:[#allocation25_spill] sm:$0xff] }
 0x29b   : > { %v4399_v52 = vadd.f32 %v4367_v12, %v4295_v60  ;;  %v8986_v63 = vadd.f32 %v8791_v62, %v4437_v32  ;;  %v6224_v33 = vmul.f32 -1.442695, %v8976_v15  ;;  %v8991_v53 = vadd.f32 %v10605_v58, %v10604_v17  ;;  %v10616_v12 = vld [vmem:[#allocation29_spill] sm:$0xff]  ;;  %v10621_v17 = vld [vmem:[#allocation30_spill] sm:$0xff] }
 0x29c   : > { %v7488_v59 = vpop.eup %7487  ;;  %v8994_v48 = vadd.f32 %v8791_v62, %v4436_v13  ;;  %7495 = vrcp.f32 %v3265_v28  ;;  %v8998_v21 = vadd.f32 %v10605_v58, %v10606_v9  ;;  %v3103_v34 = vmul.f32 %v10607_v22, %v8510_v3  ;;  %v10617_v28 = vld [vmem:[#allocation40_spill] sm:$0xff]  ;;  %v10619_v13 = vld [vmem:[#allocation27_spill] sm:$0xff] }
 0x29d   : > { %7497 = vrcp.f32 %v4600_v37  ;;  %v4438_v23 = vmul.f32 %v8771_v43, %v4399_v52  ;;  %v6226_v1 = vmul.f32 -1.442695, %v8986_v63  ;;  %v3268_v4 = vadd.f32 1.0, %v10608_v10  ;;  %v10615_v37 = vld [vmem:[#allocation10_spill] sm:$0xff] }
 0x29e   : > { %7499 = vpow2.f32 %v6224_v33  ;;  %v6225_v24 = vmul.f32 -1.442695, %v8994_v48  ;;  %v9007_v46 = vadd.f32 %v10605_v58, %v3105_v49  ;;  %v7121_v19 = vadd.f32 %v10610_v6, %v10609_v54  ;;  %v10620_v33 = vld [vmem:[#allocation11_spill] sm:$0xff] }
 0x29f   : > { %v4601_v14 = vadd.f32 1.0, %v7488_v59  ;;  %v9012_v18 = vmul.f32 %v7486_v11, %v10611_v30  ;;  %7501 = vpow2.f32 %v6226_v1  ;;  %v7122_v25 = vadd.f32 %v10614_v20, %v10613_v7  ;;  %v10623_v1 = vld [vmem:[#allocation39_spill] sm:$0xff] }
 0x2a0   : > { %v7490_v44 = vpop.eup %7489  ;;  %7503 = vpow2.f32 %v6225_v24  ;;  %v6185_v40 = vmul.f32 -1.442695, %v8991_v53  ;;  %v9018_v55 = vadd.f32 %v10605_v58, %v3103_v34  ;;  %v7123_v31 = vadd.f32 %v10616_v12, %v10615_v37 }
 0x2a1   : > { %10612 = vst [vmem:[#allocation37_spill] sm:$0xff] %v9012_v18  ;;  %v9023_v60 = vmul.f32 %v7480_v61, %v10617_v28  ;;  %v9026_v11 = vadd.f32 %v8791_v62, %v4438_v23  ;;  %7505 = vrcp.f32 %v3268_v4  ;;  %v6183_v32 = vmul.f32 -1.442695, %v8998_v21  ;;  %v10624_v4 = vld [vmem:[#allocation21_spill] sm:$0xff]  ;;  %v10629_v28 = vld [vmem:[#allocation22_spill] sm:$0xff] }
 0x2a2   : > { %7507 = vpow2.f32 %v10619_v13  ;;  %v6186_v49 = vmul.f32 -1.442695, %v9007_v46  ;;  %v3108_v52 = vmul.f32 %v7121_v19, %v8510_v3  ;;  %v7124_v58 = vadd.f32 %v10621_v17, %v10620_v33  ;;  %v10625_v19 = vld [vmem:[#allocation12_spill] sm:$0xff]  ;;  %v10630_v33 = vld [vmem:[#allocation13_spill] sm:$0xff] }
 0x2a3   : > { %10618 = vst [vmem:[#allocation20_spill] sm:$0xff] %v9023_v60  ;;  %v7492_v59 = vpop.eup %7491  ;;  %7509 = vrcp.f32 %v4601_v14  ;;  %v9035_v61 = vmul.f32 %v7490_v44, %v8903_v57  ;;  %v4724_v9 = vadd.f32 %v9012_v18, %v9023_v60  ;;  %v3537_v34 = vmul.f32 %v8586_v41, %v8923_v50  ;;  %v9053_v50 = vld [vmem:[%s10500_s3] ss:$0 sm:$0xff]  ;;  %v10626_v14 = vld [vmem:[#allocation31_spill] sm:$0xff] }
 0x2a4   : > { %v7494_v22 = vpop.eup %7493  ;;  %7511 = vpow2.f32 %v6185_v40  ;;  %v6184_v23 = vmul.f32 -1.442695, %v9018_v55  ;;  %v3641_v3 = vmul.f32 %v8597_v0, %v10623_v1  ;;  %v3538_v10 = vmul.f32 %v8586_v41, %v8927_v51  ;;  %v9072_v44 = vld [vmem:[%s10499_s2] ss:$0 sm:$0xff] }
 0x2a5   : > { %10622 = vst [vmem:[#allocation38_spill] sm:$0xff] %v9035_v61  ;;  %v9047_v24 = vmul.f32 %v7494_v22, %v10624_v4  ;;  %7513 = vpow2.f32 %v6183_v32  ;;  %v6227_v54 = vmul.f32 -1.442695, %v9026_v11  ;;  %v9056_v6 = vadd.f32 %v9053_v50, %v3108_v52  ;;  %10628 = vst [vmem:[#allocation35_spill] sm:$0xff] %v9072_v44  ;;  %v10631_v17 = vld [vmem:[#allocation32_spill] sm:$0xff] }
 0x2a6   : > { %v7496_v57 = vpop.eup %7495  ;;  %7515 = vpow2.f32 %v6186_v49  ;;  %v9060_v30 = vadd.f32 %v10626_v14, %v10625_v19  ;;  %v9063_v51 = vmul.f32 %v7492_v59, %v8911_v47  ;;  %v4725_v7 = vadd.f32 %v4724_v9, %v9035_v61 }
 0x2a7   : > { %v7498_v41 = vpop.eup %7497  ;;  %v3642_v20 = vmul.f32 %v8597_v0, %v8805_v45  ;;  %3468 = vst [vmem:[#allocation2 + $0x108] sm:$0xff] %v9047_v24  ;;  %v3106_v40 = vmul.f32 %v9072_v44, %v7122_v25  ;;  %v3673_v12 = vadd.f32 %v3641_v3, %v3537_v34  ;;  %v3745_v47 = vmul.f32 %v8610_v39, %v8937_v38 }
 0x2a8   : > { %10627 = vst [vmem:[#allocation25_spill] sm:$0xff] %v9063_v51  ;;  %v7500_v37 = vpop.eup %7499  ;;  %v9078_v32 = vmul.f32 %v7496_v57, %v10629_v28  ;;  %7517 = vpow2.f32 %v6184_v23  ;;  %v3746_v49 = vmul.f32 %v8610_v39, %v8961_v29  ;;  %v7126_v59 = vadd.f32 %v10631_v17, %v10630_v33 }
 0x2a9   : > { %v7502_v13 = vpop.eup %7501  ;;  %v3674_v45 = vadd.f32 %v3642_v20, %v3538_v10  ;;  %v4602_v52 = vadd.f32 1.0, %v7500_v37  ;;  %v4055_v25 = vmul.f32 %v8716_v27, %v8937_v38  ;;  %v4056_v22 = vmul.f32 %v8716_v27, %v8961_v29  ;;  %v10633_v29 = vld [vmem:[#allocation23_spill] sm:$0xff] }
 0x2aa   : > { %v7504_v9 = vpop.eup %7503  ;;  %7519 = vpow2.f32 %v6227_v54  ;;  %3466 = vst [vmem:[#allocation2 + $0xe8] sm:$0xff] %v9078_v32  ;;  %v6189_v34 = vmul.f32 -1.442695, %v9056_v6  ;;  %v9091_v1 = vmul.f32 %v7498_v41, %v8916_v2  ;;  %v4726_v39 = vadd.f32 %v4725_v7, %v9063_v51  ;;  %v10634_v2 = vld [vmem:[#allocation14_spill] sm:$0xff]  ;;  %v10635_v41 = vld [vmem:[#allocation33_spill] sm:$0xff]  ;;  %v10636_v7 = vld [vmem:[#allocation15_spill] sm:$0xff] }
 0x2ab   : > { %v7506_v23 = vpop.eup %7505  ;;  %v9095_v3 = vadd.f32 %v9053_v50, %v3106_v40  ;;  %v3109_v10 = vmul.f32 %v9072_v44, %v7123_v31  ;;  %v4603_v4 = vadd.f32 1.0, %v7504_v9  ;;  %7521 = vrcp.f32 %v4602_v52  ;;  %v10637_v40 = vld [vmem:[#allocation34_spill] sm:$0xff] }
 0x2ac   : > { %10632 = vst [vmem:[#allocation8_spill] sm:$0xff] %v9091_v1  ;;  %v7508_v38 = vpop.eup %7507  ;;  %v9099_v57 = vmul.f32 %v7506_v23, %v10633_v29  ;;  %v3107_v54 = vmul.f32 %v9072_v44, %v7124_v58  ;;  %v4604_v14 = vadd.f32 1.0, %v7502_v13  ;;  %v9104_v37 = vadd.f32 %v10635_v41, %v10634_v2 }
 0x2ad   : > { %v7510_v19 = vpop.eup %7509  ;;  %v3266_v20 = vadd.f32 1.0, %v7508_v38  ;;  %v9108_v28 = vadd.f32 %v10637_v40, %v10636_v7  ;;  %v3777_v33 = vadd.f32 %v3745_v47, %v3673_v12  ;;  %v9110_v17 = vadd.f32 %v3746_v49, %v3674_v45 }
 0x2ae   : > { %v7512_v31 = vpop.eup %7511  ;;  %v4087_v52 = vadd.f32 %v4055_v25, %v8966_v42  ;;  %3469 = vst [vmem:[#allocation2 + $0x110] sm:$0xff] %v9099_v57  ;;  %7523 = vpow2.f32 %v6189_v34  ;;  %v9115_v13 = vadd.f32 %v4056_v22, %v8981_v36  ;;  %v6187_v9 = vmul.f32 -1.442695, %v9095_v3 }
 0x2af   : > { %v7514_v58 = vpop.eup %7513  ;;  %7525 = vrcp.f32 %v3266_v20  ;;  %v9119_v23 = vadd.f32 %v9053_v50, %v3109_v10  ;;  %v4727_v12 = vadd.f32 %v4726_v39, %v9091_v1  ;;  %v3271_v47 = vadd.f32 1.0, %v7512_v31 }
 0x2b0   : > { %v7516_v38 = vpop.eup %7515  ;;  %7527 = vrcp.f32 %v4603_v4  ;;  %v3269_v45 = vadd.f32 1.0, %v7514_v58  ;;  %v9123_v42 = vmul.f32 %v7510_v19, %v8930_v35  ;;  %v9126_v36 = vadd.f32 %v9053_v50, %v3107_v54  ;;  %v3502_v54 = vld [vmem:[#allocation2 + $0x107] sm:$0xff] }
 0x2b1   : > { %10638 = vst [vmem:[#allocation26_spill] sm:$0xff] %v9119_v23  ;;  %7529 = vrcp.f32 %v4604_v14  ;;  %v3500_v49 = vld [vmem:[#allocation2 + $0xe7] sm:$0xff]  ;;  %v3272_v25 = vadd.f32 1.0, %v7516_v38  ;;  %v3112_v39 = vmul.f32 %v9072_v44, %v9060_v30  ;;  %v3953_v4 = vmul.f32 %v8646_v56, %v9078_v32  ;;  %v9158_v38 = vld [vmem:[%s10501_s4] ss:$0 sm:$0xff] }
 0x2b2   : > { %10639 = vst [vmem:[#allocation42_spill] sm:$0xff] %v9123_v42  ;;  %10640 = vst [vmem:[#allocation9_spill] sm:$0xff] %v9126_v36  ;;  %v7518_v22 = vpop.eup %7517  ;;  %v3849_v34 = vmul.f32 %v8668_v26, %v3500_v49  ;;  %v4160_v10 = vmul.f32 %v8711_v5, %v3500_v49  ;;  %7531 = vrcp.f32 %v3271_v47  ;;  %v4264_v35 = vmul.f32 %v8654_v8, %v9078_v32 }
 0x2b3   : > { %7533 = vrcp.f32 %v3269_v45  ;;  %v3270_v29 = vadd.f32 1.0, %v7518_v22  ;;  %v3110_v2 = vmul.f32 %v9072_v44, %v7126_v59  ;;  %v3645_v41 = vmul.f32 %v8597_v0, %v9047_v24 }
 0x2b4   : > { %v7520_v19 = vpop.eup %7519  ;;  %v3881_v14 = vadd.f32 %v3849_v34, %v3777_v33  ;;  %v4192_v20 = vadd.f32 %v4160_v10, %v4087_v52  ;;  %7535 = vrcp.f32 %v3272_v25  ;;  %v9141_v30 = vmul.f32 %v8646_v56, %v9047_v24 }
 0x2b5   : > { %7537 = vrcp.f32 %v3270_v29  ;;  %v9144_v7 = vmul.f32 -1.442695, %v9119_v23  ;;  %v7522_v40 = vpop.eup %7521  ;;  %v9148_v31 = vmul.f32 %v8654_v8, %v9047_v24  ;;  %v3503_v59 = vld [vmem:[#allocation2 + $0x10f] sm:$0xff]  ;;  %v4605_v0 = vadd.f32 1.0, %v7520_v19  ;;  %v9295_v23 = vld [vmem:[%s10501_s4 + $0x3] ss:$0 sm:$0xff] }
 0x2b6   : > { %v9150_v33 = vadd.f32 %v3953_v4, %v3881_v14  ;;  %v9152_v52 = vadd.f32 %v4264_v35, %v4192_v20  ;;  %7539 = vpow2.f32 %v6187_v9  ;;  %v4728_v58 = vadd.f32 %v4727_v12, %v9123_v42  ;;  %v9168_v9 = vld [vmem:[%s10501_s4 + $0x1] ss:$0 sm:$0xff]  ;;  %v3709_v35 = vld [vmem:[#allocation2 + $0x109] sm:$0xff]  ;;  %v3710_v18 = vld [vmem:[#allocation2 + $0x111] sm:$0xff] }
 0x2b7   : > { %v3541_v47 = vmul.f32 %v9158_v38, %v3502_v54  ;;  %v9162_v45 = vadd.f32 %v9053_v50, %v3112_v39  ;;  %v3539_v25 = vmul.f32 %v9158_v38, %v3500_v49  ;;  %v3643_v12 = vmul.f32 %v9168_v9, %v9078_v32 }
 0x2b8   : > { %v7524_v24 = vpop.eup %7523  ;;  %v9173_v22 = vmul.f32 -1.442695, %v9126_v36  ;;  %v9176_v34 = vadd.f32 %v9053_v50, %v3110_v2  ;;  %v9179_v39 = vmul.f32 %v7522_v40, %v8976_v15  ;;  %v3542_v49 = vmul.f32 %v9158_v38, %v3503_v59  ;;  %v10644_v15 = vld [vmem:[#allocation24_spill] sm:$0xff] }
 0x2b9   : > { %10641 = vst [vmem:[#allocation28_spill] sm:$0xff] %v9162_v45  ;;  %v7526_v10 = vpop.eup %7525  ;;  %v3646_v4 = vmul.f32 %v9168_v9, %v9099_v57  ;;  %v9186_v29 = vmul.f32 %v8646_v56, %v9099_v57  ;;  %v9189_v19 = vmul.f32 %v8668_v26, %v3502_v54  ;;  %v9193_v14 = vmul.f32 %v8654_v8, %v9099_v57  ;;  %v9207_v8 = vld [vmem:[%s10501_s4 + $0x2] ss:$0 sm:$0xff] }
 0x2ba   : > { %10642 = vst [vmem:[#allocation10_spill] sm:$0xff] %v9176_v34  ;;  %10643 = vst [vmem:[#allocation29_spill] sm:$0xff] %v9179_v39  ;;  %v7528_v32 = vpop.eup %7527  ;;  %v3362_v20 = vmul.f32 %v7526_v10, %v10644_v15  ;;  %v3113_v2 = vmul.f32 %v9072_v44, %v9104_v37  ;;  %7541 = vrcp.f32 %v4605_v0  ;;  %v3677_v42 = vadd.f32 %v3645_v41, %v3541_v47 }
 0x2bb   : > { %v7530_v40 = vpop.eup %7529  ;;  %v9199_v1 = vmul.f32 %v8711_v5, %v3502_v54  ;;  %v9202_v56 = vmul.f32 -1.442695, %v9162_v45  ;;  %v3675_v61 = vadd.f32 %v3643_v12, %v3539_v25  ;;  %v3749_v57 = vmul.f32 %v9207_v8, %v3709_v35 }
 0x2bc   : > { %v7532_v51 = vpop.eup %7531  ;;  %3467 = vst [vmem:[#allocation2 + $0xf0] sm:$0xff] %v3362_v20  ;;  %v3275_v37 = vadd.f32 1.0, %v7524_v24  ;;  %v9211_v41 = vmul.f32 -1.442695, %v9176_v34  ;;  %v9214_v0 = vmul.f32 %v7528_v32, %v8994_v48  ;;  %v4729_v47 = vadd.f32 %v4728_v58, %v9179_v39  ;;  %v10647_v34 = vld [vmem:[#allocation16_spill] sm:$0xff]  ;;  %v10656_v39 = vld [vmem:[#allocation43_spill] sm:$0xff] }
 0x2bd   : > { %v7534_v54 = vpop.eup %7533  ;;  %v3678_v25 = vadd.f32 %v3646_v4, %v3542_v49  ;;  %v9218_v12 = vmul.f32 %v7532_v51, %v8991_v53  ;;  %v9224_v60 = vadd.f32 %v9053_v50, %v3113_v2  ;;  %v9228_v24 = vmul.f32 %v9072_v44, %v9108_v28  ;;  %v10648_v48 = vld [vmem:[#allocation36_spill] sm:$0xff] }
 0x2be   : > { %10645 = vst [vmem:[#allocation40_spill] sm:$0xff] %v9214_v0  ;;  %v7536_v10 = vpop.eup %7535  ;;  %v9221_v15 = vmul.f32 %v7534_v54, %v8998_v21  ;;  %v9232_v32 = vadd.f32 %v10648_v48, %v10647_v34  ;;  %v9235_v49 = vmul.f32 %v7530_v40, %v8986_v63  ;;  %v3750_v53 = vmul.f32 %v9207_v8, %v3710_v18  ;;  %v10652_v48 = vld [vmem:[#allocation17_spill] sm:$0xff] }
 0x2bf   : > { %10646 = vst [vmem:[#allocation27_spill] sm:$0xff] %v9224_v60  ;;  %v7538_v58 = vpop.eup %7537  ;;  %v9239_v21 = vmul.f32 %v8668_v26, %v3503_v59  ;;  %3472 = vst [vmem:[#allocation2 + $0x148] sm:$0xff] %v9218_v12  ;;  %v9243_v51 = vmul.f32 %v7536_v10, %v9007_v46  ;;  %v9245_v4 = vadd.f32 %v3749_v57, %v3677_v42  ;;  %7543 = vrcp.f32 %v3275_v37 }
 0x2c0   : > { %10649 = vst [vmem:[#allocation11_spill] sm:$0xff] %v9232_v32  ;;  %10650 = vst [vmem:[#allocation30_spill] sm:$0xff] %v9235_v49  ;;  %v7540_v28 = vpop.eup %7539  ;;  %v9248_v34 = vmul.f32 %v8716_v27, %v3709_v35  ;;  %v9251_v2 = vmul.f32 %v8716_v27, %v3710_v18  ;;  %v9255_v63 = vmul.f32 %v7538_v58, %v9018_v55  ;;  %v9272_v55 = vld [vmem:[%s10501_s4 + $0x4] ss:$0 sm:$0xff]  ;;  %v10653_v58 = vld [vmem:[#allocation41_spill] sm:$0xff]  ;;  %7545 = vpow2.f32 %v9144_v7 }
 0x2c1   : > { %3470 = vst [vmem:[#allocation2 + $0x128] sm:$0xff] %v9221_v15  ;;  %v9258_v26 = vadd.f32 %v4729_v47, %v9214_v0  ;;  %v9260_v40 = vadd.f32 %v3750_v53, %v3678_v25  ;;  %v4163_v46 = vmul.f32 %v8711_v5, %v3503_v59  ;;  %v4370_v42 = vmul.f32 %v8743_v16, %v3709_v35  ;;  %v9279_v35 = vld [vmem:[%s10501_s4 + $0x7] ss:$0 sm:$0xff]  ;;  %v10655_v0 = vld [vmem:[#allocation18_spill] sm:$0xff] }
 0x2c2   : > { %3473 = vst [vmem:[#allocation2 + $0x150] sm:$0xff] %v9243_v51  ;;  %v9266_v57 = vmul.f32 %v8743_v16, %v3710_v18  ;;  %v3644_v54 = vmul.f32 %v9168_v9, %v3362_v20  ;;  %v3954_v47 = vmul.f32 %v9272_v55, %v3362_v20  ;;  %3471 = vst [vmem:[#allocation2 + $0x130] sm:$0xff] %v9255_v63  ;;  %v3273_v10 = vadd.f32 1.0, %v7540_v28 }
 0x2c3   : > { %10651 = vst [vmem:[#allocation39_spill] sm:$0xff] %v9258_v26  ;;  %v3501_v59 = vld [vmem:[#allocation2 + $0xef] sm:$0xff]  ;;  %v4265_v18 = vmul.f32 %v9279_v35, %v3362_v20  ;;  %v9284_v53 = vadd.f32 %v10653_v58, %v10652_v48  ;;  %v9288_v45 = vadd.f32 %v10656_v39, %v10655_v0  ;;  %7547 = vpow2.f32 %v9173_v22 }
 0x2c4   : > { %v3707_v25 = vld [vmem:[#allocation2 + $0xe9] sm:$0xff]  ;;  %v3540_v37 = vmul.f32 %v9158_v38, %v3501_v59  ;;  %v3850_v20 = vmul.f32 %v9295_v23, %v3501_v59  ;;  %v9299_v28 = vpop.eup %7541  ;;  %v3708_v48 = vld [vmem:[#allocation2 + $0xf1] sm:$0xff]  ;;  %v4161_v39 = vmul.f32 %v8711_v5, %v3501_v59  ;;  %v9308_v44 = vmul.f32 %v9272_v55, %v9218_v12 }
 0x2c5   : > { %10654 = vst [vmem:[#allocation21_spill] sm:$0xff] %v9284_v53  ;;  %10657 = vst [vmem:[#allocation12_spill] sm:$0xff] %v9288_v45  ;;  %v3747_v36 = vmul.f32 %v9207_v8, %v3707_v25  ;;  %v4057_v58 = vmul.f32 %v8716_v27, %v3707_v25  ;;  %v4368_v0 = vmul.f32 %v8743_v16, %v3707_v25  ;;  %7549 = vrcp.f32 %v3273_v10 }
 0x2c6   : > { %v3882_v53 = vadd.f32 %v3850_v20, %v9110_v17  ;;  %v9312_v7 = vmul.f32 %v9279_v35, %v9218_v12  ;;  %v4193_v60 = vadd.f32 %v4161_v39, %v9115_v13  ;;  %v3647_v22 = vmul.f32 %v9168_v9, %v9221_v15 }
 0x2c7   : > { %v3779_v45 = vadd.f32 %v3747_v36, %v3675_v61  ;;  %v4089_v32 = vadd.f32 %v4057_v58, %v9150_v33  ;;  %v4400_v5 = vadd.f32 %v4368_v0, %v9152_v52  ;;  %v3676_v61 = vadd.f32 %v3644_v54, %v3540_v37 }
 0x2c8   : > { %v3986_v36 = vadd.f32 %v3954_v47, %v3882_v53  ;;  %v4058_v59 = vmul.f32 %v8716_v27, %v3708_v48  ;;  %v3504_v25 = vld [vmem:[#allocation2 + $0x127] sm:$0xff]  ;;  %v4297_v26 = vadd.f32 %v4265_v18, %v4193_v60  ;;  %v4369_v49 = vmul.f32 %v8743_v16, %v3708_v48 }
 0x2c9   : > { %v3883_v17 = vadd.f32 %v9189_v19, %v3779_v45  ;;  %v4194_v20 = vadd.f32 %v9199_v1, %v4089_v32  ;;  %v4439_v33 = vmul.f32 %v8771_v43, %v4400_v5  ;;  %v3748_v13 = vmul.f32 %v9207_v8, %v3708_v48  ;;  %v9334_v16 = vpop.eup %7543 }
 0x2ca   : > { %v4090_v52 = vadd.f32 %v4058_v59, %v3986_v36  ;;  %v3957_v58 = vmul.f32 %v9272_v55, %v9221_v15  ;;  %v4268_v45 = vmul.f32 %v9279_v35, %v9221_v15  ;;  %v4401_v27 = vadd.f32 %v4369_v49, %v4297_v26  ;;  %v9340_v49 = vpop.eup %7545  ;;  %v3506_v36 = vld [vmem:[#allocation2 + $0x147] sm:$0xff]  ;;  %v3505_v59 = vld [vmem:[#allocation2 + $0x12f] sm:$0xff] }
 0x2cb   : > { %v4298_v19 = vadd.f32 %v9148_v31, %v4194_v20  ;;  %v9331_v54 = vadd.f32 %v8791_v62, %v4439_v33  ;;  %v3853_v60 = vmul.f32 %v9295_v23, %v3504_v25  ;;  %v3780_v1 = vadd.f32 %v3748_v13, %v3676_v61  ;;  %v9373_v13 = vld [vmem:[#allocation2 + $0x14f] sm:$0xff] }
 0x2cc   : > { %v4195_v32 = vadd.f32 %v4163_v46, %v4090_v52  ;;  %v3987_v47 = vadd.f32 %v9141_v30, %v3883_v17  ;;  %v4440_v53 = vmul.f32 %v8771_v43, %v4401_v27  ;;  %v3543_v37 = vmul.f32 %v9158_v38, %v3504_v25  ;;  %v9348_v30 = vld [vmem:[%s10501_s4 + $0x6] ss:$0 sm:$0xff]  ;;  %v3711_v52 = vld [vmem:[#allocation2 + $0x129] sm:$0xff] }
 0x2cd   : > { %v4402_v18 = vadd.f32 %v4370_v42, %v4298_v19  ;;  %v6228_v15 = vmul.f32 -1.442695, %v9331_v54  ;;  %v3885_v31 = vadd.f32 %v3853_v60, %v9245_v4  ;;  %v4164_v46 = vmul.f32 %v9348_v30, %v3504_v25  ;;  %v9351_v42 = vpop.eup %7547 }
 0x2ce   : > { %v4299_v26 = vadd.f32 %v9193_v14, %v4195_v32  ;;  %v4091_v48 = vadd.f32 %v9248_v34, %v3987_v47  ;;  %v9355_v4 = vadd.f32 %v8791_v62, %v4440_v53  ;;  %v9360_v34 = vmul.f32 %v9279_v35, %v9243_v51 }
 0x2cf   : > { %v4441_v10 = vmul.f32 %v8771_v43, %v4402_v18  ;;  %7551 = vpow2.f32 %v6228_v15  ;;  %v3989_v14 = vadd.f32 %v3957_v58, %v3885_v31  ;;  %v3648_v5 = vmul.f32 %v9168_v9, %v9255_v63  ;;  %v7550_v32 = vpop.eup %7549  ;;  %v9394_v18 = vld [vmem:[%s10501_s4 + $0x5] ss:$0 sm:$0xff] }
 0x2d0   : > { %v4403_v39 = vadd.f32 %v9266_v57, %v4299_v26  ;;  %v4196_v0 = vadd.f32 %v4164_v46, %v4091_v48  ;;  %v6229_v17 = vmul.f32 -1.442695, %v9355_v4  ;;  %v3958_v25 = vmul.f32 %v9272_v55, %v9255_v63 }
 0x2d1   : > { %v9365_v61 = vadd.f32 %v8791_v62, %v4441_v10  ;;  %7553 = vpow2.f32 %v9202_v56  ;;  %v3884_v57 = vadd.f32 %v9239_v21, %v3780_v1  ;;  %v3679_v19 = vadd.f32 %v3647_v22, %v3543_v37 }
 0x2d2   : > { %v4442_v20 = vmul.f32 %v8771_v43, %v4403_v39  ;;  %v4300_v33 = vadd.f32 %v4268_v45, %v4196_v0  ;;  %7555 = vpow2.f32 %v9211_v41  ;;  %v4269_v27 = vmul.f32 %v9279_v35, %v9255_v63  ;;  %v3712_v45 = vld [vmem:[#allocation2 + $0x131] sm:$0xff] }
 0x2d3   : > { %7557 = vpow2.f32 %v6229_v17  ;;  %v6230_v58 = vmul.f32 -1.442695, %v9365_v61  ;;  %v3855_v56 = vmul.f32 %v9295_v23, %v3506_v36  ;;  %v4166_v43 = vmul.f32 %v9348_v30, %v3506_v36  ;;  %v9405_v17 = vld [vmem:[%s10501_s4 + $0x8] ss:$0 sm:$0xff] }
 0x2d4   : > { %v9380_v60 = vadd.f32 %v8791_v62, %v4442_v20  ;;  %v3544_v21 = vmul.f32 %v9158_v38, %v3505_v59  ;;  %v4167_v41 = vmul.f32 %v9348_v30, %v9373_v13  ;;  %v3751_v1 = vmul.f32 %v9207_v8, %v3711_v52 }
 0x2d5   : > { %7559 = vpow2.f32 %v6230_v58  ;;  %v3854_v22 = vmul.f32 %v9295_v23, %v3505_v59  ;;  %v3988_v47 = vadd.f32 %v9186_v29, %v3884_v57  ;;  %v4061_v53 = vmul.f32 %v9394_v18, %v3711_v52 }
 0x2d6   : > { %v6231_v63 = vmul.f32 -1.442695, %v9380_v60  ;;  %v3680_v62 = vadd.f32 %v3648_v5, %v3544_v21  ;;  %v3752_v15 = vmul.f32 %v9207_v8, %v3712_v45  ;;  %v3783_v31 = vadd.f32 %v3751_v1, %v3679_v19 }
 0x2d7   : > { %v3886_v26 = vadd.f32 %v3854_v22, %v9260_v40  ;;  %v4062_v37 = vmul.f32 %v9394_v18, %v3712_v45  ;;  %v4092_v48 = vadd.f32 %v9251_v2, %v3988_v47  ;;  %v4093_v46 = vadd.f32 %v4061_v53, %v3989_v14  ;;  %v9447_v53 = vld [vmem:[%s10503_s6] ss:$0 sm:$0xff] }
 0x2d8   : > { %7561 = vpow2.f32 %v6231_v63  ;;  %v4165_v29 = vmul.f32 %v9348_v30, %v3505_v59  ;;  %v3784_v39 = vadd.f32 %v3752_v15, %v3680_v62  ;;  %v3887_v0 = vadd.f32 %v3855_v56, %v3783_v31  ;;  %v10661_v15 = vld [vmem:[#allocation39_spill] sm:$0xff] }
 0x2d9   : > { %v7552_v10 = vpop.eup %7551  ;;  %v3990_v5 = vadd.f32 %v3958_v25, %v3886_v26  ;;  %v4372_v57 = vmul.f32 %v9405_v17, %v3711_v52  ;;  %v4198_v58 = vadd.f32 %v4166_v43, %v4093_v46  ;;  %v4373_v19 = vmul.f32 %v9405_v17, %v3712_v45 }
 0x2da   : > { %v4606_v40 = vadd.f32 1.0, %v7552_v10  ;;  %v4197_v20 = vadd.f32 %v4165_v29, %v4092_v48  ;;  %v9411_v59 = vmul.f32 %v9334_v16, %v9056_v6  ;;  %v9414_v25 = vmul.f32 %v7550_v32, %v9095_v3  ;;  %v9426_v6 = vld [vmem:[%s10502_s5] ss:$0 sm:$0xff]  ;;  %v3713_v16 = vld [vmem:[#allocation2 + $0x149] sm:$0xff] }
 0x2db   : > { %v7554_v2 = vpop.eup %7553  ;;  %v4094_v14 = vadd.f32 %v4062_v37, %v3990_v5  ;;  %v4404_v21 = vadd.f32 %v4372_v57, %v4300_v33  ;;  %v9417_v52 = vadd.f32 %v9312_v7, %v4198_v58  ;;  %v3991_v43 = vadd.f32 %v9308_v44, %v3887_v0 }
 0x2dc   : > { %v7556_v56 = vpop.eup %7555  ;;  %7563 = vrcp.f32 %v4606_v40  ;;  %v4301_v1 = vadd.f32 %v4269_v27, %v4197_v20  ;;  %v3545_v45 = vmul.f32 %v9158_v38, %v3506_v36  ;;  %v3856_v33 = vmul.f32 %v9295_v23, %v9373_v13  ;;  %3476 = vst [vmem:[#allocation2 + $0x188] sm:$0xff] %v9411_v59  ;;  %3474 = vst [vmem:[#allocation2 + $0x168] sm:$0xff] %v9414_v25 }
 0x2dd   : > { %v7558_v22 = vpop.eup %7557  ;;  %v4199_v63 = vadd.f32 %v4167_v41, %v4094_v14  ;;  %v4443_v3 = vmul.f32 %v9426_v6, %v4404_v21  ;;  %v9433_v44 = vmul.f32 %v9299_v28, %v9026_v11  ;;  %v9437_v27 = vadd.f32 %v9053_v50, %v9228_v24  ;;  %v10660_v28 = vld [vmem:[#allocation30_spill] sm:$0xff]  ;;  %v10663_v21 = vld [vmem:[#allocation27_spill] sm:$0xff] }
 0x2de   : > { %v4607_v7 = vadd.f32 1.0, %v7558_v22  ;;  %v4405_v36 = vadd.f32 %v4373_v19, %v4301_v1  ;;  %v3649_v32 = vmul.f32 %v9168_v9, %v9218_v12  ;;  %v3888_v62 = vadd.f32 %v3856_v33, %v3784_v39 }
 0x2df   : > { %10658 = vst [vmem:[#allocation31_spill] sm:$0xff] %v9433_v44  ;;  %v7560_v41 = vpop.eup %7559  ;;  %v9442_v47 = vadd.f32 %v9360_v34, %v4199_v63  ;;  %v9450_v11 = vadd.f32 %v9447_v53, %v4443_v3  ;;  %v4731_v24 = vadd.f32 %v10661_v15, %v10660_v28  ;;  %v3753_v37 = vmul.f32 %v9207_v8, %v3713_v16 }
 0x2e0   : > { %v4608_v31 = vadd.f32 1.0, %v7560_v41  ;;  %7565 = vrcp.f32 %v4607_v7  ;;  %v4444_v26 = vmul.f32 %v9426_v6, %v4405_v36  ;;  %v3681_v12 = vadd.f32 %v3649_v32, %v3545_v45 }
 0x2e1   : > { %10659 = vst [vmem:[#allocation22_spill] sm:$0xff] %v9450_v11  ;;  %v3960_v34 = vmul.f32 %v9272_v55, %v9243_v51  ;;  %v6232_v48 = vmul.f32 -1.442695, %v9450_v11  ;;  %v4063_v29 = vmul.f32 %v9394_v18, %v3713_v16  ;;  %v3276_v39 = vadd.f32 1.0, %v9340_v49 }
 0x2e2   : > { %v7562_v46 = vpop.eup %7561  ;;  %7567 = vrcp.f32 %v4608_v31  ;;  %v9461_v10 = vadd.f32 %v9447_v53, %v4444_v26  ;;  %v3274_v5 = vadd.f32 1.0, %v9351_v42  ;;  %v3279_v19 = vadd.f32 1.0, %v7554_v2  ;;  %v4764_v31 = vld [vmem:[%s10504_s7 + $0x8] sm:$0xff] }
 0x2e3   : > { %v4609_v0 = vadd.f32 1.0, %v7562_v46  ;;  %7569 = vpow2.f32 %v6232_v48  ;;  %v9465_v57 = vadd.f32 %v3960_v34, %v3888_v62  ;;  %v9468_v20 = vld [vmem:[#allocation2 + $0x167] sm:$0xff]  ;;  %v4095_v58 = vadd.f32 %v4063_v29, %v3991_v43  ;;  %v3714_v43 = vld [vmem:[#allocation2 + $0x151] sm:$0xff] }
 0x2e4   : > { %10662 = vst [vmem:[#allocation13_spill] sm:$0xff] %v9461_v10  ;;  %v6233_v40 = vmul.f32 -1.442695, %v9461_v10  ;;  %7571 = vrcp.f32 %v3276_v39  ;;  %v3277_v14 = vadd.f32 1.0, %v7556_v56  ;;  %v6194_v1 = vmul.f32 -1.442695, %v10663_v21 }
 0x2e5   : > { %7573 = vrcp.f32 %v4609_v0  ;;  %v6192_v22 = vmul.f32 -1.442695, %v9437_v27  ;;  %v3785_v45 = vadd.f32 %v3753_v37, %v3681_v12  ;;  %v3857_v42 = vmul.f32 %v9295_v23, %v9468_v20  ;;  %v10665_v62 = vld [vmem:[#allocation11_spill] sm:$0xff]  ;;  %v10667_v37 = vld [vmem:[#allocation21_spill] sm:$0xff]  ;;  %v4765_v29 = vld [vmem:[%s10504_s7 + $0x10] sm:$0xff] }
 0x2e6   : > { %v7564_v49 = vpop.eup %7563  ;;  %7575 = vpow2.f32 %v6233_v40  ;;  %v4168_v33 = vmul.f32 %v9348_v30, %v9468_v20  ;;  %v4732_v63 = vadd.f32 %v4731_v24, %v9433_v44  ;;  %v3546_v2 = vmul.f32 %v9158_v38, %v9373_v13  ;;  %v10666_v13 = vld [vmem:[#allocation35_spill] sm:$0xff]  ;;  %v4763_v24 = vld [vmem:[%s10504_s7] sm:$0xff] }
 0x2e7   : > { %v3961_v56 = vmul.f32 %v9272_v55, %v9414_v25  ;;  %7577 = vrcp.f32 %v3274_v5  ;;  %v3889_v3 = vadd.f32 %v3857_v42, %v3785_v45  ;;  %v4272_v36 = vmul.f32 %v9279_v35, %v9414_v25  ;;  %v4766_v39 = vld [vmem:[%s10504_s7 + $0x18] sm:$0xff]  ;;  %v10671_v45 = vld [vmem:[#allocation12_spill] sm:$0xff] }
 0x2e8   : > { %v4200_v7 = vadd.f32 %v4168_v33, %v4095_v58  ;;  %7579 = vrcp.f32 %v3279_v19  ;;  %v9484_v41 = vmul.f32 %v7564_v49, %v9331_v54  ;;  %v3650_v32 = vmul.f32 %v9168_v9, %v9243_v51  ;;  %v10668_v40 = vld [vmem:[#allocation19_spill] sm:$0xff]  ;;  %v10669_v58 = vld [vmem:[#allocation44_spill] sm:$0xff] }
 0x2e9   : > { %7581 = vrcp.f32 %v3277_v14  ;;  %v3116_v15 = vmul.f32 %v10666_v13, %v10665_v62  ;;  %v9496_v12 = vadd.f32 %v3961_v56, %v3889_v3  ;;  %v3114_v51 = vmul.f32 %v10666_v13, %v10667_v37  ;;  %v10672_v62 = vld [vmem:[#allocation26_spill] sm:$0xff] }
 0x2ea   : > { %10664 = vst [vmem:[#allocation32_spill] sm:$0xff] %v9484_v41  ;;  %v7566_v26 = vpop.eup %7565  ;;  %v9498_v54 = vadd.f32 %v4272_v36, %v4200_v7  ;;  %7583 = vpow2.f32 %v6194_v1  ;;  %v3682_v34 = vadd.f32 %v3650_v32, %v3546_v2  ;;  %v3754_v48 = vmul.f32 %v9207_v8, %v3714_v43 }
 0x2eb   : > { %v4374_v46 = vmul.f32 %v9405_v17, %v3713_v16  ;;  %7585 = vpow2.f32 %v6192_v22  ;;  %v4375_v5 = vmul.f32 %v9405_v17, %v3714_v43  ;;  %v7132_v19 = vadd.f32 %v10669_v58, %v10668_v40  ;;  %v10676_v40 = vld [vmem:[#allocation9_spill] sm:$0xff] }
 0x2ec   : > { %v7568_v0 = vpop.eup %7567  ;;  %v7054_v14 = vpack.c.bf16 %v4764_v31, %v4763_v24  ;;  %v9514_v49 = vmul.f32 %v7566_v26, %v9355_v4  ;;  %v4733_v16 = vadd.f32 %v4732_v63, %v9484_v41  ;;  %v9518_v22 = vadd.f32 %v9053_v50, %v3116_v15  ;;  %v4768_v24 = vld [vmem:[%s10504_s7 + $0x28] sm:$0xff] }
 0x2ed   : > { %v7570_v1 = vpop.eup %7569  ;;  %v3117_v42 = vmul.f32 %v10666_v13, %v10671_v45  ;;  %v10539_v33 = vmov 0.0|0.0   ;;  %v4406_v56 = vadd.f32 %v4374_v46, %v9417_v52  ;;  %v9525_v3 = vadd.f32 %v9053_v50, %v3114_v51  ;;  %v4767_v52 = vld [vmem:[%s10504_s7 + $0x20] sm:$0xff] }
 0x2ee   : > { %10670 = vst [vmem:[#allocation23_spill] sm:$0xff] %v9514_v49  ;;  %7053 = vmatprep.subr.bf16.mxu1 %v10539_v33  ;;  %v7572_v2 = vpop.eup %7571  ;;  %v7057_v4 = vpack.c.bf16 %v4766_v39, %v4765_v29  ;;  %v9527_v36 = vadd.f32 %v3754_v48, %v3682_v34  ;;  %v4064_v63 = vmul.f32 %v9394_v18, %v3714_v43  ;;  %v3510_v46 = vld [vmem:[#allocation2 + $0x187] sm:$0xff]  ;;  %v6197_v29 = vmul.f32 -1.442695, %v9518_v22 }
 0x2ef   : > { %7055 = vmatpush3.bf16.msra.mxu1 %v7054_v14  ;;  %v7574_v7 = vpop.eup %7573  ;;  %v4407_v32 = vadd.f32 %v4375_v5, %v9442_v47  ;;  %v9532_v15 = vmul.f32 %v7572_v2, %v10672_v62  ;;  %v3653_v26 = vmul.f32 %v9168_v9, %v9411_v59  ;;  %v9545_v47 = vmul.f32 %v9272_v55, %v9411_v59  ;;  %v10678_v45 = vld [vmem:[#allocation28_spill] sm:$0xff] }
 0x2f0   : > { %7056 = vmatprep.subr.bf16.mxu1 %v10539_v33  ;;  %v7576_v31 = vpop.eup %7575  ;;  %v9549_v43 = vmul.f32 %v9279_v35, %v9411_v59  ;;  %v3651_v37 = vmul.f32 %v9168_v9, %v9414_v25  ;;  %v9554_v34 = vmul.f32 %v7568_v0, %v9365_v61  ;;  %v4734_v48 = vadd.f32 %v4733_v16, %v9514_v49 }
 0x2f1   : > { %v7578_v51 = vpop.eup %7577  ;;  %3477 = vst [vmem:[#allocation2 + $0x190] sm:$0xff] %v9532_v15  ;;  %v9560_v39 = vadd.f32 %v9053_v50, %v3117_v42  ;;  %v9563_v59 = vmul.f32 %v9426_v6, %v4406_v56  ;;  %v6195_v61 = vmul.f32 -1.442695, %v9525_v3  ;;  %v7060_v0 = vpack.c.bf16 %v4768_v24, %v4767_v52  ;;  %v4769_v56 = vld [vmem:[%s10504_s7 + $0x30] sm:$0xff] }
 0x2f2   : > { %10673 = vst [vmem:[#allocation14_spill] sm:$0xff] %v9554_v34  ;;  %v7580_v5 = vpop.eup %7579  ;;  %v9566_v25 = vmul.f32 %v7578_v51, %v10676_v40  ;;  %v9570_v14 = vmul.f32 %v9426_v6, %v4407_v32  ;;  %v4610_v16 = vadd.f32 1.0, %v7570_v1  ;;  %v3115_v42 = vmul.f32 %v10666_v13, %v7132_v19  ;;  %v10679_v13 = vld [vmem:[#allocation10_spill] sm:$0xff] }
 0x2f3   : > { %10674 = vst [vmem:[#allocation33_spill] sm:$0xff] %v9560_v39  ;;  %10675 = vst [vmem:[#allocation15_spill] sm:$0xff] %v9563_v59  ;;  %7058 = vmatpush3.bf16.msra.mxu1 %v7057_v4  ;;  %v7582_v58 = vpop.eup %7581  ;;  %v9573_v2 = vmul.f32 %v7580_v5, %v10678_v45  ;;  %v4770_v4 = vld [vmem:[%s10504_s7 + $0x38] sm:$0xff]  ;;  %v3549_v32 = vmul.f32 %v9158_v38, %v3510_v46  ;;  %v9585_v1 = vmul.f32 %v9295_v23, %v3510_v46 }
 0x2f4   : > { %10677 = vst [vmem:[#allocation34_spill] sm:$0xff] %v9570_v14  ;;  %7059 = vmatprep.subr.bf16.mxu1 %v10539_v33  ;;  %v7584_v62 = vpop.eup %7583  ;;  %v3547_v52 = vmul.f32 %v9158_v38, %v9468_v20  ;;  %3475 = vst [vmem:[#allocation2 + $0x170] sm:$0xff] %v9566_v25  ;;  %v9591_v19 = vmul.f32 %v7582_v58, %v10679_v13  ;;  %v4735_v51 = vadd.f32 %v4734_v48, %v9554_v34  ;;  %v10682_v48 = vmov 0.0|0.0  }
 0x2f5   : > { %v7586_v24 = vpop.eup %7585  ;;  %3480 = vst [vmem:[#allocation2 + $0x1c8] sm:$0xff] %v9573_v2  ;;  %v3280_v5 = vadd.f32 1.0, %v7584_v62  ;;  %7587 = vpow2.f32 %v6197_v29  ;;  %v6198_v40 = vmul.f32 -1.442695, %v9560_v39  ;;  %v9597_v45 = vmul.f32 %v7574_v7, %v9380_v60  ;;  %v4771_v29 = vld [vmem:[%s10504_s7 + $0x40] sm:$0xff]  ;;  %v4772_v60 = vld [vmem:[%s10504_s7 + $0x48] sm:$0xff] }
 0x2f6   : > { %3478 = vst [vmem:[#allocation2 + $0x1a8] sm:$0xff] %v9591_v19  ;;  %v3278_v20 = vadd.f32 1.0, %v7586_v24  ;;  %7589 = vpow2.f32 %v6195_v61  ;;  %v7063_v33 = vpack.c.bf16 %v4770_v4, %v4769_v56  ;;  %v4611_v58 = vadd.f32 1.0, %v7576_v31  ;;  %v9649_v4 = vld [vmem:[%s10504_s7 + $0x68] sm:$0xff]  ;;  %v9654_v62 = vld [vmem:[%s10504_s7 + $0x70] sm:$0xff] }
 0x2f7   : > { %10680 = vst [vmem:[#allocation24_spill] sm:$0xff] %v9597_v45  ;;  %7061 = vmatpush3.bf16.msra.mxu1 %v7060_v0  ;;  %7591 = vrcp.f32 %v4610_v16  ;;  %v9601_v13 = vadd.f32 %v9053_v50, %v3115_v42  ;;  %v9610_v7 = vadd.f32 %v3653_v26, %v3549_v32  ;;  %v4170_v61 = vmul.f32 %v9348_v30, %v3510_v46  ;;  %v9617_v50 = vld [vmem:[%s10504_s7 + $0x50] sm:$0xff]  ;;  %v4774_v0 = vld [vmem:[%s10504_s7 + $0x58] sm:$0xff]  ;;  %v9622_v16 = vld [vmem:[#allocation2 + $0x40] sm:$0xff] }
 0x2f8   : > { %7062 = vmatprep.subr.bf16.mxu1 %v10682_v48  ;;  %v4096_v31 = vadd.f32 %v4064_v63, %v9465_v57  ;;  %7593 = vrcp.f32 %v3280_v5  ;;  %10683 = vst [vmem:[#allocation36_spill] sm:$0xff] %v9622_v16  ;;  %6917 = vmatprep.mubr.msk.f32.mxu1 %vm7769_vm2, %v9622_v16  ;;  %v3683_v26 = vadd.f32 %v3651_v37, %v3547_v52  ;;  %v9644_v37 = vld [vmem:[%s10504_s7 + $0x60] sm:$0xff]  ;;  %v3511_v10 = vld [vmem:[#allocation2 + $0x18f] sm:$0xff] }
 0x2f9   : > { %10681 = vst [vmem:[#allocation16_spill] sm:$0xff] %v9601_v13  ;;  %v9628_v57 = vmul.f32 %v9168_v9, %v9532_v15  ;;  %v9632_v63 = vmul.f32 %v9272_v55, %v9532_v15  ;;  %7595 = vrcp.f32 %v3278_v20  ;;  %v9635_v46 = vadd.f32 %v4735_v51, %v9597_v45  ;;  %v9666_v51 = vld [vmem:[%s10504_s7 + $0x78] sm:$0xff] }
 0x2fa   : > { %v9639_v42 = vmul.f32 %v9279_v35, %v9532_v15  ;;  %7597 = vpow2.f32 %v6198_v40  ;;  %v7066_v56 = vpack.c.bf16 %v4772_v60, %v4771_v29  ;;  %v9659_v52 = vmul.f32 -1.442695, %v9601_v13  ;;  %v9675_v60 = vld [vmem:[#allocation2 + $0x189] sm:$0xff] }
 0x2fb   : > { %10684 = vst [vmem:[#allocation17_spill] sm:$0xff] %v9635_v46  ;;  %7064 = vmatpush3.bf16.msra.mxu1 %v7063_v33  ;;  %7599 = vrcp.f32 %v4611_v58  ;;  %v3509_v15 = vld [vmem:[#allocation2 + $0x16f] sm:$0xff]  ;;  %v3652_v33 = vmul.f32 %v9168_v9, %v9566_v25  ;;  %v7069_v24 = vpack.c.bf16 %v4774_v0, %v9617_v50  ;;  %v3962_v29 = vmul.f32 %v9272_v55, %v9566_v25 }
 0x2fc   : > { %v3715_v32 = vld [vmem:[#allocation2 + $0x169] sm:$0xff]  ;;  %7065 = vmatprep.subr.bf16.mxu1 %v10682_v48  ;;  %v3548_v5 = vmul.f32 %v9158_v38, %v3509_v15  ;;  %v9669_v40 = vld [vmem:[#allocation2 + $0x171] sm:$0xff]  ;;  %v3858_v58 = vmul.f32 %v9295_v23, %v3509_v15  ;;  %v4273_v0 = vmul.f32 %v9279_v35, %v9566_v25  ;;  %v3965_v45 = vmul.f32 %v9272_v55, %v9591_v19 }
 0x2fd   : > { %v3755_v20 = vmul.f32 %v9207_v8, %v3715_v32  ;;  %v4065_v50 = vmul.f32 %v9394_v18, %v3715_v32  ;;  %v7072_v34 = vpack.c.bf16 %v9649_v4, %v9644_v37  ;;  %v3756_v11 = vmul.f32 %v9207_v8, %v9669_v40 }
 0x2fe   : > { %v3684_v49 = vadd.f32 %v3652_v33, %v3548_v5  ;;  %v3890_v44 = vadd.f32 %v3858_v58, %v9527_v36  ;;  %v4169_v13 = vmul.f32 %v9348_v30, %v3509_v15  ;;  %v4376_v14 = vmul.f32 %v9405_v17, %v3715_v32  ;;  %v3512_v32 = vld [vmem:[#allocation2 + $0x1a7] sm:$0xff] }
 0x2ff   : > { %v3787_v41 = vadd.f32 %v3755_v20, %v3683_v26  ;;  %7067 = vmatpush3.bf16.msra.mxu1 %v7066_v56  ;;  %v7588_v46 = vpop.eup %7587  ;;  %v4097_v25 = vadd.f32 %v4065_v50, %v9496_v12  ;;  %v3757_v36 = vmul.f32 %v9207_v8, %v9675_v60  ;;  %v4066_v4 = vmul.f32 %v9394_v18, %v9669_v40 }
 0x300   : > { %7068 = vmatprep.subr.bf16.mxu1 %v10682_v48  ;;  %v7590_v26 = vpop.eup %7589  ;;  %v3994_v37 = vadd.f32 %v3962_v29, %v3890_v44  ;;  %v3788_v5 = vadd.f32 %v3756_v11, %v3684_v49  ;;  %v4201_v12 = vadd.f32 %v4169_v13, %v4096_v31  ;;  %v4408_v15 = vadd.f32 %v4376_v14, %v9498_v54 }
 0x301   : > { %v3891_v56 = vadd.f32 %v9585_v1, %v3787_v41  ;;  %v9698_v33 = vpop.eup %7591  ;;  %v4202_v20 = vadd.f32 %v4170_v61, %v4097_v25  ;;  %v3860_v50 = vmul.f32 %v9295_v23, %v3511_v10  ;;  %v4171_v28 = vmul.f32 %v9348_v30, %v3511_v10 }
 0x302   : > { %v7594_v58 = vpop.eup %7593  ;;  %v4098_v59 = vadd.f32 %v4066_v4, %v3994_v37  ;;  %v3283_v39 = vadd.f32 1.0, %v7588_v46  ;;  %v4067_v41 = vmul.f32 %v9394_v18, %v9675_v60  ;;  %v4305_v1 = vadd.f32 %v4273_v0, %v4201_v12  ;;  %v3514_v37 = vld [vmem:[#allocation2 + $0x1c7] sm:$0xff] }
 0x303   : > { %7070 = vmatpush3.bf16.msra.mxu1 %v7069_v24  ;;  %v7596_v44 = vpop.eup %7595  ;;  %v9706_v11 = vadd.f32 %v9549_v43, %v4202_v20  ;;  %v4447_v49 = vmul.f32 %v9426_v6, %v4408_v15  ;;  %v3789_v14 = vadd.f32 %v3757_v36, %v9610_v7  ;;  %v3861_v61 = vmul.f32 %v9295_v23, %v3512_v32  ;;  %v4140_v15 = vld [vmem:[#allocation2 + $0x227] sm:$0xff] }
 0x304   : > { %7071 = vmatprep.subr.bf16.mxu1 %v10682_v48  ;;  %v7598_v54 = vpop.eup %7597  ;;  %v4203_v13 = vadd.f32 %v4171_v28, %v4098_v59  ;;  %v3995_v31 = vadd.f32 %v9545_v47, %v3891_v56  ;;  %v3550_v24 = vmul.f32 %v9158_v38, %v3511_v10  ;;  %v3892_v29 = vadd.f32 %v3860_v50, %v3788_v5  ;;  %v3718_v5 = vld [vmem:[#allocation2 + $0x191] sm:$0xff] }
 0x305   : > { %v9713_v46 = vpop.eup %7599  ;;  %v4172_v43 = vmul.f32 %v9348_v30, %v3512_v32  ;;  %v3376_v0 = vmul.f32 %v7594_v58, %v10663_v21  ;;  %v3893_v4 = vadd.f32 %v3861_v61, %v3789_v14  ;;  %v3374_v28 = vmul.f32 %v7596_v44, %v9437_v27  ;;  %v4141_v58 = vld [vmem:[#allocation2 + $0x22f] sm:$0xff] }
 0x306   : > { %v9719_v25 = vadd.f32 %v9639_v42, %v4203_v13  ;;  %v4099_v7 = vadd.f32 %v4067_v41, %v3995_v31  ;;  %v9723_v47 = vadd.f32 %v9447_v53, %v4447_v49  ;;  %v3657_v10 = vmul.f32 %v9168_v9, %v9573_v2  ;;  %v4348_v14 = vld [vmem:[#allocation2 + $0x229] sm:$0xff] }
 0x307   : > { %7073 = vmatpush3.bf16.msra.mxu1 %v7072_v34  ;;  %v9729_v59 = vmul.f32 %v9272_v55, %v9573_v2  ;;  %v9733_v21 = vmul.f32 %v9279_v35, %v9573_v2  ;;  %3481 = vst [vmem:[#allocation2 + $0x1d0] sm:$0xff] %v3376_v0  ;;  %v3655_v27 = vmul.f32 %v9168_v9, %v9591_v19  ;;  %3479 = vst [vmem:[#allocation2 + $0x1b0] sm:$0xff] %v3374_v28 }
 0x308   : > { %7074 = vmatprep.subr.bf16.mxu1 %v10682_v48  ;;  %v9738_v34 = vadd.f32 %v3965_v45, %v3893_v4  ;;  %v4204_v42 = vadd.f32 %v4172_v43, %v4099_v7  ;;  %v4276_v36 = vmul.f32 %v9279_v35, %v9591_v19  ;;  %v3686_v56 = vadd.f32 %v9628_v57, %v3550_v24 }
 0x309   : > { %v4377_v2 = vmul.f32 %v9405_v17, %v9669_v40  ;;  %v3553_v12 = vmul.f32 %v9158_v38, %v3514_v37  ;;  %v3996_v20 = vadd.f32 %v9632_v63, %v3892_v29  ;;  %7601 = vrcp.f32 %v3283_v39 }
 0x30a   : > { %v9747_v50 = vadd.f32 %v4276_v36, %v4204_v42  ;;  %v3281_v45 = vadd.f32 1.0, %v7590_v26  ;;  %v3284_v44 = vadd.f32 1.0, %v7598_v54  ;;  %v10685_v19 = vpack.c.bf16 %v9666_v51, %v9654_v62 }
 0x30b   : > { %v4409_v57 = vadd.f32 %v4377_v2, %v4305_v1  ;;  %v6236_v41 = vmul.f32 -1.442695, %v9723_v47  ;;  %v3551_v40 = vmul.f32 %v9158_v38, %v3512_v32  ;;  %7603 = vpow2.f32 %v9659_v52 }
 0x30c   : > { %7076 = vmatpush3.bf16.msra.mxu1 %v10685_v19  ;;  %v3758_v63 = vmul.f32 %v9207_v8, %v3718_v5  ;;  %7605 = vrcp.f32 %v3281_v45  ;;  %v9758_v39 = vmul.f32 %v9348_v30, %v4140_v15  ;;  %v9761_v26 = vmul.f32 %v9348_v30, %v4141_v58 }
 0x30d   : > { %7077 = vmatprep.subr.bf16.mxu1 %v10682_v48  ;;  %v4068_v62 = vmul.f32 %v9394_v18, %v3718_v5  ;;  %v4378_v51 = vmul.f32 %v9405_v17, %v9675_v60  ;;  %v4379_v32 = vmul.f32 %v9405_v17, %v3718_v5  ;;  %7607 = vrcp.f32 %v3284_v44  ;;  %v4349_v60 = vld [vmem:[#allocation2 + $0x231] sm:$0xff] }
 0x30e   : > { %v3790_v52 = vadd.f32 %v3758_v63, %v3686_v56  ;;  %v9767_v1 = vadd.f32 %v3657_v10, %v3553_v12  ;;  %v3863_v49 = vmul.f32 %v9295_v23, %v3514_v37  ;;  %v4174_v54 = vmul.f32 %v9348_v30, %v3514_v37  ;;  %v3513_v24 = vld [vmem:[#allocation2 + $0x1af] sm:$0xff] }
 0x30f   : > { %v4448_v13 = vmul.f32 %v9426_v6, %v4409_v57  ;;  %7609 = vpow2.f32 %v6236_v41  ;;  %v3687_v61 = vadd.f32 %v3655_v27, %v3551_v40  ;;  %v3658_v31 = vmul.f32 %v9168_v9, %v3376_v0  ;;  %v3719_v29 = vld [vmem:[#allocation2 + $0x1a9] sm:$0xff]  ;;  %v3720_v10 = vld [vmem:[#allocation2 + $0x1b1] sm:$0xff] }
 0x310   : > { %v3968_v43 = vmul.f32 %v9272_v55, %v3376_v0  ;;  %v4279_v4 = vmul.f32 %v9279_v35, %v3376_v0  ;;  %v3656_v7 = vmul.f32 %v9168_v9, %v3374_v28  ;;  %v3966_v42 = vmul.f32 %v9272_v55, %v3374_v28  ;;  %v3515_v37 = vld [vmem:[#allocation2 + $0x1cf] sm:$0xff] }
 0x311   : > { %v3552_v36 = vmul.f32 %v9158_v38, %v3513_v24  ;;  %v3759_v56 = vmul.f32 %v9207_v8, %v3719_v29  ;;  %v4100_v27 = vadd.f32 %v4068_v62, %v3996_v20  ;;  %v4277_v5 = vmul.f32 %v9279_v35, %v3374_v28 }
 0x312   : > { %v3862_v2 = vmul.f32 %v9295_v23, %v3513_v24  ;;  %v9783_v12 = vmul.f32 %v9622_v16, %v9279_v35  ;;  %v9786_v0 = vmul.f32 %v9405_v17, %v4348_v14  ;;  %v9789_v9 = vmul.f32 %v9405_v17, %v4349_v60 }
 0x313   : > { %v3688_v15 = vadd.f32 %v3656_v7, %v3552_v36  ;;  %v3760_v58 = vmul.f32 %v9207_v8, %v3720_v10  ;;  %v3791_v45 = vadd.f32 %v3759_v56, %v3687_v61  ;;  %v4173_v20 = vmul.f32 %v9348_v30, %v3513_v24  ;;  %v7602_v44 = vpop.eup %7601 }
 0x314   : > { %v3864_v28 = vmul.f32 %v9295_v23, %v3515_v37  ;;  %v3894_v19 = vadd.f32 %v3862_v2, %v3790_v52  ;;  %v4069_v57 = vmul.f32 %v9394_v18, %v3719_v29  ;;  %v4410_v41 = vadd.f32 %v4378_v51, %v9706_v11 }
 0x315   : > { %v7604_v40 = vpop.eup %7603  ;;  %v3792_v63 = vadd.f32 %v3760_v58, %v3688_v15  ;;  %v3895_v62 = vadd.f32 %v3863_v49, %v3791_v45  ;;  %v4070_v14 = vmul.f32 %v9394_v18, %v3720_v10  ;;  %v4205_v60 = vadd.f32 %v4173_v20, %v4100_v27  ;;  %v3721_v15 = vld [vmem:[#allocation2 + $0x1c9] sm:$0xff]  ;;  %v3722_v20 = vld [vmem:[#allocation2 + $0x1d1] sm:$0xff] }
 0x316   : > { %v7606_v7 = vpop.eup %7605  ;;  %v3998_v36 = vadd.f32 %v3966_v42, %v3894_v19  ;;  %v4101_v61 = vadd.f32 %v4069_v57, %v9738_v34  ;;  %v9799_v24 = vmul.f32 %v7602_v44, %v9518_v22  ;;  %v3282_v56 = vadd.f32 1.0, %v7604_v40  ;;  %v10686_v42 = vld [vmem:[#allocation33_spill] sm:$0xff] }
 0x317   : > { %v7608_v48 = vpop.eup %7607  ;;  %v3554_v52 = vmul.f32 %v9158_v38, %v3515_v37  ;;  %v4309_v2 = vadd.f32 %v4277_v5, %v4205_v60  ;;  %v3377_v11 = vmul.f32 %v7606_v7, %v9525_v3  ;;  %v3896_v51 = vadd.f32 %v3864_v28, %v3792_v63  ;;  %v10687_v5 = vld [vmem:[#allocation15_spill] sm:$0xff]  ;;  %v10688_v28 = vld [vmem:[#allocation34_spill] sm:$0xff] }
 0x318   : > { %v4175_v49 = vmul.f32 %v9348_v30, %v3515_v37  ;;  %v4102_v58 = vadd.f32 %v4070_v14, %v3998_v36  ;;  %3484 = vst [vmem:[#allocation2 + $0x208] sm:$0xff] %v9799_v24  ;;  %v9806_v27 = vmul.f32 %v7608_v48, %v10686_v42  ;;  %7611 = vrcp.f32 %v3282_v56 }
 0x319   : > { %v7610_v22 = vpop.eup %7609  ;;  %3482 = vst [vmem:[#allocation2 + $0x1e8] sm:$0xff] %v3377_v11  ;;  %v3999_v34 = vadd.f32 %v9729_v59, %v3895_v62  ;;  %v4000_v45 = vadd.f32 %v3968_v43, %v3896_v51  ;;  %v4411_v38 = vadd.f32 %v4379_v32, %v9719_v25  ;;  %v9812_v3 = vadd.f32 %v9447_v53, %v10687_v5 }
 0x31a   : > { %3485 = vst [vmem:[#allocation2 + $0x210] sm:$0xff] %v9806_v27  ;;  %v4206_v37 = vadd.f32 %v4174_v54, %v4101_v61  ;;  %v4207_v44 = vadd.f32 %v4175_v49, %v4102_v58  ;;  %v9817_v48 = vadd.f32 %v9447_v53, %v10688_v28  ;;  %v9820_v19 = vadd.f32 %v9447_v53, %v4448_v13 }
 0x31b   : > { %v3690_v59 = vadd.f32 %v3658_v31, %v3554_v52  ;;  %v3761_v43 = vmul.f32 %v9207_v8, %v3721_v15  ;;  %v4380_v25 = vmul.f32 %v9405_v17, %v3719_v29  ;;  %v4449_v32 = vmul.f32 %v9426_v6, %v4410_v41  ;;  %v7697_v52 = vld [vmem:[%s10501_s4 + $0x1] ss:$0 sm:$0xff] }
 0x31c   : > { %10689 = vst [vmem:[#allocation41_spill] sm:$0xff] %v9820_v19  ;;  %v4614_v57 = vadd.f32 1.0, %v7610_v22  ;;  %v4381_v40 = vmul.f32 %v9405_v17, %v3720_v10  ;;  %v4310_v54 = vadd.f32 %v9733_v21, %v4206_v37  ;;  %v4311_v63 = vadd.f32 %v4279_v4, %v4207_v44 }
 0x31d   : > { %v3762_v62 = vmul.f32 %v9207_v8, %v3722_v20  ;;  %v4071_v14 = vmul.f32 %v9394_v18, %v3721_v15  ;;  %v4382_v13 = vmul.f32 %v9405_v17, %v3721_v15  ;;  %v4450_v31 = vmul.f32 %v9426_v6, %v4411_v38 }
 0x31e   : > { %v4412_v60 = vadd.f32 %v4380_v25, %v9747_v50  ;;  %v4383_v29 = vmul.f32 %v9405_v17, %v3722_v20  ;;  %v4413_v7 = vadd.f32 %v4381_v40, %v4309_v2  ;;  %v6234_v41 = vmul.f32 -1.442695, %v9812_v3 }
 0x31f   : > { %v3793_v10 = vadd.f32 %v3761_v43, %v9767_v1  ;;  %v4072_v21 = vmul.f32 %v9394_v18, %v3722_v20  ;;  %v4103_v4 = vadd.f32 %v4071_v14, %v3999_v34  ;;  %v4414_v36 = vadd.f32 %v4382_v13, %v4310_v54  ;;  %v10691_v34 = vld [vmem:[#allocation16_spill] sm:$0xff] }
 0x320   : > { %7613 = vrcp.f32 %v4614_v57  ;;  %v3516_v8 = vld [vmem:[#allocation2 + $0x1e7] sm:$0xff]  ;;  %v9836_v61 = vadd.f32 %v3762_v62, %v3690_v59  ;;  %v9840_v56 = vmul.f32 %v9272_v55, %v9799_v24  ;;  %v4415_v50 = vadd.f32 %v4383_v29, %v4311_v63 }
 0x321   : > { %v3659_v2 = vmul.f32 %v7697_v52, %v3377_v11  ;;  %v3865_v1 = vmul.f32 %v9295_v23, %v3516_v8  ;;  %v3969_v51 = vmul.f32 %v9272_v55, %v3377_v11  ;;  %v4176_v15 = vmul.f32 %v9348_v30, %v3516_v8  ;;  %v3827_v43 = vld [vmem:[#allocation2 + $0x207] sm:$0xff]  ;;  %v3828_v25 = vld [vmem:[#allocation2 + $0x20f] sm:$0xff] }
 0x322   : > { %v7612_v49 = vpop.eup %7611  ;;  %v4451_v58 = vmul.f32 %v9426_v6, %v4412_v60  ;;  %v4452_v42 = vmul.f32 %v9426_v6, %v4413_v7  ;;  %v9851_v22 = vadd.f32 %v9447_v53, %v4449_v32  ;;  %7615 = vpow2.f32 %v6234_v41  ;;  %v4035_v54 = vld [vmem:[#allocation2 + $0x209] sm:$0xff]  ;;  %v9874_v63 = vld [vmem:[#allocation2 + $0x211] sm:$0xff]  ;;  %v7699_v62 = vld [vmem:[%s10501_s4 + $0x7] ss:$0 sm:$0xff] }
 0x323   : > { %v3378_v38 = vmul.f32 %v7612_v49, %v10691_v34  ;;  %v3897_v5 = vadd.f32 %v3865_v1, %v3793_v10  ;;  %v4208_v20 = vadd.f32 %v4176_v15, %v4103_v4  ;;  %v4453_v37 = vmul.f32 %v9426_v6, %v4414_v36  ;;  %v7700_v7 = vld [vmem:[%s10501_s4 + $0x3] ss:$0 sm:$0xff] }
 0x324   : > { %10690 = vst [vmem:[#allocation18_spill] sm:$0xff] %v9851_v22  ;;  %v9857_v23 = vmul.f32 %v9272_v55, %v9806_v27  ;;  %v9859_v44 = vadd.f32 %v4072_v21, %v4000_v45  ;;  %v4280_v28 = vmul.f32 %v9279_v35, %v3377_v11  ;;  %v4454_v59 = vmul.f32 %v9426_v6, %v4415_v50  ;;  %v7698_v45 = vld [vmem:[%s10501_s4] ss:$0 sm:$0xff] }
 0x325   : > { %3483 = vst [vmem:[#allocation2 + $0x1f0] sm:$0xff] %v3378_v38  ;;  %v4001_v32 = vadd.f32 %v3969_v51, %v3897_v5  ;;  %v9865_v57 = vmul.f32 %v9279_v35, %v9799_v24  ;;  %v9868_v40 = vadd.f32 %v9447_v53, %v4450_v31  ;;  %v6235_v55 = vmul.f32 -1.442695, %v9817_v48 }
 0x326   : > { %v3555_v11 = vmul.f32 %v7698_v45, %v3516_v8  ;;  %v9880_v35 = vmul.f32 %v7699_v62, %v9806_v27  ;;  %v4312_v24 = vadd.f32 %v4280_v28, %v4208_v20  ;;  %v9883_v14 = vadd.f32 %v9447_v53, %v4451_v58 }
 0x327   : > { %10692 = vst [vmem:[#allocation43_spill] sm:$0xff] %v9868_v40  ;;  %v9886_v13 = vadd.f32 %v9447_v53, %v4452_v42  ;;  %v9889_v31 = vadd.f32 %v9447_v53, %v4453_v37  ;;  %v6237_v60 = vmul.f32 -1.442695, %v9820_v19  ;;  %v6238_v29 = vmul.f32 -1.442695, %v9851_v22 }
 0x328   : > { %10693 = vst [vmem:[#allocation39_spill] sm:$0xff] %v9883_v14  ;;  %v3867_v27 = vmul.f32 %v7700_v7, %v3827_v43  ;;  %v3868_v41 = vmul.f32 %v7700_v7, %v3828_v25  ;;  %v4178_v10 = vmul.f32 %v9348_v30, %v3827_v43  ;;  %v9898_v21 = vadd.f32 %v9447_v53, %v4454_v59 }
 0x329   : > { %10694 = vst [vmem:[#allocation27_spill] sm:$0xff] %v9886_v13  ;;  %10695 = vst [vmem:[#allocation11_spill] sm:$0xff] %v9889_v31  ;;  %v4075_v4 = vmul.f32 %v9394_v18, %v4035_v54  ;;  %v9903_v36 = vmul.f32 %v9394_v18, %v9874_v63  ;;  %7617 = vpow2.f32 %v6235_v55  ;;  %v6239_v8 = vmul.f32 -1.442695, %v9868_v40 }
 0x32a   : > { %10696 = vst [vmem:[#allocation35_spill] sm:$0xff] %v9898_v21  ;;  %v9906_v50 = vpop.eup %7613  ;;  %v3691_v1 = vadd.f32 %v3659_v2, %v3555_v11  ;;  %v4179_v51 = vmul.f32 %v9348_v30, %v3828_v25  ;;  %v4386_v15 = vmul.f32 %v9405_v17, %v4035_v54  ;;  %v6240_v49 = vmul.f32 -1.442695, %v9883_v14  ;;  %v7701_v2 = vld [vmem:[%s10501_s4 + $0x4] ss:$0 sm:$0xff] }
 0x32b   : > { %v3660_v58 = vmul.f32 %v7697_v52, %v3378_v38  ;;  %7619 = vpow2.f32 %v6237_v60  ;;  %v6241_v42 = vmul.f32 -1.442695, %v9886_v13  ;;  %v6242_v34 = vmul.f32 -1.442695, %v9889_v31  ;;  %v7702_v52 = vld [vmem:[%s10501_s4 + $0x2] ss:$0 sm:$0xff] }
 0x32c   : > { %v7616_v5 = vpop.eup %7615  ;;  %v3517_v20 = vld [vmem:[#allocation2 + $0x1ef] sm:$0xff]  ;;  %v3970_v59 = vmul.f32 %v7701_v2, %v3378_v38  ;;  %v4281_v43 = vmul.f32 %v7699_v62, %v3378_v38  ;;  %7621 = vpow2.f32 %v6238_v29  ;;  %v6243_v25 = vmul.f32 -1.442695, %v9898_v21 }
 0x32d   : > { %v3723_v37 = vld [vmem:[#allocation2 + $0x1e9] sm:$0xff]  ;;  %v3724_v28 = vld [vmem:[#allocation2 + $0x1f1] sm:$0xff]  ;;  %v3556_v55 = vmul.f32 %v7698_v45, %v3517_v20  ;;  %v3866_v54 = vmul.f32 %v7700_v7, %v3517_v20  ;;  %7623 = vpow2.f32 %v6239_v8  ;;  %v4177_v16 = vmul.f32 %v9348_v30, %v3517_v20 }
 0x32e   : > { %v3763_v11 = vmul.f32 %v7702_v52, %v3723_v37  ;;  %v4073_v60 = vmul.f32 %v9394_v18, %v3723_v37  ;;  %v4384_v31 = vmul.f32 %v9405_v17, %v3723_v37  ;;  %7625 = vpow2.f32 %v6240_v49 }
 0x32f   : > { %v3692_v2 = vadd.f32 %v3660_v58, %v3556_v55  ;;  %v3764_v38 = vmul.f32 %v7702_v52, %v3724_v28  ;;  %v3898_v29 = vadd.f32 %v3866_v54, %v9836_v61  ;;  %v4209_v21 = vadd.f32 %v4177_v16, %v9859_v44 }
 0x330   : > { %v3795_v62 = vadd.f32 %v3763_v11, %v3691_v1  ;;  %v4105_v45 = vadd.f32 %v4073_v60, %v4001_v32  ;;  %v4416_v13 = vadd.f32 %v4384_v31, %v4312_v24  ;;  %v4612_v14 = vadd.f32 1.0, %v7616_v5  ;;  %v10699_v60 = vld [vmem:[#allocation17_spill] sm:$0xff] }
 0x331   : > { %v3796_v40 = vadd.f32 %v3764_v38, %v3692_v2  ;;  %v4002_v8 = vadd.f32 %v3970_v59, %v3898_v29  ;;  %v4074_v22 = vmul.f32 %v9394_v18, %v3724_v28  ;;  %v4313_v30 = vadd.f32 %v4281_v43, %v4209_v21 }
 0x332   : > { %v3899_v7 = vadd.f32 %v3867_v27, %v3795_v62  ;;  %v4210_v19 = vadd.f32 %v4178_v10, %v4105_v45  ;;  %v4385_v20 = vmul.f32 %v9405_v17, %v3724_v28  ;;  %v4455_v49 = vmul.f32 %v9426_v6, %v4416_v13 }
 0x333   : > { %v7618_v58 = vpop.eup %7617  ;;  %v3900_v1 = vadd.f32 %v3868_v41, %v3796_v40  ;;  %v4106_v32 = vadd.f32 %v4074_v22, %v4002_v8  ;;  %7627 = vpow2.f32 %v6241_v42 }
 0x334   : > { %v4003_v61 = vadd.f32 %v9840_v56, %v3899_v7  ;;  %v4314_v16 = vadd.f32 %v9865_v57, %v4210_v19  ;;  %v4417_v44 = vadd.f32 %v4385_v20, %v4313_v30  ;;  %v9931_v24 = vadd.f32 %v9447_v53, %v4455_v49 }
 0x335   : > { %7629 = vpow2.f32 %v6242_v34  ;;  %v7620_v18 = vpop.eup %7619  ;;  %v4004_v31 = vadd.f32 %v9857_v23, %v3900_v1  ;;  %v4211_v10 = vadd.f32 %v4179_v51, %v4106_v32  ;;  %v4613_v22 = vadd.f32 1.0, %v7618_v58 }
 0x336   : > { %v4107_v27 = vadd.f32 %v4075_v4, %v4003_v61  ;;  %7631 = vpow2.f32 %v6243_v25  ;;  %v7622_v13 = vpop.eup %7621  ;;  %v4418_v21 = vadd.f32 %v4386_v15, %v4314_v16  ;;  %v4456_v40 = vmul.f32 %v9426_v6, %v4417_v44 }
 0x337   : > { %v6244_v56 = vmul.f32 -1.442695, %v9931_v24  ;;  %v7624_v41 = vpop.eup %7623  ;;  %v4108_v19 = vadd.f32 %v9903_v36, %v4004_v31  ;;  %v4315_v42 = vadd.f32 %v9880_v35, %v4211_v10  ;;  %v4387_v23 = vmul.f32 %v9405_v17, %v9874_v63 }
 0x338   : > { %v4212_v57 = vadd.f32 %v9758_v39, %v4107_v27  ;;  %v7626_v4 = vpop.eup %7625  ;;  %v4457_v51 = vmul.f32 %v9426_v6, %v4418_v21  ;;  %v9943_v15 = vadd.f32 %v9447_v53, %v4456_v40  ;;  %v4615_v34 = vadd.f32 1.0, %v7620_v18  ;;  %v10697_v39 = vld [vmem:[#allocation22_spill] sm:$0xff]  ;;  %v10700_v21 = vld [vmem:[#allocation41_spill] sm:$0xff] }
 0x339   : > { %7633 = vpow2.f32 %v6244_v56  ;;  %v4213_v5 = vadd.f32 %v9761_v26, %v4108_v19  ;;  %v4419_v36 = vadd.f32 %v4387_v23, %v4315_v42  ;;  %v9949_v35 = vmul.f32 %v9698_v33, %v10697_v39  ;;  %v10702_v23 = vld [vmem:[#allocation43_spill] sm:$0xff] }
 0x33a   : > { %v4316_v37 = vadd.f32 %v9783_v12, %v4212_v57  ;;  %7635 = vrcp.f32 %v4612_v14  ;;  %v9952_v17 = vadd.f32 %v9447_v53, %v4457_v51  ;;  %v6245_v63 = vmul.f32 -1.442695, %v9943_v15 }
 0x33b   : > { %7637 = vrcp.f32 %v4613_v22  ;;  %v4317_v28 = vadd.f32 %v9783_v12, %v4213_v5  ;;  %v4458_v26 = vmul.f32 %v9426_v6, %v4419_v36  ;;  %v4616_v43 = vadd.f32 1.0, %v7622_v13  ;;  %v10698_v12 = vld [vmem:[#allocation13_spill] sm:$0xff]  ;;  %v10703_v36 = vld [vmem:[#allocation39_spill] sm:$0xff] }
 0x33c   : > { %v4420_v59 = vadd.f32 %v9786_v0, %v4316_v37  ;;  %7639 = vpow2.f32 %v6245_v63  ;;  %v6246_v14 = vmul.f32 -1.442695, %v9952_v17  ;;  %v4617_v25 = vadd.f32 1.0, %v7624_v41  ;;  %v10701_v41 = vld [vmem:[#allocation18_spill] sm:$0xff] }
 0x33d   : > { %v7628_v55 = vpop.eup %7627  ;;  %v4421_v33 = vadd.f32 %v9789_v9, %v4317_v28  ;;  %v9962_v11 = vadd.f32 %v9447_v53, %v4458_v26  ;;  %7641 = vrcp.f32 %v4615_v34  ;;  %v9966_v0 = vmul.f32 %v9713_v46, %v10698_v12 }
 0x33e   : > { %v4459_v52 = vmul.f32 %v9426_v6, %v4420_v59  ;;  %v4737_v2 = vadd.f32 %v10699_v60, %v9949_v35  ;;  %7643 = vpow2.f32 %v6246_v14  ;;  %v4618_v38 = vadd.f32 1.0, %v7626_v4  ;;  %v10706_v60 = vld [vmem:[#allocation35_spill] sm:$0xff] }
 0x33f   : > { %v7630_v54 = vpop.eup %7629  ;;  %v4460_v29 = vmul.f32 %v9426_v6, %v4421_v33  ;;  %v6247_v45 = vmul.f32 -1.442695, %v9962_v11  ;;  %7645 = vrcp.f32 %v4616_v43  ;;  %v4619_v7 = vadd.f32 1.0, %v7628_v55  ;;  %v10704_v43 = vld [vmem:[#allocation27_spill] sm:$0xff] }
 0x340   : > { %v7632_v62 = vpop.eup %7631  ;;  %v9972_v9 = vadd.f32 %v9447_v53, %v4459_v52  ;;  %7647 = vrcp.f32 %v4617_v25  ;;  %v4620_v20 = vadd.f32 1.0, %v7630_v54  ;;  %v4738_v49 = vadd.f32 %v4737_v2, %v9966_v0  ;;  %v10705_v33 = vld [vmem:[#allocation11_spill] sm:$0xff] }
 0x341   : > { %v9976_v8 = vadd.f32 %v9447_v53, %v4460_v29  ;;  %7649 = vpow2.f32 %v6247_v45  ;;  %v4621_v1 = vadd.f32 1.0, %v7632_v62  ;;  %v9989_v18 = vmul.f32 %v9906_v50, %v9723_v47 }
 0x342   : > { %v6248_v46 = vmul.f32 -1.442695, %v9972_v9  ;;  %7651 = vrcp.f32 %v4618_v38 }
 0x343   : > { %v7634_v30 = vpop.eup %7633  ;;  %v6249_v58 = vmul.f32 -1.442695, %v9976_v8 }
 0x344   : > { %v7636_v6 = vpop.eup %7635  ;;  %7653 = vpow2.f32 %v6248_v46  ;;  %v4622_v53 = vadd.f32 1.0, %v7634_v30 }
 0x345   : > { %v7638_v61 = vpop.eup %7637  ;;  %7655 = vrcp.f32 %v4619_v7  ;;  %v9982_v32 = vmul.f32 %v7636_v6, %v9812_v3 }
 0x346   : > { %7657 = vpow2.f32 %v6249_v58  ;;  %v9985_v16 = vmul.f32 %v7638_v61, %v9817_v48  ;;  %v7640_v44 = vpop.eup %7639 }
 0x347   : > { %7659 = vrcp.f32 %v4620_v20  ;;  %v4739_v31 = vadd.f32 %v4738_v49, %v9982_v32  ;;  %v7642_v27 = vpop.eup %7641  ;;  %v4623_v10 = vadd.f32 1.0, %v7640_v44 }
 0x348   : > { %7661 = vrcp.f32 %v4621_v1  ;;  %v7644_v13 = vpop.eup %7643  ;;  %v9993_v3 = vmul.f32 %v7642_v27, %v10700_v21 }
 0x349   : > { %v4740_v40 = vadd.f32 %v4739_v31, %v9985_v16  ;;  %v7646_v56 = vpop.eup %7645  ;;  %v4624_v48 = vadd.f32 1.0, %v7644_v13  ;;  %7663 = vrcp.f32 %v4622_v53 }
 0x34a   : > { %v7648_v22 = vpop.eup %7647  ;;  %v9997_v19 = vmul.f32 %v7646_v56, %v10701_v41  ;;  %7665 = vrcp.f32 %v4623_v10 }
 0x34b   : > { %v4741_v47 = vadd.f32 %v4740_v40, %v9989_v18  ;;  %v7650_v50 = vpop.eup %7649  ;;  %v10001_v4 = vmul.f32 %v7648_v22, %v10702_v23  ;;  %7667 = vrcp.f32 %v4624_v48  ;;  %v4864_v22 = vld [vmem:[%s10506_s9 + $0x8] sm:$0xff]  ;;  %v4867_v23 = vld [vmem:[%s10506_s9 + $0x20] sm:$0xff] }
 0x34c   : > { %v7652_v57 = vpop.eup %7651  ;;  %v4625_v42 = vadd.f32 1.0, %v7650_v50  ;;  %v4865_v50 = vld [vmem:[%s10506_s9 + $0x10] sm:$0xff] }
 0x34d   : > { %v4742_v51 = vadd.f32 %v4741_v47, %v9993_v3  ;;  %v10005_v39 = vmul.f32 %v7652_v57, %v10703_v36  ;;  %v10708_v47 = vmov 0.0|0.0   ;;  %v4866_v57 = vld [vmem:[%s10506_s9 + $0x18] sm:$0xff] }
 0x34e   : > { %v7654_v34 = vpop.eup %7653  ;;  %7669 = vrcp.f32 %v4625_v42  ;;  %v7081_v42 = vpack.c.bf16 %v4866_v57, %v4865_v50  ;;  %v4962_v50 = vlaneseq }
 0x34f   : > { %v7656_v5 = vpop.eup %7655  ;;  %v4626_v37 = vadd.f32 1.0, %v7654_v34  ;;  %v4743_v63 = vadd.f32 %v4742_v51, %v9997_v19  ;;  %v4868_v51 = vld [vmem:[%s10506_s9 + $0x28] sm:$0xff] }
 0x350   : > { %v7658_v28 = vpop.eup %7657  ;;  %v10009_v14 = vmul.f32 %v7656_v5, %v10704_v43  ;;  %v7084_v34 = vpack.c.bf16 %v4868_v51, %v4867_v23  ;;  %v4869_v5 = vld [vmem:[%s10506_s9 + $0x30] sm:$0xff]  ;;  %v4874_v43 = vld [vmem:[%s10506_s9 + $0x58] sm:$0xff]  ;;  %v4963_v57 = vshrl.u32 %v4962_v50, 7 }
 0x351   : > { %v7660_v59 = vpop.eup %7659  ;;  %v4627_v26 = vadd.f32 1.0, %v7658_v28  ;;  %v4744_v25 = vadd.f32 %v4743_v63, %v10001_v4  ;;  %7671 = vrcp.f32 %v4626_v37  ;;  %v4870_v37 = vld [vmem:[%s10506_s9 + $0x38] sm:$0xff]  ;;  %v4871_v63 = vld [vmem:[%s10506_s9 + $0x40] sm:$0xff]  ;;  %v4872_v28 = vld [vmem:[%s10506_s9 + $0x48] sm:$0xff] }
 0x352   : > { %v7662_v55 = vpop.eup %7661  ;;  %v10013_v52 = vmul.f32 %v7660_v59, %v10705_v33  ;;  %v7087_v36 = vpack.c.bf16 %v4870_v37, %v4869_v5  ;;  %v7090_v59 = vpack.c.bf16 %v4872_v28, %v4871_v63  ;;  %v4876_v33 = vld [vmem:[%s10506_s9 + $0x68] sm:$0xff]  ;;  %v10711_v63 = vld [vmem:[#allocation38_spill] sm:$0xff] }
 0x353   : > { %v4745_v54 = vadd.f32 %v4744_v25, %v10005_v39  ;;  %v7664_v12 = vpop.eup %7663  ;;  %7673 = vrcp.f32 %v4627_v26  ;;  %v10017_v2 = vmul.f32 %v7662_v55, %v10706_v60  ;;  %v4873_v26 = vld [vmem:[%s10506_s9 + $0x50] sm:$0xff]  ;;  %v4875_v55 = vld [vmem:[%s10506_s9 + $0x60] sm:$0xff]  ;;  %v4878_v60 = vld [vmem:[%s10506_s9 + $0x78] sm:$0xff] }
 0x354   : > { %v7666_v62 = vpop.eup %7665  ;;  %v10021_v29 = vmul.f32 %v7664_v12, %v9931_v24  ;;  %v7093_v25 = vpack.c.bf16 %v4874_v43, %v4873_v26  ;;  %v4877_v12 = vld [vmem:[%s10506_s9 + $0x70] sm:$0xff]  ;;  %v10710_v37 = vld [vmem:[#allocation37_spill] sm:$0xff]  ;;  %v10713_v43 = vld [vmem:[#allocation8_spill] sm:$0xff] }
 0x355   : > { %v4746_v38 = vadd.f32 %v4745_v54, %v10009_v14  ;;  %v7668_v7 = vpop.eup %7667  ;;  %v10025_v46 = vmul.f32 %v7666_v62, %v9943_v15  ;;  %v7096_v54 = vpack.c.bf16 %v4876_v33, %v4875_v55  ;;  %v6250_v62 = vld [vmem:[%s10505_s8] ss:$0 sm:$0xff]  ;;  %v10714_v55 = vld [vmem:[#allocation42_spill] sm:$0xff] }
 0x356   : > { %v10029_v49 = vmul.f32 %v7668_v7, %v9952_v17 }
 0x357   : > { %v4747_v45 = vadd.f32 %v4746_v38, %v10013_v52  ;;  %v7099_v38 = vpack.c.bf16 %v4878_v60, %v4877_v12 }
 0x358   : > { %v7670_v20 = vpop.eup %7669 }
 0x359   : > { %v4748_v30 = vadd.f32 %v4747_v45, %v10017_v2  ;;  %v10033_v1 = vmul.f32 %v7670_v20, %v9962_v11 }
 0x35b   : > { %v4749_v6 = vadd.f32 %v4748_v30, %v10021_v29  ;;  %v7672_v58 = vpop.eup %7671 }
 0x35c   : > { %v10037_v53 = vmul.f32 %v7672_v58, %v9972_v9  ;;  %v10707_v9 = vld [vmem:[#allocation36_spill] sm:$0xff] }
 0x35d   : > { %v4750_v24 = vadd.f32 %v4749_v6, %v10025_v46  ;;  %v7674_v61 = vpop.eup %7673 }
 0x35e   : > { %v10041_v44 = vmul.f32 %v7674_v61, %v9976_v8  ;;  %v4863_v8 = vld [vmem:[%s10506_s9] sm:$0xff] }
 0x35f   : > { %v4751_v15 = vadd.f32 %v4750_v24, %v10029_v49  ;;  %v7078_v41 = vpack.c.bf16 %v4864_v22, %v4863_v8 }
 0x361   : > { %v4752_v17 = vadd.f32 %v4751_v15, %v10033_v1  ;;  %v7411_v15 = vld [vmem:[%s10508_s11] sm:$0xff]  }
 0x363   : > { %v4753_v31 = vadd.f32 %v4752_v17, %v10037_v53  ;;  %v7412_v17 = vld [vmem:[%s10508_s11 + $0x8] sm:$0xff]  }
 0x365   : > { %v4754_v27 = vadd.f32 %v4753_v31, %v10041_v44  ;;  %v7413_v31 = vld [vmem:[%s10508_s11 + $0x10] sm:$0xff]  }
 0x367   : > { %v4755_v10 = vrot.slane %v4754_v27, 4 }
 0x369   : > { %v4756_v11 = vadd.f32 %v4755_v10, %v4754_v27  ;;  %v7414_v27 = vld [vmem:[%s10508_s11 + $0x18] sm:$0xff]   ;;  %v7415_v10 = vld [vmem:[%s10508_s11 + $0x20] sm:$0xff]  }
 0x36b   : > { %v4757_v13 = vrot.slane %v4756_v11, 2 }
 0x36d   : > { %v4758_v21 = vadd.f32 %v4757_v13, %v4756_v11  ;;  %v7416_v11 = vld [vmem:[%s10508_s11 + $0x28] sm:$0xff]   ;;  %v7417_v13 = vld [vmem:[%s10508_s11 + $0x30] sm:$0xff]  }
 0x36f   : > { %v4759_v40 = vrot.slane %v4758_v21, 1 }
 0x371   : > { %v4760_v56 = vadd.f32 %v4759_v40, %v4758_v21  ;;  %v7418_v21 = vld [vmem:[%s10508_s11 + $0x38] sm:$0xff]   ;;  %v5349_v40 = vld [vmem:[%s10511_s14] sm:$0xf] }
 0x373   : > { %v4762_v48 = vmul.f32 0.00390625, %v4760_v56  ;;  %v6252_v56 = vld [vmem:[%s10507_s10] ss:$0 sm:$0xff] }
 0x375   : > { %6918 = vmatmul.mubr.f32.vlgmr.msra.gmra.mrb[32].mxu1 %v4762_v48 }
 0x376   : > { %6952 = vmatprep.mubr.msk.f32.mxu1 %vm7769_vm2, %v10707_v9  ;;  %7079 = vmatpush3.bf16.msra.mxu1 %v7078_v41 }
 0x377   : > { %7080 = vmatprep.subr.bf16.mxu1 %v10708_v47 }
 0x37a   : > { %7082 = vmatpush3.bf16.msra.mxu1 %v7081_v42  ;;  %v4964_v42 = vsub.s32 0, %v4963_v57 }
 0x37b   : > { %7083 = vmatprep.subr.bf16.mxu1 %v10708_v47 }
 0x37e   : > { %7085 = vmatpush3.bf16.msra.mxu1 %v7084_v34  ;;  %v10709_v34 = vld [vmem:[#allocation20_spill] sm:$0xff] }
 0x37f   : > { %7086 = vmatprep.subr.bf16.mxu1 %v10708_v47 }
 0x382   : > { %7088 = vmatpush3.bf16.msra.mxu1 %v7087_v36 }
 0x383   : > { %7089 = vmatprep.subr.bf16.mxu1 %v10708_v47 }
 0x386   : > { %7091 = vmatpush3.bf16.msra.mxu1 %v7090_v59  ;;  %v10712_v59 = vld [vmem:[#allocation25_spill] sm:$0xff] }
 0x387   : > { %7092 = vmatprep.subr.bf16.mxu1 %v10708_v47 }
 0x38a   : > { %7094 = vmatpush3.bf16.msra.mxu1 %v7093_v25 }
 0x38b   : > { %7095 = vmatprep.subr.bf16.mxu1 %v10708_v47 }
 0x38e   : > { %7097 = vmatpush3.bf16.msra.mxu1 %v7096_v54 }
 0x38f   : > { %7098 = vmatprep.subr.bf16.mxu1 %v10708_v47 }
 0x392   : > { %7100 = vmatpush3.bf16.msra.mxu1 %v7099_v38  ;;  %v10715_v38 = vld [vmem:[#allocation29_spill] sm:$0xff] }
 0x393   : > { %6955 = vmatprep.subr.bf16.mxu1 %v7411_v15 }
 0x448   : > { %v4852_v45 = vpop.f32.mrb[32].mxu1 }
 0x449   : > { %v4853_v7 = vadd.f32 %v6250_v62, %v4852_v45  ;;  %v6919_v30 = vpop.f32.mrb[33].mxu1  ;;  %v10716_v45 = vld [vmem:[#allocation40_spill] sm:$0xff] }
 0x44a   : > { %v10717_v30 = vld [vmem:[#allocation30_spill] sm:$0xff] }
 0x44b   : > { %v6251_v20 = vmul.f32 -1.442695, %v4853_v7 }
 0x44d   : > { %7675 = vpow2.f32 %v6251_v20 }
 0x457   : > { %v7676_v6 = vpop.eup %7675 }
 0x458   : > { %v4859_v58 = vadd.f32 1.0, %v7676_v6  ;;  %v10718_v6 = vld [vmem:[#allocation31_spill] sm:$0xff] }
 0x45a   : > { %7677 = vrcp.f32 %v4859_v58 }
 0x464   : > { %v7678_v24 = vpop.eup %7677 }
 0x465   : > { %v4862_v61 = vmul.f32 %v7678_v24, %v4853_v7 }
 0x467   : > { %6953 = vmatmul.mubr.f32.vlgmr.msra.gmra.mrb[34].mxu1 %v4862_v61 }
 0x468   : > { %6956 = vmatpush3.bf16.msra.mxu1 %v7411_v15  ;;  %v10719_v15 = vld [vmem:[#allocation32_spill] sm:$0xff] }
 0x469   : > { %6957 = vmatprep.subr.bf16.mxu1 %v7412_v17 }
 0x46c   : > { %6958 = vmatpush3.bf16.msra.mxu1 %v7412_v17 }
 0x46d   : > { %6959 = vmatprep.subr.bf16.mxu1 %v7413_v31 }
 0x470   : > { %6960 = vmatpush3.bf16.msra.mxu1 %v7413_v31  ;;  %v10720_v31 = vld [vmem:[#allocation23_spill] sm:$0xff] }
 0x471   : > { %6961 = vmatprep.subr.bf16.mxu1 %v7414_v27 }
 0x474   : > { %6962 = vmatpush3.bf16.msra.mxu1 %v7414_v27 }
 0x475   : > { %6963 = vmatprep.subr.bf16.mxu1 %v7415_v10 }
 0x478   : > { %6964 = vmatpush3.bf16.msra.mxu1 %v7415_v10  ;;  %v10721_v10 = vld [vmem:[#allocation14_spill] sm:$0xff] }
 0x479   : > { %6965 = vmatprep.subr.bf16.mxu1 %v7416_v11 }
 0x47c   : > { %6966 = vmatpush3.bf16.msra.mxu1 %v7416_v11 }
 0x47d   : > { %6967 = vmatprep.subr.bf16.mxu1 %v7417_v13 }
 0x480   : > { %6968 = vmatpush3.bf16.msra.mxu1 %v7417_v13  ;;  %v10722_v13 = vld [vmem:[#allocation24_spill] sm:$0xff] }
 0x481   : > { %6969 = vmatprep.subr.bf16.mxu1 %v7418_v21 }
 0x484   : > { %6970 = vmatpush3.bf16.msra.mxu1 %v7418_v21 }
 0x485   : > { %7003 = vmatprep.subr.msk.mxu1 %vm5446_vm3, %v5349_v40 }
 0x53a   : > { %v4952_v48 = vpop.f32.mrb[34].mxu1 }
 0x53b   : > { %v4953_v9 = vadd.f32 %v6252_v56, %v4952_v48  ;;  %v6954_v8 = vpop.f32.mrb[35].mxu1 }
 0x53d   : > { %v6253_v22 = vmul.f32 -1.442695, %v4953_v9 }
 0x53f   : > { %7679 = vpow2.f32 %v6253_v22 }
 0x549   : > { %v7680_v41 = vpop.eup %7679 }
 0x54a   : > { %v4959_v47 = vadd.f32 1.0, %v7680_v41 }
 0x54c   : > { %7681 = vrcp.f32 %v4959_v47 }
 0x556   : > { %v7682_v23 = vpop.eup %7681 }
 0x557   : > { %v10137_v51 = vrot.slane %v7682_v23, %v4964_v42 }
 0x559   : > { %v4966_v5 = vmul.f32 %v10137_v51, %v10709_v34  ;;  %v4967_v36 = vmul.f32 %v10137_v51, %v10710_v37  ;;  %v4968_v28 = vmul.f32 %v10137_v51, %v10711_v63  ;;  %v4969_v26 = vmul.f32 %v10137_v51, %v10712_v59  ;;  %v6267_v63 = vld [vmem:[%s7924_s25 + $0x39] sm:$0xff] }
 0x55a   : > { %v4970_v25 = vmul.f32 %v10137_v51, %v10713_v43  ;;  %v4971_v33 = vmul.f32 %v10137_v51, %v10714_v55  ;;  %v4972_v62 = vmul.f32 %v10137_v51, %v10715_v38  ;;  %v4973_v7 = vmul.f32 %v10137_v51, %v10716_v45  ;;  %v6272_v59 = vld [vmem:[%s7924_s25 + $0x79] sm:$0xff]  ;;  %v6274_v43 = vld [vmem:[%s7924_s25 + $0x91] sm:$0xff]  ;;  %v6276_v55 = vld [vmem:[%s7924_s25 + $0xa9] sm:$0xff] }
 0x55b   : > { %v4998_v54 = vpack.c.bf16 %v4967_v36, %v4966_v5  ;;  %v4999_v12 = vpack.c.bf16 %v4969_v26, %v4968_v28  ;;  %v4974_v20 = vmul.f32 %v10137_v51, %v10717_v30  ;;  %v4975_v58 = vmul.f32 %v10137_v51, %v10718_v6  ;;  %v6266_v36 = vld [vmem:[%s7924_s25 + $0x31] sm:$0xff]  ;;  %v6271_v28 = vld [vmem:[%s7924_s25 + $0x69] sm:$0xff]  ;;  %v6273_v26 = vld [vmem:[%s7924_s25 + $0x81] sm:$0xff] }
 0x55c   : > { %v5000_v60 = vpack.c.bf16 %v4971_v33, %v4970_v25  ;;  %v5001_v24 = vpack.c.bf16 %v4973_v7, %v4972_v62  ;;  %v4976_v17 = vmul.f32 %v10137_v51, %v10719_v15  ;;  %v4977_v27 = vmul.f32 %v10137_v51, %v10720_v31  ;;  %v6275_v25 = vld [vmem:[%s7924_s25 + $0x99] sm:$0xff]  ;;  %v6277_v33 = vld [vmem:[%s7924_s25 + $0xb1] sm:$0xff]  ;;  %v6281_v38 = vld [vmem:[%s7924_s25 + $0xe1] sm:$0xff] }
 0x55d   : > { %6971 = vmatprep.mubr.bf16.mxu1 %v4998_v54  ;;  %v5002_v61 = vpack.c.bf16 %v4975_v58, %v4974_v20  ;;  %v4978_v11 = vmul.f32 %v10137_v51, %v10721_v10  ;;  %v4979_v21 = vmul.f32 %v10137_v51, %v10722_v13  ;;  %v4980_v48 = vmul.f32 %v10137_v51, %v9949_v35  ;;  %v6278_v54 = vld [vmem:[%s7924_s25 + $0xc1] sm:$0xff]  ;;  %v6282_v62 = vld [vmem:[%s7924_s25 + $0xf1] sm:$0xff]  ;;  %v6283_v45 = vld [vmem:[%s7924_s25 + $0xf9] sm:$0xff] }
 0x55e   : > { %6972 = vmatmul.mubr.bf16.vlgmr.msra.gmra.mrb[36].mxu1 %v4999_v12  ;;  %v4981_v9 = vmul.f32 %v10137_v51, %v9966_v0  ;;  %v4982_v8 = vmul.f32 %v10137_v51, %v9982_v32  ;;  %v4983_v22 = vmul.f32 %v10137_v51, %v9985_v16  ;;  %v4984_v50 = vmul.f32 %v10137_v51, %v9989_v18  ;;  %v6279_v12 = vld [vmem:[%s7924_s25 + $0xc9] sm:$0xff]  ;;  %v6285_v30 = vld [vmem:[%s7924_s25 + $0x111] sm:$0xff]  ;;  %v6286_v20 = vld [vmem:[%s7924_s25 + $0x121] sm:$0xff] }
 0x55f   : > { %7004 = vmatpush3.msk.msra.mxu1 %vm5446_vm3, %v5349_v40  ;;  %6975 = vmatprep.mubr.bf16.mxu1 %v5000_v60  ;;  %v5003_v40 = vpack.c.bf16 %v4977_v27, %v4976_v17  ;;  %v5004_v56 = vpack.c.bf16 %v4979_v21, %v4978_v11  ;;  %v4985_v57 = vmul.f32 %v10137_v51, %v9993_v3  ;;  %v6280_v60 = vld [vmem:[%s7924_s25 + $0xd9] sm:$0xff]  ;;  %v6284_v7 = vld [vmem:[%s7924_s25 + $0x109] sm:$0xff]  ;;  %v6293_v31 = vld [vmem:[%s7924_s25 + $0x171] sm:$0xff] }
 0x560   : > { %v5005_v41 = vpack.c.bf16 %v4981_v9, %v4980_v48  ;;  %v5006_v47 = vpack.c.bf16 %v4983_v22, %v4982_v8  ;;  %v4986_v35 = vmul.f32 %v10137_v51, %v9997_v19  ;;  %v4987_v0 = vmul.f32 %v10137_v51, %v10001_v4  ;;  %v6287_v6 = vld [vmem:[%s7924_s25 + $0x129] sm:$0xff]  ;;  %v6288_v58 = vld [vmem:[%s7924_s25 + $0x139] sm:$0xff]  ;;  %v6294_v27 = vld [vmem:[%s7924_s25 + $0x181] sm:$0xff] }
 0x561   : > { %v5007_v32 = vpack.c.bf16 %v4985_v57, %v4984_v50  ;;  %v4988_v16 = vmul.f32 %v10137_v51, %v10005_v39  ;;  %v4989_v23 = vmul.f32 %v10137_v51, %v10009_v14  ;;  %v4990_v18 = vmul.f32 %v10137_v51, %v10013_v52  ;;  %v6291_v15 = vld [vmem:[%s7924_s25 + $0x159] sm:$0xff]  ;;  %v6292_v17 = vld [vmem:[%s7924_s25 + $0x169] sm:$0xff] }
 0x562   : > { %v5008_v42 = vpack.c.bf16 %v4987_v0, %v4986_v35  ;;  %v4991_v3 = vmul.f32 %v10137_v51, %v10017_v2  ;;  %v4992_v4 = vmul.f32 %v10137_v51, %v10021_v29  ;;  %v4993_v39 = vmul.f32 %v10137_v51, %v10025_v46  ;;  %v6295_v10 = vld [vmem:[%s7924_s25 + $0x189] sm:$0xff] }
 0x563   : > { %v5009_v19 = vpack.c.bf16 %v4989_v23, %v4988_v16  ;;  %v4994_v14 = vmul.f32 %v10137_v51, %v10029_v49  ;;  %v4995_v52 = vmul.f32 %v10137_v51, %v10033_v1  ;;  %v4996_v29 = vmul.f32 %v10137_v51, %v10037_v53  ;;  %v6264_v49 = vld [vmem:[%s7924_s25 + $0x19] sm:$0xff]  ;;  %v6265_v1 = vld [vmem:[%s7924_s25 + $0x21] sm:$0xff]  ;;  %v6268_v53 = vld [vmem:[%s7924_s25 + $0x49] sm:$0xff] }
 0x564   : > { %v5010_v34 = vpack.c.bf16 %v4991_v3, %v4990_v18  ;;  %v5011_v2 = vpack.c.bf16 %v4993_v39, %v4992_v4  ;;  %v4997_v46 = vmul.f32 %v10137_v51, %v10041_v44  ;;  %v6269_v44 = vld [vmem:[%s7924_s25 + $0x51] sm:$0xff]  ;;  %v6270_v51 = vld [vmem:[%s7924_s25 + $0x61] sm:$0xff] }
 0x565   : > { %v5012_v5 = vpack.c.bf16 %v4995_v52, %v4994_v14 }
 0x566   : > { %6976 = vmatmul.mubr.bf16.gmra.mrb[40].mxu1 %v5001_v24  ;;  %v5013_v37 = vpack.c.bf16 %v4997_v46, %v4996_v29  ;;  %v6289_v24 = vld [vmem:[%s7924_s25 + $0x141] sm:$0xff]  ;;  %v10309_v29 = vld [vmem:[%s10509_s12] ss:$0 sm:$0xff] }
 0x567   : > { %6979 = vmatprep.mubr.bf16.mxu1 %v5002_v61  ;;  %v6290_v61 = vld [vmem:[%s7924_s25 + $0x151] sm:$0xff]  ;;  %s7707_s25 = sshll.u32 %s7770_s23, 4  ;;  %s7708_s25 = int_to_ptr.vmem [resolvable:$false] %s7707_s25 }
 0x568   : > { %s7709_s0 = scalar_lea.vmem %s7708_s25, 8192  ;;  %p7710_p0 = scmp.lt.s32.totalorder %s10450_s27, %s7708_s25 }
 0x569   : > { %p7711_p1 = scmp.lt.s32.totalorder %s7709_s0, %s7703_s17 }
 0x56b   : > { %p7712_p2 = por %p7711_p1, %p7710_p0 }
 0x56d   : > { %p7713_p3 = pnand %p7712_p2, %p7706_p13 }
 0x56e   : > { %6980 = vmatmul.mubr.bf16.gmra.mrb[44].mxu1 %v5003_v40 }
 0x56f   : > { %6983 = vmatprep.mubr.bf16.mxu1 %v5004_v56 }
 0x576   : > { %6984 = vmatmul.mubr.bf16.gmra.mrb[48].mxu1 %v5005_v41 }
 0x577   : > { %6987 = vmatprep.mubr.bf16.mxu1 %v5006_v47 }
 0x57e   : > { %6988 = vmatmul.mubr.bf16.gmra.mrb[52].mxu1 %v5007_v32 }
 0x57f   : > { %6991 = vmatprep.mubr.bf16.mxu1 %v5008_v42 }
 0x586   : > { %6992 = vmatmul.mubr.bf16.gmra.mrb[56].mxu1 %v5009_v19 }
 0x587   : > { %6995 = vmatprep.mubr.bf16.mxu1 %v5010_v34 }
 0x58e   : > { %6996 = vmatmul.mubr.bf16.gmra.mrb[60].mxu1 %v5011_v2 }
 0x58f   : > { %6999 = vmatprep.mubr.bf16.mxu1 %v5012_v5 }
 0x596   : > { %7000 = vmatmul.mubr.bf16.gmra.mrb[64].mxu1 %v5013_v37 }
 0x597   : > { %7005 = vmatprep.mubr.msk.f32.mxu1 %vm593_vm1, %v6264_v49 }
 0x59e   : > { %7006 = vmatmul.mubr.msk.f32.vlgmr.msra.gmra.mrb[68].mxu1 %vm593_vm1, %v6265_v1 }
 0x59f   : > { %7008 = vmatprep.mubr.msk.f32.mxu1 %vm593_vm1, %v6266_v36 }
 0x5a2   : > { %7009 = vmatmul.mubr.msk.f32.gmra.mrb[70].mxu1 %vm593_vm1, %v6267_v63  ;;  %v10325_v63 = vld [vmem:[%s10510_s13] ss:$0 sm:$0xff] }
 0x5a3   : > { %7011 = vmatprep.mubr.msk.f32.mxu1 %vm593_vm1, %v6268_v53 }
 0x5a6   : > { %7012 = vmatmul.mubr.msk.f32.gmra.mrb[72].mxu1 %vm593_vm1, %v6269_v44 }
 0x5a7   : > { %7014 = vmatprep.mubr.msk.f32.mxu1 %vm593_vm1, %v6270_v51 }
 0x5aa   : > { %7015 = vmatmul.mubr.msk.f32.gmra.mrb[74].mxu1 %vm593_vm1, %v6271_v28 }
 0x5ab   : > { %7017 = vmatprep.mubr.msk.f32.mxu1 %vm593_vm1, %v6272_v59 }
 0x5ae   : > { %7018 = vmatmul.mubr.msk.f32.gmra.mrb[76].mxu1 %vm593_vm1, %v6273_v26 }
 0x5af   : > { %7020 = vmatprep.mubr.msk.f32.mxu1 %vm593_vm1, %v6274_v43 }
 0x5b2   : > { %7021 = vmatmul.mubr.msk.f32.gmra.mrb[78].mxu1 %vm593_vm1, %v6275_v25 }
 0x5b3   : > { %7023 = vmatprep.mubr.msk.f32.mxu1 %vm593_vm1, %v6276_v55 }
 0x5b6   : > { %7024 = vmatmul.mubr.msk.f32.gmra.mrb[80].mxu1 %vm593_vm1, %v6277_v33 }
 0x5b7   : > { %7026 = vmatprep.mubr.msk.f32.mxu1 %vm593_vm1, %v6278_v54 }
 0x5ba   : > { %7027 = vmatmul.mubr.msk.f32.gmra.mrb[82].mxu1 %vm593_vm1, %v6279_v12 }
 0x5bb   : > { %7029 = vmatprep.mubr.msk.f32.mxu1 %vm593_vm1, %v6280_v60 }
 0x5be   : > { %7030 = vmatmul.mubr.msk.f32.gmra.mrb[84].mxu1 %vm593_vm1, %v6281_v38 }
 0x5bf   : > { %7032 = vmatprep.mubr.msk.f32.mxu1 %vm593_vm1, %v6282_v62 }
 0x5c2   : > { %7033 = vmatmul.mubr.msk.f32.gmra.mrb[86].mxu1 %vm593_vm1, %v6283_v45 }
 0x5c3   : > { %7035 = vmatprep.mubr.msk.f32.mxu1 %vm593_vm1, %v6284_v7 }
 0x5c6   : > { %7036 = vmatmul.mubr.msk.f32.gmra.mrb[88].mxu1 %vm593_vm1, %v6285_v30 }
 0x5c7   : > { %7038 = vmatprep.mubr.msk.f32.mxu1 %vm593_vm1, %v6286_v20 }
 0x5ca   : > { %7039 = vmatmul.mubr.msk.f32.gmra.mrb[90].mxu1 %vm593_vm1, %v6287_v6 }
 0x5cb   : > { %7041 = vmatprep.mubr.msk.f32.mxu1 %vm593_vm1, %v6288_v58 }
 0x5ce   : > { %7042 = vmatmul.mubr.msk.f32.gmra.mrb[92].mxu1 %vm593_vm1, %v6289_v24 }
 0x5cf   : > { %7044 = vmatprep.mubr.msk.f32.mxu1 %vm593_vm1, %v6290_v61 }
 0x5d2   : > { %7045 = vmatmul.mubr.msk.f32.gmra.mrb[94].mxu1 %vm593_vm1, %v6291_v15 }
 0x5d3   : > { %7047 = vmatprep.mubr.msk.f32.mxu1 %vm593_vm1, %v6292_v17 }
 0x5d6   : > { %7048 = vmatmul.mubr.msk.f32.gmra.mrb[96].mxu1 %vm593_vm1, %v6293_v31 }
 0x5d7   : > { %7050 = vmatprep.mubr.msk.f32.mxu1 %vm593_vm1, %v6294_v27 }
 0x5da   : > { %7051 = vmatmul.mubr.msk.f32.gmra.mrb[98].mxu1 %vm593_vm1, %v6295_v10 }
 0x631   : > { %v6973_v11 = vpop.f32.mrb[36].mxu1 }
 0x632   : > { %v5112_v13 = vpop.f32.mrb[37].mxu1  ;;  %v5248_v51 = vmul.f32 %v6973_v11, %v10309_v29 }
 0x633   : > { %v6974_v21 = vpop.f32.mrb[38].mxu1  ;;  %v5246_v36 = vmul.f32 %v10309_v29, %v5112_v13 }
 0x634   : > { %v5115_v40 = vpop.f32.mrb[39].mxu1  ;;  %v5249_v53 = vmul.f32 %v6974_v21, %v10309_v29  ;;  %v5287_v60 = vadd.f32 %v10325_v63, %v5248_v51 }
 0x635   : > { %v5247_v49 = vmul.f32 %v10309_v29, %v5115_v40  ;;  %v5285_v59 = vadd.f32 %v10325_v63, %v5246_v36 }
 0x636   : > { %v5288_v33 = vadd.f32 %v10325_v63, %v5249_v53 }
 0x637   : > { %v5286_v44 = vadd.f32 %v10325_v63, %v5247_v49 }
 0x639   : > { %v6977_v56 = vpop.f32.mrb[40].mxu1 }
 0x63a   : > { %v5128_v48 = vpop.f32.mrb[41].mxu1  ;;  %v5252_v20 = vmul.f32 %v6977_v56, %v10309_v29 }
 0x63b   : > { %v6978_v9 = vpop.f32.mrb[42].mxu1  ;;  %v5250_v54 = vmul.f32 %v10309_v29, %v5128_v48 }
 0x63c   : > { %v5131_v8 = vpop.f32.mrb[43].mxu1  ;;  %v5253_v7 = vmul.f32 %v6978_v9, %v10309_v29  ;;  %v5291_v11 = vadd.f32 %v10325_v63, %v5252_v20 }
 0x63d   : > { %v5251_v55 = vmul.f32 %v10309_v29, %v5131_v8  ;;  %v5289_v58 = vadd.f32 %v10325_v63, %v5250_v54 }
 0x63e   : > { %v5292_v31 = vadd.f32 %v10325_v63, %v5253_v7 }
 0x63f   : > { %v5290_v30 = vadd.f32 %v10325_v63, %v5251_v55 }
 0x641   : > { %v10268_v22 = vpop.f32.mrb[44].mxu1 }
 0x642   : > { %v5144_v41 = vpop.f32.mrb[45].mxu1  ;;  %v5256_v9 = vmul.f32 %v10268_v22, %v10309_v29 }
 0x643   : > { %v10270_v47 = vpop.f32.mrb[46].mxu1  ;;  %v5254_v27 = vmul.f32 %v10309_v29, %v5144_v41 }
 0x644   : > { %v5147_v50 = vpop.f32.mrb[47].mxu1  ;;  %v5257_v56 = vmul.f32 %v10270_v47, %v10309_v29  ;;  %v5295_v51 = vadd.f32 %v10325_v63, %v5256_v9 }
 0x645   : > { %v5255_v17 = vmul.f32 %v10309_v29, %v5147_v50  ;;  %v5293_v41 = vadd.f32 %v10325_v63, %v5254_v27 }
 0x646   : > { %v5296_v47 = vadd.f32 %v10325_v63, %v5257_v56 }
 0x647   : > { %v5294_v48 = vadd.f32 %v10325_v63, %v5255_v17 }
 0x649   : > { %v10272_v57 = vpop.f32.mrb[48].mxu1 }
 0x64a   : > { %v10274_v35 = vpop.f32.mrb[49].mxu1 }
 0x64b   : > { %v10276_v0 = vpop.f32.mrb[50].mxu1 }
 0x64c   : > { %v10278_v32 = vpop.f32.mrb[51].mxu1 }
 0x64d   : > { %v5259_v53 = vmul.f32 %v10309_v29, %v10278_v32 }
 0x64f   : > { %v5298_v32 = vadd.f32 %v10325_v63, %v5259_v53 }
 0x651   : > { %v10280_v42 = vpop.f32.mrb[52].mxu1 }
 0x652   : > { %v10282_v16 = vpop.f32.mrb[53].mxu1 }
 0x653   : > { %v10284_v23 = vpop.f32.mrb[54].mxu1 }
 0x654   : > { %v10286_v18 = vpop.f32.mrb[55].mxu1  ;;  %v5265_v20 = vmul.f32 %v10284_v23, %v10309_v29 }
 0x656   : > { %v5304_v23 = vadd.f32 %v10325_v63, %v5265_v20 }
 0x659   : > { %v10288_v3 = vpop.f32.mrb[56].mxu1 }
 0x65a   : > { %v10290_v19 = vpop.f32.mrb[57].mxu1 }
 0x65b   : > { %v10292_v34 = vpop.f32.mrb[58].mxu1 }
 0x65c   : > { %v10294_v4 = vpop.f32.mrb[59].mxu1 }
 0x65d   : > { %v5267_v17 = vmul.f32 %v10309_v29, %v10294_v4 }
 0x65f   : > { %v5306_v4 = vadd.f32 %v10325_v63, %v5267_v17 }
 0x661   : > { %v10296_v39 = vpop.f32.mrb[60].mxu1 }
 0x662   : > { %v10298_v14 = vpop.f32.mrb[61].mxu1 }
 0x663   : > { %v10300_v52 = vpop.f32.mrb[62].mxu1 }
 0x664   : > { %v10302_v2 = vpop.f32.mrb[63].mxu1 }
 0x669   : > { %v10304_v5 = vpop.f32.mrb[64].mxu1 }
 0x66a   : > { %v10311_v46 = vpop.f32.mrb[65].mxu1 }
 0x66b   : > { %v10313_v37 = vpop.f32.mrb[66].mxu1 }
 0x66c   : > { %v10317_v1 = vpop.f32.mrb[67].mxu1 }
 0x671   : > { %v7007_v28 = vpop.f32.mrb[68].mxu1 }
 0x672   : > { %v5676_v26 = vadd.f32 %v7007_v28, %v5286_v44  ;;  %v5516_v43 = vpop.f32.mrb[69].mxu1  ;;  %v5258_v44 = vmul.f32 %v10309_v29, %v10274_v35 }
 0x673   : > { %v5675_v25 = vadd.f32 %v5516_v43, %v5285_v59  ;;  %v5261_v43 = vmul.f32 %v10276_v0, %v10309_v29 }
 0x674   : > { %5708 = vst [vmem:[%s10332_s20 + $0x8] sm:$0xff] %v5676_v26  ;;  %v5297_v55 = vadd.f32 %v10325_v63, %v5258_v44  ;;  %v5273_v44 = vmul.f32 %v10300_v52, %v10309_v29 }
 0x675   : > { %5707 = vst [vmem:[%s10332_s20] sm:$0xff] %v5675_v25  ;;  %v7010_v12 = vpop.f32.mrb[70].mxu1  ;;  %v5260_v25 = vmul.f32 %v10272_v57, %v10309_v29  ;;  %v5300_v0 = vadd.f32 %v10325_v63, %v5261_v43  ;;  %v5275_v43 = vmul.f32 %v10309_v29, %v10317_v1  ;;  %v5277_v1 = vmul.f32 %v10313_v37, %v10309_v29 }
 0x676   : > { %v5678_v38 = vadd.f32 %v7010_v12, %v5288_v33  ;;  %v5526_v62 = vpop.f32.mrb[71].mxu1  ;;  %v5312_v52 = vadd.f32 %v10325_v63, %v5273_v44 }
 0x677   : > { %v5677_v45 = vadd.f32 %v5526_v62, %v5287_v60  ;;  %v5263_v60 = vmul.f32 %v10309_v29, %v10286_v18  ;;  %v5299_v62 = vadd.f32 %v10325_v63, %v5260_v25  ;;  %v5316_v37 = vadd.f32 %v10325_v63, %v5277_v1 }
 0x678   : > { %5710 = vst [vmem:[%s10332_s20 + $0x18] sm:$0xff] %v5678_v38  ;;  %v5262_v38 = vmul.f32 %v10309_v29, %v10282_v16 }
 0x679   : > { %5709 = vst [vmem:[%s10332_s20 + $0x10] sm:$0xff] %v5677_v45  ;;  %v7013_v6 = vpop.f32.mrb[72].mxu1  ;;  %v5302_v18 = vadd.f32 %v10325_v63, %v5263_v60 }
 0x67a   : > { %v5680_v24 = vadd.f32 %v7013_v6, %v5290_v30  ;;  %v5536_v61 = vpop.f32.mrb[73].mxu1  ;;  %v5264_v6 = vmul.f32 %v10280_v42, %v10309_v29 }
 0x67b   : > { %v5679_v15 = vadd.f32 %v5536_v61, %v5289_v58  ;;  %v5301_v58 = vadd.f32 %v10325_v63, %v5262_v38 }
 0x67c   : > { %5712 = vst [vmem:[%s10332_s20 + $0x28] sm:$0xff] %v5680_v24  ;;  %v5303_v27 = vadd.f32 %v10325_v63, %v5264_v6 }
 0x67d   : > { %5711 = vst [vmem:[%s10332_s20 + $0x20] sm:$0xff] %v5679_v15  ;;  %v7016_v10 = vpop.f32.mrb[74].mxu1 }
 0x67e   : > { %v5682_v13 = vadd.f32 %v7016_v10, %v5292_v31  ;;  %v5546_v21 = vpop.f32.mrb[75].mxu1  ;;  %v5266_v31 = vmul.f32 %v10309_v29, %v10290_v19 }
 0x67f   : > { %v5681_v40 = vadd.f32 %v5546_v21, %v5291_v11  ;;  %v5269_v21 = vmul.f32 %v10292_v34, %v10309_v29 }
 0x680   : > { %5714 = vst [vmem:[%s10332_s20 + $0x38] sm:$0xff] %v5682_v13  ;;  %v5305_v56 = vadd.f32 %v10325_v63, %v5266_v31 }
 0x681   : > { %5713 = vst [vmem:[%s10332_s20 + $0x30] sm:$0xff] %v5681_v40  ;;  %v7019_v8 = vpop.f32.mrb[76].mxu1  ;;  %v5268_v40 = vmul.f32 %v10288_v3, %v10309_v29  ;;  %v5308_v34 = vadd.f32 %v10325_v63, %v5269_v21 }
 0x682   : > { %v5684_v50 = vadd.f32 %v7019_v8, %v5294_v48  ;;  %v5556_v49 = vpop.f32.mrb[77].mxu1 }
 0x683   : > { %v5683_v36 = vadd.f32 %v5556_v49, %v5293_v41  ;;  %v5271_v41 = vmul.f32 %v10309_v29, %v10302_v2  ;;  %v5307_v49 = vadd.f32 %v10325_v63, %v5268_v40 }
 0x684   : > { %5716 = vst [vmem:[%s10332_s20 + $0x48] sm:$0xff] %v5684_v50  ;;  %v5270_v50 = vmul.f32 %v10309_v29, %v10298_v14 }
 0x685   : > { %5715 = vst [vmem:[%s10332_s20 + $0x40] sm:$0xff] %v5683_v36  ;;  %v7022_v22 = vpop.f32.mrb[78].mxu1  ;;  %v5310_v2 = vadd.f32 %v10325_v63, %v5271_v41 }
 0x686   : > { %v5686_v28 = vadd.f32 %v7022_v22, %v5296_v47  ;;  %v5566_v59 = vpop.f32.mrb[79].mxu1  ;;  %v5272_v22 = vmul.f32 %v10296_v39, %v10309_v29 }
 0x687   : > { %v5685_v26 = vadd.f32 %v5566_v59, %v5295_v51  ;;  %v5309_v51 = vadd.f32 %v10325_v63, %v5270_v50 }
 0x688   : > { %5718 = vst [vmem:[%s10332_s20 + $0x58] sm:$0xff] %v5686_v28  ;;  %v5311_v25 = vadd.f32 %v10325_v63, %v5272_v22 }
 0x689   : > { %5717 = vst [vmem:[%s10332_s20 + $0x50] sm:$0xff] %v5685_v26  ;;  %v7025_v35 = vpop.f32.mrb[80].mxu1 }
 0x68a   : > { %v5688_v33 = vadd.f32 %v7025_v35, %v5298_v32  ;;  %v5576_v54 = vpop.f32.mrb[81].mxu1  ;;  %v5274_v32 = vmul.f32 %v10309_v29, %v10311_v46  ;;  %v5276_v46 = vmul.f32 %v10304_v5, %v10309_v29 }
 0x68b   : > { %v5687_v12 = vadd.f32 %v5576_v54, %v5297_v55  ;;  %v5314_v54 = vadd.f32 %v10325_v63, %v5275_v43 }
 0x68c   : > { %5720 = vst [vmem:[%s10332_s20 + $0x68] sm:$0xff] %v5688_v33  ;;  %v5313_v60 = vadd.f32 %v10325_v63, %v5274_v32  ;;  %v5315_v5 = vadd.f32 %v10325_v63, %v5276_v46 }
 0x68d   : > { %5719 = vst [vmem:[%s10332_s20 + $0x60] sm:$0xff] %v5687_v12  ;;  %v7028_v57 = vpop.f32.mrb[82].mxu1 }
 0x68e   : > { %v5690_v45 = vadd.f32 %v7028_v57, %v5300_v0  ;;  %v5586_v7 = vpop.f32.mrb[83].mxu1 }
 0x68f   : > { %v5689_v30 = vadd.f32 %v5586_v7, %v5299_v62 }
 0x690   : > { %5722 = vst [vmem:[%s10332_s20 + $0x78] sm:$0xff] %v5690_v45 }
 0x691   : > { %5721 = vst [vmem:[%s10332_s20 + $0x70] sm:$0xff] %v5689_v30  ;;  %v7031_v16 = vpop.f32.mrb[84].mxu1 }
 0x692   : > { %v5692_v24 = vadd.f32 %v7031_v16, %v5302_v18  ;;  %v5596_v61 = vpop.f32.mrb[85].mxu1 }
 0x693   : > { %v5691_v15 = vadd.f32 %v5596_v61, %v5301_v58 }
 0x694   : > { %5724 = vst [vmem:[%s10332_s20 + $0x88] sm:$0xff] %v5692_v24 }
 0x695   : > { %5723 = vst [vmem:[%s10332_s20 + $0x80] sm:$0xff] %v5691_v15  ;;  %v7034_v42 = vpop.f32.mrb[86].mxu1 }
 0x696   : > { %v5694_v10 = vadd.f32 %v7034_v42, %v5304_v23  ;;  %v5606_v11 = vpop.f32.mrb[87].mxu1 }
 0x697   : > { %v5693_v13 = vadd.f32 %v5606_v11, %v5303_v27 }
 0x698   : > { %5726 = vst [vmem:[%s10332_s20 + $0x98] sm:$0xff] %v5694_v10 }
 0x699   : > { %5725 = vst [vmem:[%s10332_s20 + $0x90] sm:$0xff] %v5693_v13  ;;  %v7037_v19 = vpop.f32.mrb[88].mxu1 }
 0x69a   : > { %v5696_v48 = vadd.f32 %v7037_v19, %v5306_v4  ;;  %v5616_v9 = vpop.f32.mrb[89].mxu1 }
 0x69b   : > { %v5695_v8 = vadd.f32 %v5616_v9, %v5305_v56 }
 0x69c   : > { %5728 = vst [vmem:[%s10332_s20 + $0xa8] sm:$0xff] %v5696_v48 }
 0x69d   : > { %5727 = vst [vmem:[%s10332_s20 + $0xa0] sm:$0xff] %v5695_v8  ;;  %v7040_v3 = vpop.f32.mrb[90].mxu1 }
 0x69e   : > { %v5698_v36 = vadd.f32 %v7040_v3, %v5308_v34  ;;  %v5626_v53 = vpop.f32.mrb[91].mxu1 }
 0x69f   : > { %v5697_v47 = vadd.f32 %v5626_v53, %v5307_v49 }
 0x6a0   : > { %5730 = vst [vmem:[%s10332_s20 + $0xb8] sm:$0xff] %v5698_v36 }
 0x6a1   : > { %5729 = vst [vmem:[%s10332_s20 + $0xb0] sm:$0xff] %v5697_v47  ;;  %v7043_v14 = vpop.f32.mrb[92].mxu1 }
 0x6a2   : > { %v5700_v28 = vadd.f32 %v7043_v14, %v5310_v2  ;;  %v5636_v59 = vpop.f32.mrb[93].mxu1 }
 0x6a3   : > { %v5699_v26 = vadd.f32 %v5636_v59, %v5309_v51 }
 0x6a4   : > { %5732 = vst [vmem:[%s10332_s20 + $0xc8] sm:$0xff] %v5700_v28 }
 0x6a5   : > { %5731 = vst [vmem:[%s10332_s20 + $0xc0] sm:$0xff] %v5699_v26  ;;  %v7046_v39 = vpop.f32.mrb[94].mxu1 }
 0x6a6   : > { %v5702_v35 = vadd.f32 %v7046_v39, %v5312_v52  ;;  %v5646_v55 = vpop.f32.mrb[95].mxu1 }
 0x6a7   : > { %v5701_v33 = vadd.f32 %v5646_v55, %v5311_v25 }
 0x6a8   : > { %5734 = vst [vmem:[%s10332_s20 + $0xd8] sm:$0xff] %v5702_v35 }
 0x6a9   : > { %5733 = vst [vmem:[%s10332_s20 + $0xd0] sm:$0xff] %v5701_v33  ;;  %v7049_v12 = vpop.f32.mrb[96].mxu1 }
 0x6aa   : > { %v5704_v0 = vadd.f32 %v7049_v12, %v5314_v54  ;;  %v5656_v38 = vpop.f32.mrb[97].mxu1 }
 0x6ab   : > { %v5703_v57 = vadd.f32 %v5656_v38, %v5313_v60 }
 0x6ac   : > { %5736 = vst [vmem:[%s10332_s20 + $0xe8] sm:$0xff] %v5704_v0 }
 0x6ad   : > { %5735 = vst [vmem:[%s10332_s20 + $0xe0] sm:$0xff] %v5703_v57  ;;  %v7052_v62 = vpop.f32.mrb[98].mxu1 }
 0x6ae   : > { %v5706_v29 = vadd.f32 %v7052_v62, %v5316_v37  ;;  %v5666_v45 = vpop.f32.mrb[99].mxu1 }
 0x6af   : > { %v5705_v7 = vadd.f32 %v5666_v45, %v5315_v5 }
 0x6b0   : > { %5738 = vst [vmem:[%s10332_s20 + $0xf8] sm:$0xff] %v5706_v29 }
 0x6b1   : > { %5737 = vst [vmem:[%s10332_s20 + $0xf0] sm:$0xff] %v5705_v7 }
 0x6b2   : > { %7716 = shalt.err (!%p7713_p3)
}
 0x6b3   : > { %s7717_s30 = scalar_lea.hbm %s10448_s16, 4096  ;;  %s7721_s23 = scalar_lea.hbm %s10512_s15, 8192 }
 0x6b4   : > { %p7718_p4 = scmp.ne.s32.totalorder %s10448_s16, %s7717_s30  ;;  %p7722_p9 = scmp.lt.u32.totalorder %s10448_s16, %s10512_s15 }
 0x6b5   : > { %p7723_p10 = scmp.lt.u32.totalorder %s7721_s23, %s7717_s30  ;;  %p7725_p12 = scmp.lt.u32.totalorder %s7717_s30, %s10448_s16 }
 0x6b6   : > { %p7719_p7 = pnand %p7718_p4, %p7891_p5 }
 0x6b7   : > { %p7724_p11 = por %p7723_p10, %p7722_p9 }
 0x6b8   : > { %p7720_p8 = pneg %p7719_p7 }
 0x6b9   : > { %p7726_p13 = por %p7725_p12, %p7724_p11 }
 0x6bb   : > { %p7727_p0 = pnand %p7726_p13, %p7720_p8 }
 0x6bd   : > { %7730 = shalt.err (!%p7727_p0)
}
 0x6be   : > { %s7771_s17 = smov 128   ;;  %s7772_s0 = smov 8  }
 0x6bf   : > { %7367 = dma.vmem_to_hbm [thread:$0]  (%p7891_p5), %s10450_s27, 4096, %s10448_s16, %s10456_s22, %s7771_s17, %s7771_s17, %s7772_s0  }
 0x6c0 PF: > { %p7373_p1 = scmp.ge.s32.totalorder %s7765_s21, 2  ;;  %s5768_s1 = sand.u32 1, %s7753_s18  }
 0x6c1   : > { %s5769_s30 = scalar_lea.sflag [#allocation4], %s5768_s1 }
 0x6c2   : > { %p7370_p2 = pnand %p7373_p1, %p7895_p6 }
 0x6c4   : > { %7748 = dma.done.wait (!%p7370_p2), %s5769_s30, 4096  }
 0x6c5   : > { %7750 = vsyncadd (!%p7370_p2), %s5769_s30, 4294963200  ;;  %s10723_s20 = sld [smem:[#allocation6_spill]]  ;;  %s10724_s26 = sld [smem:[#allocation7_spill]] }
 0x6c6   : > { %p25_p3 = scmp.ge.s32.totalorder %s7878_s24, 4   ;;  %s10725_s18 = smov %s7757_s19 }
 0x6c7   : > { %s10728_s21 = smov %s7878_s24 }
 0x6c8   :  { %27 = sbr.rel (!%p25_p3) target bundleno = 6 (0x6), region = 135 }
 0x6cb   : > { %s10726_s19 = smov %s10723_s20  ;;  %s10727_s20 = smov %s10724_s26 }
 0x6cf   :  { %5774 = vsyncpa [#allocation4], 1 }
 0x6d0   :  { %5776 = vsyncpa [#allocation4 + $0x1], 1 }

</bundles_post_ra>
